<compile_context>
chip_gen: v5e
topology: v5e:2x2
jax: 0.10.0
libtpu: 0.0.40
codegen_flags: <defaults>
</compile_context>

<pallas_src>
import jax
import jax.numpy as jnp
from jax.experimental import pallas as pl
from jax.experimental.pallas import tpu as pltpu


# ---------------------------------------------------------------------------
# Fused Pallas kernel: the entire RealNVP forward for one batch tile
# (feature-major: activations are (features, batch_tile))
# ---------------------------------------------------------------------------
def _realnvp_fwd_kernel(x_ref, mask_ref, w1_ref, b1_ref,
                        sw2_ref, sb2_ref, sw3_ref, sb3_ref,
                        tw2_ref, tb2_ref, tw3_ref, tb3_ref,
                        z_ref, ld_ref):
  num_layers = mask_ref.shape[0]
  hidden = sw2_ref.shape[1]

  z0 = x_ref[...].astype(jnp.float32)                    # (D, tb)
  ld0 = jnp.zeros(ld_ref.shape, jnp.float32)             # (1, tb)

  def layer_body(l, carry):
    z, log_det = carry
    mask = mask_ref[l]                                    # (D, 1)
    inv = 1.0 - mask
    x_masked = z * mask                                   # (D, tb)
    xm = x_masked.astype(jnp.bfloat16)

    # Fused scale/translate first layer: one (2H, D) @ (D, tb) MXU push.
    h1 = jnp.dot(w1_ref[l], xm, preferred_element_type=jnp.float32) + b1_ref[l]
    h1 = jnp.maximum(h1, 0.0).astype(jnp.bfloat16)        # (2H, tb)
    s_h = h1[:hidden]                                     # (H, tb)
    t_h = h1[hidden:]                                     # (H, tb)

    s_h = jnp.maximum(
        jnp.dot(sw2_ref[l], s_h, preferred_element_type=jnp.float32)
        + sb2_ref[l], 0.0).astype(jnp.bfloat16)           # (H, tb)
    t_h = jnp.maximum(
        jnp.dot(tw2_ref[l], t_h, preferred_element_type=jnp.float32)
        + tb2_ref[l], 0.0).astype(jnp.bfloat16)           # (H, tb)

    s = jnp.tanh(
        jnp.dot(sw3_ref[l], s_h, preferred_element_type=jnp.float32)
        + sb3_ref[l]) * inv                               # (D, tb)
    t = (jnp.dot(tw3_ref[l], t_h, preferred_element_type=jnp.float32)
         + tb3_ref[l]) * inv                              # (D, tb)

    # mask is binary -> the extra (1-mask) on t in the PyTorch code is a no-op.
    z_new = x_masked + inv * z * jnp.exp(s) + t
    log_det_new = log_det + jnp.sum(s, axis=0, keepdims=True)
    return z_new, log_det_new

  carry = (z0, ld0)
  if num_layers <= 8:
    # Small L: static unroll (LLO scheduler sees everything).
    for l in range(num_layers):
      carry = layer_body(l, carry)
  else:
    # Large L: bound live ranges; stacked weights are indexed dynamically.
    carry = jax.lax.fori_loop(0, num_layers, layer_body, carry)

  z, log_det = carry
  z_ref[...] = z.astype(z_ref.dtype)
  ld_ref[...] = log_det.astype(ld_ref.dtype)


# ---------------------------------------------------------------------------
# Wrapper helpers
# ---------------------------------------------------------------------------
def _round_up(n, m):
  return ((n + m - 1) // m) * m


def _resident_spec(shape):
  """Constant-index, single-buffered BlockSpec: DMA'd once, stays resident."""
  zeros = (0,) * len(shape)
  return pl.BlockSpec(shape, lambda *_, _z=zeros: _z,
                      pipeline_mode=pl.Buffered(1))


def _padded_bytes(shape, dtype):
  s = list(shape)
  if len(s) >= 1:
    s[-1] = _round_up(s[-1], 128)
  if len(s) >= 2:
    s[-2] = _round_up(s[-2], 8)
  n = 1
  for d in s:
    n *= int(d)
  return n * jnp.dtype(dtype).itemsize


def prepare_params(params):
  """One-time layout prep: feature-major transpose, s/t layer-1 fusion, bf16."""
  def t(a):
    return jnp.swapaxes(a, 1, 2)
  bf = jnp.bfloat16
  return {
      "mask": t(params["mask"]).astype(jnp.float32),                  # (L, D, 1)
      "w1": jnp.concatenate([t(params["sw1"]), t(params["tw1"])],
                            axis=1).astype(bf),                       # (L, 2H, D)
      "b1": jnp.concatenate([t(params["sb1"]), t(params["tb1"])],
                            axis=1).astype(jnp.float32),              # (L, 2H, 1)
      "sw2": t(params["sw2"]).astype(bf), "sb2": t(params["sb2"]).astype(jnp.float32),
      "sw3": t(params["sw3"]).astype(bf), "sb3": t(params["sb3"]).astype(jnp.float32),
      "tw2": t(params["tw2"]).astype(bf), "tb2": t(params["tb2"]).astype(jnp.float32),
      "tw3": t(params["tw3"]).astype(bf), "tb3": t(params["tb3"]).astype(jnp.float32),
  }


def realnvp_forward(kparams, x, *, block_b=256):
  """RealNVP.forward.  x: (B, D) f32 -> (z: (B, D) f32, log_det: (B,) f32)."""
  B, D = x.shape
  # Batch lives on the 128-lane axis -> tile must be a multiple of 128.
  tb = max(128, min(_round_up(block_b, 128), _round_up(B, 128)))
  Bp = _round_up(B, tb)

  xT = x.T                                                            # (D, B)
  if Bp != B:
    xT = jnp.pad(xT, ((0, 0), (0, Bp - B)))                           # (D, Bp)

  order = ("mask", "w1", "b1", "sw2", "sb2", "sw3", "sb3",
           "tw2", "tb2", "tw3", "tb3")
  args = [xT] + [kparams[k] for k in order]
  in_specs = [pl.BlockSpec((D, tb), lambda i: (0, i))]
  in_specs += [_resident_spec(kparams[k].shape) for k in order]

  # Explicit VMEM budget: resident weights + activations + pipelined I/O.
  twoH = kparams["w1"].shape[1]
  resident = sum(_padded_bytes(kparams[k].shape, kparams[k].dtype) for k in order)
  act = 10 * twoH * tb * 4                       # generous activation estimate
  io = 2 * 2 * (_padded_bytes((D, tb), jnp.float32)
                + _padded_bytes((1, tb), jnp.float32))
  vmem_limit = int(min(max(resident + act + io + (8 << 20), 32 << 20), 48 << 20))

  z_pad, ld_pad = pl.pallas_call(
      _realnvp_fwd_kernel,
      grid=(Bp // tb,),
      in_specs=in_specs,
      out_specs=[pl.BlockSpec((D, tb), lambda i: (0, i)),
                 pl.BlockSpec((1, tb), lambda i: (0, i))],
      out_shape=(jax.ShapeDtypeStruct((D, Bp), jnp.float32),
                 jax.ShapeDtypeStruct((1, Bp), jnp.float32)),
      compiler_params=pltpu.CompilerParams(
          dimension_semantics=("parallel",),
          vmem_limit_bytes=vmem_limit),
  )(*args)

  return z_pad[:, :B].T, ld_pad[0, :B]


# ---------------------------------------------------------------------------
# Pure-JAX reference (mirrors the kernel's bf16-matmul numerics)
# ---------------------------------------------------------------------------
def realnvp_forward_ref(params, x):
  def mlp(xm, w1, b1, w2, b2, w3, b3):
    h = jnp.dot(xm.astype(jnp.bfloat16), w1.astype(jnp.bfloat16),
                preferred_element_type=jnp.float32) + b1
    h = jnp.maximum(h, 0.0)
    h = jnp.dot(h.astype(jnp.bfloat16), w2.astype(jnp.bfloat16),
                preferred_element_type=jnp.float32) + b2
    h = jnp.maximum(h, 0.0)
    return jnp.dot(h.astype(jnp.bfloat16), w3.astype(jnp.bfloat16),
                   preferred_element_type=jnp.float32) + b3

  z = x
  log_det = jnp.zeros((x.shape[0],), jnp.float32)
  for l in range(params["mask"].shape[0]):
    mask = params["mask"][l]                 # (1, D)
    inv = 1.0 - mask
    xm = z * mask
    s = jnp.tanh(mlp(xm, params["sw1"][l], params["sb1"][l],
                     params["sw2"][l], params["sb2"][l],
                     params["sw3"][l], params["sb3"][l])) * inv
    t = mlp(xm, params["tw1"][l], params["tb1"][l],
            params["tw2"][l], params["tb2"][l],
            params["tw3"][l], params["tb3"][l]) * inv
    z = xm + inv * (z * jnp.exp(s) + t)
    log_det = log_det + jnp.sum(s, axis=1)
  return z, log_det


# ---------------------------------------------------------------------------
# Deterministic parameter construction (mirrors RealNVP.__init__ shapes)
# ---------------------------------------------------------------------------
def init_params(key, num_coupling_layers, input_dim, hidden_dim):
  def linear(k, fan_in, fan_out):
    kw, kb = jax.random.split(k)
    bound = float(fan_in) ** -0.5            # nn.Linear default init range
    w = jax.random.uniform(kw, (fan_in, fan_out), jnp.float32, -bound, bound)
    b = jax.random.uniform(kb, (1, fan_out), jnp.float32, -bound, bound)
    return w, b

  dims = [(input_dim, hidden_dim), (hidden_dim, hidden_dim), (hidden_dim, input_dim)]
  names = ("sw1", "sb1", "sw2", "sb2", "sw3", "sb3",
           "tw1", "tb1", "tw2", "tb2", "tw3", "tb3")
  acc = {n: [] for n in names}
  masks = []

  mask = jnp.zeros((input_dim,), jnp.float32).at[::2].set(1.0)  # mask[::2] = 1
  for _ in range(num_coupling_layers):
    for net in ("s", "t"):
      for j, (fi, fo) in enumerate(dims, start=1):
        key, sub = jax.random.split(key)
        w, b = linear(sub, fi, fo)
        acc[f"{net}w{j}"].append(w)
        acc[f"{net}b{j}"].append(b)
    masks.append(mask.reshape(1, input_dim))
    mask = 1.0 - mask                                           # flip per layer

  params = {n: jnp.stack(v) for n, v in acc.items()}            # (L, ...) stacks
  params["mask"] = jnp.stack(masks)                             # (L, 1, D)
  return params


# ---------------------------------------------------------------------------
if __name__ == "__main__":
  num_coupling_layers = 4
  input_dim = 8
  # Demo-small hidden; module default is 512.  On v6e/v7x use a multiple of
  # 256 in production to feed the full 256x256 MXU.
  hidden_dim = 128
  batch = 8

  key = jax.random.PRNGKey(0)
  key, kx = jax.random.split(key)
  x = jax.random.normal(kx, (batch, input_dim), jnp.float32)

  params = init_params(key, num_coupling_layers, input_dim, hidden_dim)
  kparams = prepare_params(params)        # one-time transpose / fuse / bf16 cast

  fwd = jax.jit(realnvp_forward)
  z, log_det = fwd(kparams, x)
  z = jax.block_until_ready(z)
  log_det = jax.block_until_ready(log_det)

  assert z.shape == (batch, input_dim), z.shape
  assert log_det.shape == (batch,), log_det.shape

  z_ref, ld_ref = realnvp_forward_ref(params, x)
  assert jnp.allclose(z, z_ref, rtol=1e-2, atol=1e-2), \
      float(jnp.max(jnp.abs(z - z_ref)))
  assert jnp.allclose(log_det, ld_ref, rtol=1e-2, atol=1e-2), \
      float(jnp.max(jnp.abs(log_det - ld_ref)))

  print("KERNEL_OK")
</pallas_src>

<mosaic_0001>
module attributes {stable_mosaic.version = 11 : i64} {
  func.func @_realnvp_fwd_kernel(%arg0: i32, %arg1: memref<8x128xf32, #tpu.memory_space<vmem>>, %arg2: memref<4x8x1xf32, #tpu.memory_space<vmem>>, %arg3: memref<4x256x8xbf16, #tpu.memory_space<vmem>>, %arg4: memref<4x256x1xf32, #tpu.memory_space<vmem>>, %arg5: memref<4x128x128xbf16, #tpu.memory_space<vmem>>, %arg6: memref<4x128x1xf32, #tpu.memory_space<vmem>>, %arg7: memref<4x8x128xbf16, #tpu.memory_space<vmem>>, %arg8: memref<4x8x1xf32, #tpu.memory_space<vmem>>, %arg9: memref<4x128x128xbf16, #tpu.memory_space<vmem>>, %arg10: memref<4x128x1xf32, #tpu.memory_space<vmem>>, %arg11: memref<4x8x128xbf16, #tpu.memory_space<vmem>>, %arg12: memref<4x8x1xf32, #tpu.memory_space<vmem>>, %arg13: memref<8x128xf32, #tpu.memory_space<vmem>>, %arg14: memref<1x128xf32, #tpu.memory_space<vmem>>) attributes {dimension_semantics = [#tpu.dimension_semantics<parallel>], iteration_bounds = array<i64: 1>, scalar_prefetch = 0 : i64, scratch_operands = 0 : i64, tpu.core_type = #tpu.core_type<tc>, window_params = [{transform_indices = @transform_0, window_bounds = array<i64: 8, 128>}, {pipeline_mode = #tpu.pipeline_mode<synchronous>, transform_indices = @transform_1, window_bounds = array<i64: 4, 8, 1>}, {pipeline_mode = #tpu.pipeline_mode<synchronous>, transform_indices = @transform_2, window_bounds = array<i64: 4, 256, 8>}, {pipeline_mode = #tpu.pipeline_mode<synchronous>, transform_indices = @transform_3, window_bounds = array<i64: 4, 256, 1>}, {pipeline_mode = #tpu.pipeline_mode<synchronous>, transform_indices = @transform_4, window_bounds = array<i64: 4, 128, 128>}, {pipeline_mode = #tpu.pipeline_mode<synchronous>, transform_indices = @transform_5, window_bounds = array<i64: 4, 128, 1>}, {pipeline_mode = #tpu.pipeline_mode<synchronous>, transform_indices = @transform_6, window_bounds = array<i64: 4, 8, 128>}, {pipeline_mode = #tpu.pipeline_mode<synchronous>, transform_indices = @transform_7, window_bounds = array<i64: 4, 8, 1>}, {pipeline_mode = #tpu.pipeline_mode<synchronous>, transform_indices = @transform_8, window_bounds = array<i64: 4, 128, 128>}, {pipeline_mode = #tpu.pipeline_mode<synchronous>, transform_indices = @transform_9, window_bounds = array<i64: 4, 128, 1>}, {pipeline_mode = #tpu.pipeline_mode<synchronous>, transform_indices = @transform_10, window_bounds = array<i64: 4, 8, 128>}, {pipeline_mode = #tpu.pipeline_mode<synchronous>, transform_indices = @transform_11, window_bounds = array<i64: 4, 8, 1>}, {transform_indices = @transform_12, window_bounds = array<i64: 8, 128>}, {transform_indices = @transform_13, window_bounds = array<i64: 1, 128>}]} {
    %c0 = arith.constant 0 : index
    %c0_0 = arith.constant 0 : index
    %0 = vector.load %arg1[%c0, %c0_0] : memref<8x128xf32, #tpu.memory_space<vmem>>, vector<8x128xf32>
    %cst = arith.constant 0.000000e+00 : f32
    %1 = vector.broadcast %cst : f32 to vector<1x128xf32>
    %c0_1 = arith.constant 0 : index
    %c0_2 = arith.constant 0 : index
    %c0_3 = arith.constant 0 : index
    %2 = vector.load %arg2[%c0_1, %c0_2, %c0_3] : memref<4x8x1xf32, #tpu.memory_space<vmem>>, vector<1x8x1xf32>
    %3 = vector.shape_cast %2 : vector<1x8x1xf32> to vector<8x1xf32>
    %cst_4 = arith.constant 1.000000e+00 : f32
    %4 = vector.broadcast %cst_4 : f32 to vector<8x1xf32>
    %5 = arith.subf %4, %3 : vector<8x1xf32>
    %6 = vector.broadcast %3 : vector<8x1xf32> to vector<8x128xf32>
    %7 = arith.mulf %0, %6 : vector<8x128xf32>
    %8 = arith.truncf %7 : vector<8x128xf32> to vector<8x128xbf16>
    %c0_5 = arith.constant 0 : index
    %c0_6 = arith.constant 0 : index
    %c0_7 = arith.constant 0 : index
    %9 = vector.load %arg3[%c0_5, %c0_6, %c0_7] : memref<4x256x8xbf16, #tpu.memory_space<vmem>>, vector<1x256x8xbf16>
    %10 = vector.shape_cast %9 : vector<1x256x8xbf16> to vector<256x8xbf16>
    %cst_8 = arith.constant dense<0.000000e+00> : vector<256x128xf32>
    %11 = tpu.matmul %10, %8, %cst_8 {dimension_numbers = #tpu.dot_dimension_numbers<[1], [0], [0], [1], [0, 0, 1, 1], [], []>} : vector<256x8xbf16>, vector<8x128xbf16>, vector<256x128xf32> -> vector<256x128xf32>
    %c0_9 = arith.constant 0 : index
    %c0_10 = arith.constant 0 : index
    %c0_11 = arith.constant 0 : index
    %12 = vector.load %arg4[%c0_9, %c0_10, %c0_11] : memref<4x256x1xf32, #tpu.memory_space<vmem>>, vector<1x256x1xf32>
    %13 = vector.shape_cast %12 : vector<1x256x1xf32> to vector<256x1xf32>
    %14 = vector.broadcast %13 : vector<256x1xf32> to vector<256x128xf32>
    %15 = arith.addf %11, %14 : vector<256x128xf32>
    %cst_12 = arith.constant 0.000000e+00 : f32
    %16 = vector.broadcast %cst_12 : f32 to vector<256x128xf32>
    %17 = arith.maximumf %15, %16 : vector<256x128xf32>
    %18 = arith.truncf %17 : vector<256x128xf32> to vector<256x128xbf16>
    %19 = vector.extract_strided_slice %18 {offsets = [0, 0], sizes = [128, 128], strides = [1, 1]} : vector<256x128xbf16> to vector<128x128xbf16>
    %20 = vector.extract_strided_slice %18 {offsets = [128, 0], sizes = [128, 128], strides = [1, 1]} : vector<256x128xbf16> to vector<128x128xbf16>
    %c0_13 = arith.constant 0 : index
    %c0_14 = arith.constant 0 : index
    %c0_15 = arith.constant 0 : index
    %21 = vector.load %arg5[%c0_13, %c0_14, %c0_15] : memref<4x128x128xbf16, #tpu.memory_space<vmem>>, vector<1x128x128xbf16>
    %22 = vector.shape_cast %21 : vector<1x128x128xbf16> to vector<128x128xbf16>
    %cst_16 = arith.constant dense<0.000000e+00> : vector<128x128xf32>
    %23 = tpu.matmul %22, %19, %cst_16 {dimension_numbers = #tpu.dot_dimension_numbers<[1], [0], [0], [1], [0, 0, 1, 1], [], []>} : vector<128x128xbf16>, vector<128x128xbf16>, vector<128x128xf32> -> vector<128x128xf32>
    %c0_17 = arith.constant 0 : index
    %c0_18 = arith.constant 0 : index
    %c0_19 = arith.constant 0 : index
    %24 = vector.load %arg6[%c0_17, %c0_18, %c0_19] : memref<4x128x1xf32, #tpu.memory_space<vmem>>, vector<1x128x1xf32>
    %25 = vector.shape_cast %24 : vector<1x128x1xf32> to vector<128x1xf32>
    %26 = vector.broadcast %25 : vector<128x1xf32> to vector<128x128xf32>
    %27 = arith.addf %23, %26 : vector<128x128xf32>
    %cst_20 = arith.constant 0.000000e+00 : f32
    %28 = vector.broadcast %cst_20 : f32 to vector<128x128xf32>
    %29 = arith.maximumf %27, %28 : vector<128x128xf32>
    %30 = arith.truncf %29 : vector<128x128xf32> to vector<128x128xbf16>
    %c0_21 = arith.constant 0 : index
    %c0_22 = arith.constant 0 : index
    %c0_23 = arith.constant 0 : index
    %31 = vector.load %arg9[%c0_21, %c0_22, %c0_23] : memref<4x128x128xbf16, #tpu.memory_space<vmem>>, vector<1x128x128xbf16>
    %32 = vector.shape_cast %31 : vector<1x128x128xbf16> to vector<128x128xbf16>
    %cst_24 = arith.constant dense<0.000000e+00> : vector<128x128xf32>
    %33 = tpu.matmul %32, %20, %cst_24 {dimension_numbers = #tpu.dot_dimension_numbers<[1], [0], [0], [1], [0, 0, 1, 1], [], []>} : vector<128x128xbf16>, vector<128x128xbf16>, vector<128x128xf32> -> vector<128x128xf32>
    %c0_25 = arith.constant 0 : index
    %c0_26 = arith.constant 0 : index
    %c0_27 = arith.constant 0 : index
    %34 = vector.load %arg10[%c0_25, %c0_26, %c0_27] : memref<4x128x1xf32, #tpu.memory_space<vmem>>, vector<1x128x1xf32>
    %35 = vector.shape_cast %34 : vector<1x128x1xf32> to vector<128x1xf32>
    %36 = vector.broadcast %35 : vector<128x1xf32> to vector<128x128xf32>
    %37 = arith.addf %33, %36 : vector<128x128xf32>
    %cst_28 = arith.constant 0.000000e+00 : f32
    %38 = vector.broadcast %cst_28 : f32 to vector<128x128xf32>
    %39 = arith.maximumf %37, %38 : vector<128x128xf32>
    %40 = arith.truncf %39 : vector<128x128xf32> to vector<128x128xbf16>
    %c0_29 = arith.constant 0 : index
    %c0_30 = arith.constant 0 : index
    %c0_31 = arith.constant 0 : index
    %41 = vector.load %arg7[%c0_29, %c0_30, %c0_31] : memref<4x8x128xbf16, #tpu.memory_space<vmem>>, vector<1x8x128xbf16>
    %42 = vector.shape_cast %41 : vector<1x8x128xbf16> to vector<8x128xbf16>
    %cst_32 = arith.constant dense<0.000000e+00> : vector<8x128xf32>
    %43 = tpu.matmul %42, %30, %cst_32 {dimension_numbers = #tpu.dot_dimension_numbers<[1], [0], [0], [1], [0, 0, 1, 1], [], []>} : vector<8x128xbf16>, vector<128x128xbf16>, vector<8x128xf32> -> vector<8x128xf32>
    %c0_33 = arith.constant 0 : index
    %c0_34 = arith.constant 0 : index
    %c0_35 = arith.constant 0 : index
    %44 = vector.load %arg8[%c0_33, %c0_34, %c0_35] : memref<4x8x1xf32, #tpu.memory_space<vmem>>, vector<1x8x1xf32>
    %45 = vector.shape_cast %44 : vector<1x8x1xf32> to vector<8x1xf32>
    %46 = vector.broadcast %45 : vector<8x1xf32> to vector<8x128xf32>
    %47 = arith.addf %43, %46 : vector<8x128xf32>
    %48 = math.tanh %47 : vector<8x128xf32>
    %49 = vector.broadcast %5 : vector<8x1xf32> to vector<8x128xf32>
    %50 = arith.mulf %48, %49 : vector<8x128xf32>
    %c0_36 = arith.constant 0 : index
    %c0_37 = arith.constant 0 : index
    %c0_38 = arith.constant 0 : index
    %51 = vector.load %arg11[%c0_36, %c0_37, %c0_38] : memref<4x8x128xbf16, #tpu.memory_space<vmem>>, vector<1x8x128xbf16>
    %52 = vector.shape_cast %51 : vector<1x8x128xbf16> to vector<8x128xbf16>
    %cst_39 = arith.constant dense<0.000000e+00> : vector<8x128xf32>
    %53 = tpu.matmul %52, %40, %cst_39 {dimension_numbers = #tpu.dot_dimension_numbers<[1], [0], [0], [1], [0, 0, 1, 1], [], []>} : vector<8x128xbf16>, vector<128x128xbf16>, vector<8x128xf32> -> vector<8x128xf32>
    %c0_40 = arith.constant 0 : index
    %c0_41 = arith.constant 0 : index
    %c0_42 = arith.constant 0 : index
    %54 = vector.load %arg12[%c0_40, %c0_41, %c0_42] : memref<4x8x1xf32, #tpu.memory_space<vmem>>, vector<1x8x1xf32>
    %55 = vector.shape_cast %54 : vector<1x8x1xf32> to vector<8x1xf32>
    %56 = vector.broadcast %55 : vector<8x1xf32> to vector<8x128xf32>
    %57 = arith.addf %53, %56 : vector<8x128xf32>
    %58 = vector.broadcast %5 : vector<8x1xf32> to vector<8x128xf32>
    %59 = arith.mulf %57, %58 : vector<8x128xf32>
    %60 = vector.broadcast %5 : vector<8x1xf32> to vector<8x128xf32>
    %61 = arith.mulf %60, %0 : vector<8x128xf32>
    %62 = math.exp %50 : vector<8x128xf32>
    %63 = arith.mulf %61, %62 : vector<8x128xf32>
    %64 = arith.addf %7, %63 : vector<8x128xf32>
    %65 = arith.addf %64, %59 : vector<8x128xf32>
    %cst_43 = arith.constant dense<0.000000e+00> : vector<128xf32>
    %66 = vector.multi_reduction <add>, %50, %cst_43 [0] : vector<8x128xf32> to vector<128xf32>
    %67 = vector.shape_cast %66 : vector<128xf32> to vector<1x128xf32>
    %68 = arith.addf %1, %67 : vector<1x128xf32>
    %c1 = arith.constant 1 : index
    %c0_44 = arith.constant 0 : index
    %c0_45 = arith.constant 0 : index
    %69 = vector.load %arg2[%c1, %c0_44, %c0_45] : memref<4x8x1xf32, #tpu.memory_space<vmem>>, vector<1x8x1xf32>
    %70 = vector.shape_cast %69 : vector<1x8x1xf32> to vector<8x1xf32>
    %cst_46 = arith.constant 1.000000e+00 : f32
    %71 = vector.broadcast %cst_46 : f32 to vector<8x1xf32>
    %72 = arith.subf %71, %70 : vector<8x1xf32>
    %73 = vector.broadcast %70 : vector<8x1xf32> to vector<8x128xf32>
    %74 = arith.mulf %65, %73 : vector<8x128xf32>
    %75 = arith.truncf %74 : vector<8x128xf32> to vector<8x128xbf16>
    %c1_47 = arith.constant 1 : index
    %c0_48 = arith.constant 0 : index
    %c0_49 = arith.constant 0 : index
    %76 = vector.load %arg3[%c1_47, %c0_48, %c0_49] : memref<4x256x8xbf16, #tpu.memory_space<vmem>>, vector<1x256x8xbf16>
    %77 = vector.shape_cast %76 : vector<1x256x8xbf16> to vector<256x8xbf16>
    %cst_50 = arith.constant dense<0.000000e+00> : vector<256x128xf32>
    %78 = tpu.matmul %77, %75, %cst_50 {dimension_numbers = #tpu.dot_dimension_numbers<[1], [0], [0], [1], [0, 0, 1, 1], [], []>} : vector<256x8xbf16>, vector<8x128xbf16>, vector<256x128xf32> -> vector<256x128xf32>
    %c1_51 = arith.constant 1 : index
    %c0_52 = arith.constant 0 : index
    %c0_53 = arith.constant 0 : index
    %79 = vector.load %arg4[%c1_51, %c0_52, %c0_53] : memref<4x256x1xf32, #tpu.memory_space<vmem>>, vector<1x256x1xf32>
    %80 = vector.shape_cast %79 : vector<1x256x1xf32> to vector<256x1xf32>
    %81 = vector.broadcast %80 : vector<256x1xf32> to vector<256x128xf32>
    %82 = arith.addf %78, %81 : vector<256x128xf32>
    %cst_54 = arith.constant 0.000000e+00 : f32
    %83 = vector.broadcast %cst_54 : f32 to vector<256x128xf32>
    %84 = arith.maximumf %82, %83 : vector<256x128xf32>
    %85 = arith.truncf %84 : vector<256x128xf32> to vector<256x128xbf16>
    %86 = vector.extract_strided_slice %85 {offsets = [0, 0], sizes = [128, 128], strides = [1, 1]} : vector<256x128xbf16> to vector<128x128xbf16>
    %87 = vector.extract_strided_slice %85 {offsets = [128, 0], sizes = [128, 128], strides = [1, 1]} : vector<256x128xbf16> to vector<128x128xbf16>
    %c1_55 = arith.constant 1 : index
    %c0_56 = arith.constant 0 : index
    %c0_57 = arith.constant 0 : index
    %88 = vector.load %arg5[%c1_55, %c0_56, %c0_57] : memref<4x128x128xbf16, #tpu.memory_space<vmem>>, vector<1x128x128xbf16>
    %89 = vector.shape_cast %88 : vector<1x128x128xbf16> to vector<128x128xbf16>
    %cst_58 = arith.constant dense<0.000000e+00> : vector<128x128xf32>
    %90 = tpu.matmul %89, %86, %cst_58 {dimension_numbers = #tpu.dot_dimension_numbers<[1], [0], [0], [1], [0, 0, 1, 1], [], []>} : vector<128x128xbf16>, vector<128x128xbf16>, vector<128x128xf32> -> vector<128x128xf32>
    %c1_59 = arith.constant 1 : index
    %c0_60 = arith.constant 0 : index
    %c0_61 = arith.constant 0 : index
    %91 = vector.load %arg6[%c1_59, %c0_60, %c0_61] : memref<4x128x1xf32, #tpu.memory_space<vmem>>, vector<1x128x1xf32>
    %92 = vector.shape_cast %91 : vector<1x128x1xf32> to vector<128x1xf32>
    %93 = vector.broadcast %92 : vector<128x1xf32> to vector<128x128xf32>
    %94 = arith.addf %90, %93 : vector<128x128xf32>
    %cst_62 = arith.constant 0.000000e+00 : f32
    %95 = vector.broadcast %cst_62 : f32 to vector<128x128xf32>
    %96 = arith.maximumf %94, %95 : vector<128x128xf32>
    %97 = arith.truncf %96 : vector<128x128xf32> to vector<128x128xbf16>
    %c1_63 = arith.constant 1 : index
    %c0_64 = arith.constant 0 : index
    %c0_65 = arith.constant 0 : index
    %98 = vector.load %arg9[%c1_63, %c0_64, %c0_65] : memref<4x128x128xbf16, #tpu.memory_space<vmem>>, vector<1x128x128xbf16>
    %99 = vector.shape_cast %98 : vector<1x128x128xbf16> to vector<128x128xbf16>
    %cst_66 = arith.constant dense<0.000000e+00> : vector<128x128xf32>
    %100 = tpu.matmul %99, %87, %cst_66 {dimension_numbers = #tpu.dot_dimension_numbers<[1], [0], [0], [1], [0, 0, 1, 1], [], []>} : vector<128x128xbf16>, vector<128x128xbf16>, vector<128x128xf32> -> vector<128x128xf32>
    %c1_67 = arith.constant 1 : index
    %c0_68 = arith.constant 0 : index
    %c0_69 = arith.constant 0 : index
    %101 = vector.load %arg10[%c1_67, %c0_68, %c0_69] : memref<4x128x1xf32, #tpu.memory_space<vmem>>, vector<1x128x1xf32>
    %102 = vector.shape_cast %101 : vector<1x128x1xf32> to vector<128x1xf32>
    %103 = vector.broadcast %102 : vector<128x1xf32> to vector<128x128xf32>
    %104 = arith.addf %100, %103 : vector<128x128xf32>
    %cst_70 = arith.constant 0.000000e+00 : f32
    %105 = vector.broadcast %cst_70 : f32 to vector<128x128xf32>
    %106 = arith.maximumf %104, %105 : vector<128x128xf32>
    %107 = arith.truncf %106 : vector<128x128xf32> to vector<128x128xbf16>
    %c1_71 = arith.constant 1 : index
    %c0_72 = arith.constant 0 : index
    %c0_73 = arith.constant 0 : index
    %108 = vector.load %arg7[%c1_71, %c0_72, %c0_73] : memref<4x8x128xbf16, #tpu.memory_space<vmem>>, vector<1x8x128xbf16>
    %109 = vector.shape_cast %108 : vector<1x8x128xbf16> to vector<8x128xbf16>
    %cst_74 = arith.constant dense<0.000000e+00> : vector<8x128xf32>
    %110 = tpu.matmul %109, %97, %cst_74 {dimension_numbers = #tpu.dot_dimension_numbers<[1], [0], [0], [1], [0, 0, 1, 1], [], []>} : vector<8x128xbf16>, vector<128x128xbf16>, vector<8x128xf32> -> vector<8x128xf32>
    %c1_75 = arith.constant 1 : index
    %c0_76 = arith.constant 0 : index
    %c0_77 = arith.constant 0 : index
    %111 = vector.load %arg8[%c1_75, %c0_76, %c0_77] : memref<4x8x1xf32, #tpu.memory_space<vmem>>, vector<1x8x1xf32>
    %112 = vector.shape_cast %111 : vector<1x8x1xf32> to vector<8x1xf32>
    %113 = vector.broadcast %112 : vector<8x1xf32> to vector<8x128xf32>
    %114 = arith.addf %110, %113 : vector<8x128xf32>
    %115 = math.tanh %114 : vector<8x128xf32>
    %116 = vector.broadcast %72 : vector<8x1xf32> to vector<8x128xf32>
    %117 = arith.mulf %115, %116 : vector<8x128xf32>
    %c1_78 = arith.constant 1 : index
    %c0_79 = arith.constant 0 : index
    %c0_80 = arith.constant 0 : index
    %118 = vector.load %arg11[%c1_78, %c0_79, %c0_80] : memref<4x8x128xbf16, #tpu.memory_space<vmem>>, vector<1x8x128xbf16>
    %119 = vector.shape_cast %118 : vector<1x8x128xbf16> to vector<8x128xbf16>
    %cst_81 = arith.constant dense<0.000000e+00> : vector<8x128xf32>
    %120 = tpu.matmul %119, %107, %cst_81 {dimension_numbers = #tpu.dot_dimension_numbers<[1], [0], [0], [1], [0, 0, 1, 1], [], []>} : vector<8x128xbf16>, vector<128x128xbf16>, vector<8x128xf32> -> vector<8x128xf32>
    %c1_82 = arith.constant 1 : index
    %c0_83 = arith.constant 0 : index
    %c0_84 = arith.constant 0 : index
    %121 = vector.load %arg12[%c1_82, %c0_83, %c0_84] : memref<4x8x1xf32, #tpu.memory_space<vmem>>, vector<1x8x1xf32>
    %122 = vector.shape_cast %121 : vector<1x8x1xf32> to vector<8x1xf32>
    %123 = vector.broadcast %122 : vector<8x1xf32> to vector<8x128xf32>
    %124 = arith.addf %120, %123 : vector<8x128xf32>
    %125 = vector.broadcast %72 : vector<8x1xf32> to vector<8x128xf32>
    %126 = arith.mulf %124, %125 : vector<8x128xf32>
    %127 = vector.broadcast %72 : vector<8x1xf32> to vector<8x128xf32>
    %128 = arith.mulf %127, %65 : vector<8x128xf32>
    %129 = math.exp %117 : vector<8x128xf32>
    %130 = arith.mulf %128, %129 : vector<8x128xf32>
    %131 = arith.addf %74, %130 : vector<8x128xf32>
    %132 = arith.addf %131, %126 : vector<8x128xf32>
    %cst_85 = arith.constant dense<0.000000e+00> : vector<128xf32>
    %133 = vector.multi_reduction <add>, %117, %cst_85 [0] : vector<8x128xf32> to vector<128xf32>
    %134 = vector.shape_cast %133 : vector<128xf32> to vector<1x128xf32>
    %135 = arith.addf %68, %134 : vector<1x128xf32>
    %c2 = arith.constant 2 : index
    %c0_86 = arith.constant 0 : index
    %c0_87 = arith.constant 0 : index
    %136 = vector.load %arg2[%c2, %c0_86, %c0_87] : memref<4x8x1xf32, #tpu.memory_space<vmem>>, vector<1x8x1xf32>
    %137 = vector.shape_cast %136 : vector<1x8x1xf32> to vector<8x1xf32>
    %cst_88 = arith.constant 1.000000e+00 : f32
    %138 = vector.broadcast %cst_88 : f32 to vector<8x1xf32>
    %139 = arith.subf %138, %137 : vector<8x1xf32>
    %140 = vector.broadcast %137 : vector<8x1xf32> to vector<8x128xf32>
    %141 = arith.mulf %132, %140 : vector<8x128xf32>
    %142 = arith.truncf %141 : vector<8x128xf32> to vector<8x128xbf16>
    %c2_89 = arith.constant 2 : index
    %c0_90 = arith.constant 0 : index
    %c0_91 = arith.constant 0 : index
    %143 = vector.load %arg3[%c2_89, %c0_90, %c0_91] : memref<4x256x8xbf16, #tpu.memory_space<vmem>>, vector<1x256x8xbf16>
    %144 = vector.shape_cast %143 : vector<1x256x8xbf16> to vector<256x8xbf16>
    %cst_92 = arith.constant dense<0.000000e+00> : vector<256x128xf32>
    %145 = tpu.matmul %144, %142, %cst_92 {dimension_numbers = #tpu.dot_dimension_numbers<[1], [0], [0], [1], [0, 0, 1, 1], [], []>} : vector<256x8xbf16>, vector<8x128xbf16>, vector<256x128xf32> -> vector<256x128xf32>
    %c2_93 = arith.constant 2 : index
    %c0_94 = arith.constant 0 : index
    %c0_95 = arith.constant 0 : index
    %146 = vector.load %arg4[%c2_93, %c0_94, %c0_95] : memref<4x256x1xf32, #tpu.memory_space<vmem>>, vector<1x256x1xf32>
    %147 = vector.shape_cast %146 : vector<1x256x1xf32> to vector<256x1xf32>
    %148 = vector.broadcast %147 : vector<256x1xf32> to vector<256x128xf32>
    %149 = arith.addf %145, %148 : vector<256x128xf32>
    %cst_96 = arith.constant 0.000000e+00 : f32
    %150 = vector.broadcast %cst_96 : f32 to vector<256x128xf32>
    %151 = arith.maximumf %149, %150 : vector<256x128xf32>
    %152 = arith.truncf %151 : vector<256x128xf32> to vector<256x128xbf16>
    %153 = vector.extract_strided_slice %152 {offsets = [0, 0], sizes = [128, 128], strides = [1, 1]} : vector<256x128xbf16> to vector<128x128xbf16>
    %154 = vector.extract_strided_slice %152 {offsets = [128, 0], sizes = [128, 128], strides = [1, 1]} : vector<256x128xbf16> to vector<128x128xbf16>
    %c2_97 = arith.constant 2 : index
    %c0_98 = arith.constant 0 : index
    %c0_99 = arith.constant 0 : index
    %155 = vector.load %arg5[%c2_97, %c0_98, %c0_99] : memref<4x128x128xbf16, #tpu.memory_space<vmem>>, vector<1x128x128xbf16>
    %156 = vector.shape_cast %155 : vector<1x128x128xbf16> to vector<128x128xbf16>
    %cst_100 = arith.constant dense<0.000000e+00> : vector<128x128xf32>
    %157 = tpu.matmul %156, %153, %cst_100 {dimension_numbers = #tpu.dot_dimension_numbers<[1], [0], [0], [1], [0, 0, 1, 1], [], []>} : vector<128x128xbf16>, vector<128x128xbf16>, vector<128x128xf32> -> vector<128x128xf32>
    %c2_101 = arith.constant 2 : index
    %c0_102 = arith.constant 0 : index
    %c0_103 = arith.constant 0 : index
    %158 = vector.load %arg6[%c2_101, %c0_102, %c0_103] : memref<4x128x1xf32, #tpu.memory_space<vmem>>, vector<1x128x1xf32>
    %159 = vector.shape_cast %158 : vector<1x128x1xf32> to vector<128x1xf32>
    %160 = vector.broadcast %159 : vector<128x1xf32> to vector<128x128xf32>
    %161 = arith.addf %157, %160 : vector<128x128xf32>
    %cst_104 = arith.constant 0.000000e+00 : f32
    %162 = vector.broadcast %cst_104 : f32 to vector<128x128xf32>
    %163 = arith.maximumf %161, %162 : vector<128x128xf32>
    %164 = arith.truncf %163 : vector<128x128xf32> to vector<128x128xbf16>
    %c2_105 = arith.constant 2 : index
    %c0_106 = arith.constant 0 : index
    %c0_107 = arith.constant 0 : index
    %165 = vector.load %arg9[%c2_105, %c0_106, %c0_107] : memref<4x128x128xbf16, #tpu.memory_space<vmem>>, vector<1x128x128xbf16>
    %166 = vector.shape_cast %165 : vector<1x128x128xbf16> to vector<128x128xbf16>
    %cst_108 = arith.constant dense<0.000000e+00> : vector<128x128xf32>
    %167 = tpu.matmul %166, %154, %cst_108 {dimension_numbers = #tpu.dot_dimension_numbers<[1], [0], [0], [1], [0, 0, 1, 1], [], []>} : vector<128x128xbf16>, vector<128x128xbf16>, vector<128x128xf32> -> vector<128x128xf32>
    %c2_109 = arith.constant 2 : index
    %c0_110 = arith.constant 0 : index
    %c0_111 = arith.constant 0 : index
    %168 = vector.load %arg10[%c2_109, %c0_110, %c0_111] : memref<4x128x1xf32, #tpu.memory_space<vmem>>, vector<1x128x1xf32>
    %169 = vector.shape_cast %168 : vector<1x128x1xf32> to vector<128x1xf32>
    %170 = vector.broadcast %169 : vector<128x1xf32> to vector<128x128xf32>
    %171 = arith.addf %167, %170 : vector<128x128xf32>
    %cst_112 = arith.constant 0.000000e+00 : f32
    %172 = vector.broadcast %cst_112 : f32 to vector<128x128xf32>
    %173 = arith.maximumf %171, %172 : vector<128x128xf32>
    %174 = arith.truncf %173 : vector<128x128xf32> to vector<128x128xbf16>
    %c2_113 = arith.constant 2 : index
    %c0_114 = arith.constant 0 : index
    %c0_115 = arith.constant 0 : index
    %175 = vector.load %arg7[%c2_113, %c0_114, %c0_115] : memref<4x8x128xbf16, #tpu.memory_space<vmem>>, vector<1x8x128xbf16>
    %176 = vector.shape_cast %175 : vector<1x8x128xbf16> to vector<8x128xbf16>
    %cst_116 = arith.constant dense<0.000000e+00> : vector<8x128xf32>
    %177 = tpu.matmul %176, %164, %cst_116 {dimension_numbers = #tpu.dot_dimension_numbers<[1], [0], [0], [1], [0, 0, 1, 1], [], []>} : vector<8x128xbf16>, vector<128x128xbf16>, vector<8x128xf32> -> vector<8x128xf32>
    %c2_117 = arith.constant 2 : index
    %c0_118 = arith.constant 0 : index
    %c0_119 = arith.constant 0 : index
    %178 = vector.load %arg8[%c2_117, %c0_118, %c0_119] : memref<4x8x1xf32, #tpu.memory_space<vmem>>, vector<1x8x1xf32>
    %179 = vector.shape_cast %178 : vector<1x8x1xf32> to vector<8x1xf32>
    %180 = vector.broadcast %179 : vector<8x1xf32> to vector<8x128xf32>
    %181 = arith.addf %177, %180 : vector<8x128xf32>
    %182 = math.tanh %181 : vector<8x128xf32>
    %183 = vector.broadcast %139 : vector<8x1xf32> to vector<8x128xf32>
    %184 = arith.mulf %182, %183 : vector<8x128xf32>
    %c2_120 = arith.constant 2 : index
    %c0_121 = arith.constant 0 : index
    %c0_122 = arith.constant 0 : index
    %185 = vector.load %arg11[%c2_120, %c0_121, %c0_122] : memref<4x8x128xbf16, #tpu.memory_space<vmem>>, vector<1x8x128xbf16>
    %186 = vector.shape_cast %185 : vector<1x8x128xbf16> to vector<8x128xbf16>
    %cst_123 = arith.constant dense<0.000000e+00> : vector<8x128xf32>
    %187 = tpu.matmul %186, %174, %cst_123 {dimension_numbers = #tpu.dot_dimension_numbers<[1], [0], [0], [1], [0, 0, 1, 1], [], []>} : vector<8x128xbf16>, vector<128x128xbf16>, vector<8x128xf32> -> vector<8x128xf32>
    %c2_124 = arith.constant 2 : index
    %c0_125 = arith.constant 0 : index
    %c0_126 = arith.constant 0 : index
    %188 = vector.load %arg12[%c2_124, %c0_125, %c0_126] : memref<4x8x1xf32, #tpu.memory_space<vmem>>, vector<1x8x1xf32>
    %189 = vector.shape_cast %188 : vector<1x8x1xf32> to vector<8x1xf32>
    %190 = vector.broadcast %189 : vector<8x1xf32> to vector<8x128xf32>
    %191 = arith.addf %187, %190 : vector<8x128xf32>
    %192 = vector.broadcast %139 : vector<8x1xf32> to vector<8x128xf32>
    %193 = arith.mulf %191, %192 : vector<8x128xf32>
    %194 = vector.broadcast %139 : vector<8x1xf32> to vector<8x128xf32>
    %195 = arith.mulf %194, %132 : vector<8x128xf32>
    %196 = math.exp %184 : vector<8x128xf32>
    %197 = arith.mulf %195, %196 : vector<8x128xf32>
    %198 = arith.addf %141, %197 : vector<8x128xf32>
    %199 = arith.addf %198, %193 : vector<8x128xf32>
    %cst_127 = arith.constant dense<0.000000e+00> : vector<128xf32>
    %200 = vector.multi_reduction <add>, %184, %cst_127 [0] : vector<8x128xf32> to vector<128xf32>
    %201 = vector.shape_cast %200 : vector<128xf32> to vector<1x128xf32>
    %202 = arith.addf %135, %201 : vector<1x128xf32>
    %c3 = arith.constant 3 : index
    %c0_128 = arith.constant 0 : index
    %c0_129 = arith.constant 0 : index
    %203 = vector.load %arg2[%c3, %c0_128, %c0_129] : memref<4x8x1xf32, #tpu.memory_space<vmem>>, vector<1x8x1xf32>
    %204 = vector.shape_cast %203 : vector<1x8x1xf32> to vector<8x1xf32>
    %cst_130 = arith.constant 1.000000e+00 : f32
    %205 = vector.broadcast %cst_130 : f32 to vector<8x1xf32>
    %206 = arith.subf %205, %204 : vector<8x1xf32>
    %207 = vector.broadcast %204 : vector<8x1xf32> to vector<8x128xf32>
    %208 = arith.mulf %199, %207 : vector<8x128xf32>
    %209 = arith.truncf %208 : vector<8x128xf32> to vector<8x128xbf16>
    %c3_131 = arith.constant 3 : index
    %c0_132 = arith.constant 0 : index
    %c0_133 = arith.constant 0 : index
    %210 = vector.load %arg3[%c3_131, %c0_132, %c0_133] : memref<4x256x8xbf16, #tpu.memory_space<vmem>>, vector<1x256x8xbf16>
    %211 = vector.shape_cast %210 : vector<1x256x8xbf16> to vector<256x8xbf16>
    %cst_134 = arith.constant dense<0.000000e+00> : vector<256x128xf32>
    %212 = tpu.matmul %211, %209, %cst_134 {dimension_numbers = #tpu.dot_dimension_numbers<[1], [0], [0], [1], [0, 0, 1, 1], [], []>} : vector<256x8xbf16>, vector<8x128xbf16>, vector<256x128xf32> -> vector<256x128xf32>
    %c3_135 = arith.constant 3 : index
    %c0_136 = arith.constant 0 : index
    %c0_137 = arith.constant 0 : index
    %213 = vector.load %arg4[%c3_135, %c0_136, %c0_137] : memref<4x256x1xf32, #tpu.memory_space<vmem>>, vector<1x256x1xf32>
    %214 = vector.shape_cast %213 : vector<1x256x1xf32> to vector<256x1xf32>
    %215 = vector.broadcast %214 : vector<256x1xf32> to vector<256x128xf32>
    %216 = arith.addf %212, %215 : vector<256x128xf32>
    %cst_138 = arith.constant 0.000000e+00 : f32
    %217 = vector.broadcast %cst_138 : f32 to vector<256x128xf32>
    %218 = arith.maximumf %216, %217 : vector<256x128xf32>
    %219 = arith.truncf %218 : vector<256x128xf32> to vector<256x128xbf16>
    %220 = vector.extract_strided_slice %219 {offsets = [0, 0], sizes = [128, 128], strides = [1, 1]} : vector<256x128xbf16> to vector<128x128xbf16>
    %221 = vector.extract_strided_slice %219 {offsets = [128, 0], sizes = [128, 128], strides = [1, 1]} : vector<256x128xbf16> to vector<128x128xbf16>
    %c3_139 = arith.constant 3 : index
    %c0_140 = arith.constant 0 : index
    %c0_141 = arith.constant 0 : index
    %222 = vector.load %arg5[%c3_139, %c0_140, %c0_141] : memref<4x128x128xbf16, #tpu.memory_space<vmem>>, vector<1x128x128xbf16>
    %223 = vector.shape_cast %222 : vector<1x128x128xbf16> to vector<128x128xbf16>
    %cst_142 = arith.constant dense<0.000000e+00> : vector<128x128xf32>
    %224 = tpu.matmul %223, %220, %cst_142 {dimension_numbers = #tpu.dot_dimension_numbers<[1], [0], [0], [1], [0, 0, 1, 1], [], []>} : vector<128x128xbf16>, vector<128x128xbf16>, vector<128x128xf32> -> vector<128x128xf32>
    %c3_143 = arith.constant 3 : index
    %c0_144 = arith.constant 0 : index
    %c0_145 = arith.constant 0 : index
    %225 = vector.load %arg6[%c3_143, %c0_144, %c0_145] : memref<4x128x1xf32, #tpu.memory_space<vmem>>, vector<1x128x1xf32>
    %226 = vector.shape_cast %225 : vector<1x128x1xf32> to vector<128x1xf32>
    %227 = vector.broadcast %226 : vector<128x1xf32> to vector<128x128xf32>
    %228 = arith.addf %224, %227 : vector<128x128xf32>
    %cst_146 = arith.constant 0.000000e+00 : f32
    %229 = vector.broadcast %cst_146 : f32 to vector<128x128xf32>
    %230 = arith.maximumf %228, %229 : vector<128x128xf32>
    %231 = arith.truncf %230 : vector<128x128xf32> to vector<128x128xbf16>
    %c3_147 = arith.constant 3 : index
    %c0_148 = arith.constant 0 : index
    %c0_149 = arith.constant 0 : index
    %232 = vector.load %arg9[%c3_147, %c0_148, %c0_149] : memref<4x128x128xbf16, #tpu.memory_space<vmem>>, vector<1x128x128xbf16>
    %233 = vector.shape_cast %232 : vector<1x128x128xbf16> to vector<128x128xbf16>
    %cst_150 = arith.constant dense<0.000000e+00> : vector<128x128xf32>
    %234 = tpu.matmul %233, %221, %cst_150 {dimension_numbers = #tpu.dot_dimension_numbers<[1], [0], [0], [1], [0, 0, 1, 1], [], []>} : vector<128x128xbf16>, vector<128x128xbf16>, vector<128x128xf32> -> vector<128x128xf32>
    %c3_151 = arith.constant 3 : index
    %c0_152 = arith.constant 0 : index
    %c0_153 = arith.constant 0 : index
    %235 = vector.load %arg10[%c3_151, %c0_152, %c0_153] : memref<4x128x1xf32, #tpu.memory_space<vmem>>, vector<1x128x1xf32>
    %236 = vector.shape_cast %235 : vector<1x128x1xf32> to vector<128x1xf32>
    %237 = vector.broadcast %236 : vector<128x1xf32> to vector<128x128xf32>
    %238 = arith.addf %234, %237 : vector<128x128xf32>
    %cst_154 = arith.constant 0.000000e+00 : f32
    %239 = vector.broadcast %cst_154 : f32 to vector<128x128xf32>
    %240 = arith.maximumf %238, %239 : vector<128x128xf32>
    %241 = arith.truncf %240 : vector<128x128xf32> to vector<128x128xbf16>
    %c3_155 = arith.constant 3 : index
    %c0_156 = arith.constant 0 : index
    %c0_157 = arith.constant 0 : index
    %242 = vector.load %arg7[%c3_155, %c0_156, %c0_157] : memref<4x8x128xbf16, #tpu.memory_space<vmem>>, vector<1x8x128xbf16>
    %243 = vector.shape_cast %242 : vector<1x8x128xbf16> to vector<8x128xbf16>
    %cst_158 = arith.constant dense<0.000000e+00> : vector<8x128xf32>
    %244 = tpu.matmul %243, %231, %cst_158 {dimension_numbers = #tpu.dot_dimension_numbers<[1], [0], [0], [1], [0, 0, 1, 1], [], []>} : vector<8x128xbf16>, vector<128x128xbf16>, vector<8x128xf32> -> vector<8x128xf32>
    %c3_159 = arith.constant 3 : index
    %c0_160 = arith.constant 0 : index
    %c0_161 = arith.constant 0 : index
    %245 = vector.load %arg8[%c3_159, %c0_160, %c0_161] : memref<4x8x1xf32, #tpu.memory_space<vmem>>, vector<1x8x1xf32>
    %246 = vector.shape_cast %245 : vector<1x8x1xf32> to vector<8x1xf32>
    %247 = vector.broadcast %246 : vector<8x1xf32> to vector<8x128xf32>
    %248 = arith.addf %244, %247 : vector<8x128xf32>
    %249 = math.tanh %248 : vector<8x128xf32>
    %250 = vector.broadcast %206 : vector<8x1xf32> to vector<8x128xf32>
    %251 = arith.mulf %249, %250 : vector<8x128xf32>
    %c3_162 = arith.constant 3 : index
    %c0_163 = arith.constant 0 : index
    %c0_164 = arith.constant 0 : index
    %252 = vector.load %arg11[%c3_162, %c0_163, %c0_164] : memref<4x8x128xbf16, #tpu.memory_space<vmem>>, vector<1x8x128xbf16>
    %253 = vector.shape_cast %252 : vector<1x8x128xbf16> to vector<8x128xbf16>
    %cst_165 = arith.constant dense<0.000000e+00> : vector<8x128xf32>
    %254 = tpu.matmul %253, %241, %cst_165 {dimension_numbers = #tpu.dot_dimension_numbers<[1], [0], [0], [1], [0, 0, 1, 1], [], []>} : vector<8x128xbf16>, vector<128x128xbf16>, vector<8x128xf32> -> vector<8x128xf32>
    %c3_166 = arith.constant 3 : index
    %c0_167 = arith.constant 0 : index
    %c0_168 = arith.constant 0 : index
    %255 = vector.load %arg12[%c3_166, %c0_167, %c0_168] : memref<4x8x1xf32, #tpu.memory_space<vmem>>, vector<1x8x1xf32>
    %256 = vector.shape_cast %255 : vector<1x8x1xf32> to vector<8x1xf32>
    %257 = vector.broadcast %256 : vector<8x1xf32> to vector<8x128xf32>
    %258 = arith.addf %254, %257 : vector<8x128xf32>
    %259 = vector.broadcast %206 : vector<8x1xf32> to vector<8x128xf32>
    %260 = arith.mulf %258, %259 : vector<8x128xf32>
    %261 = vector.broadcast %206 : vector<8x1xf32> to vector<8x128xf32>
    %262 = arith.mulf %261, %199 : vector<8x128xf32>
    %263 = math.exp %251 : vector<8x128xf32>
    %264 = arith.mulf %262, %263 : vector<8x128xf32>
    %265 = arith.addf %208, %264 : vector<8x128xf32>
    %266 = arith.addf %265, %260 : vector<8x128xf32>
    %cst_169 = arith.constant dense<0.000000e+00> : vector<128xf32>
    %267 = vector.multi_reduction <add>, %251, %cst_169 [0] : vector<8x128xf32> to vector<128xf32>
    %268 = vector.shape_cast %267 : vector<128xf32> to vector<1x128xf32>
    %269 = arith.addf %202, %268 : vector<1x128xf32>
    %c0_170 = arith.constant 0 : index
    %c0_171 = arith.constant 0 : index
    %270 = vector.load %arg13[%c0_170, %c0_171] : memref<8x128xf32, #tpu.memory_space<vmem>>, vector<8x128xf32>
    tpu.vector_store %arg13[%c0_170, %c0_171], %266 {strides = array<i32>} : memref<8x128xf32, #tpu.memory_space<vmem>>, vector<8x128xf32>,
    %c0_172 = arith.constant 0 : index
    %c0_173 = arith.constant 0 : index
    %271 = vector.load %arg14[%c0_172, %c0_173] : memref<1x128xf32, #tpu.memory_space<vmem>>, vector<1x128xf32>
    tpu.vector_store %arg14[%c0_172, %c0_173], %269 {strides = array<i32>} : memref<1x128xf32, #tpu.memory_space<vmem>>, vector<1x128xf32>,
    return
  }
  func.func @transform_0(%arg0: i32) -> (i32, i32) {
    %c0_i32 = arith.constant 0 : i32
    %c0_i32_0 = arith.constant 0 : i32
    return %c0_i32, %arg0 : i32, i32
  }
  func.func @transform_1(%arg0: i32) -> (i32, i32, i32) {
    %c0_i32 = arith.constant 0 : i32
    %c0_i32_0 = arith.constant 0 : i32
    %c0_i32_1 = arith.constant 0 : i32
    %c0_i32_2 = arith.constant 0 : i32
    return %c0_i32, %c0_i32_0, %c0_i32_1 : i32, i32, i32
  }
  func.func @transform_2(%arg0: i32) -> (i32, i32, i32) {
    %c0_i32 = arith.constant 0 : i32
    %c0_i32_0 = arith.constant 0 : i32
    %c0_i32_1 = arith.constant 0 : i32
    %c0_i32_2 = arith.constant 0 : i32
    return %c0_i32, %c0_i32_0, %c0_i32_1 : i32, i32, i32
  }
  func.func @transform_3(%arg0: i32) -> (i32, i32, i32) {
    %c0_i32 = arith.constant 0 : i32
    %c0_i32_0 = arith.constant 0 : i32
    %c0_i32_1 = arith.constant 0 : i32
    %c0_i32_2 = arith.constant 0 : i32
    return %c0_i32, %c0_i32_0, %c0_i32_1 : i32, i32, i32
  }
  func.func @transform_4(%arg0: i32) -> (i32, i32, i32) {
    %c0_i32 = arith.constant 0 : i32
    %c0_i32_0 = arith.constant 0 : i32
    %c0_i32_1 = arith.constant 0 : i32
    %c0_i32_2 = arith.constant 0 : i32
    return %c0_i32, %c0_i32_0, %c0_i32_1 : i32, i32, i32
  }
  func.func @transform_5(%arg0: i32) -> (i32, i32, i32) {
    %c0_i32 = arith.constant 0 : i32
    %c0_i32_0 = arith.constant 0 : i32
    %c0_i32_1 = arith.constant 0 : i32
    %c0_i32_2 = arith.constant 0 : i32
    return %c0_i32, %c0_i32_0, %c0_i32_1 : i32, i32, i32
  }
  func.func @transform_6(%arg0: i32) -> (i32, i32, i32) {
    %c0_i32 = arith.constant 0 : i32
    %c0_i32_0 = arith.constant 0 : i32
    %c0_i32_1 = arith.constant 0 : i32
    %c0_i32_2 = arith.constant 0 : i32
    return %c0_i32, %c0_i32_0, %c0_i32_1 : i32, i32, i32
  }
  func.func @transform_7(%arg0: i32) -> (i32, i32, i32) {
    %c0_i32 = arith.constant 0 : i32
    %c0_i32_0 = arith.constant 0 : i32
    %c0_i32_1 = arith.constant 0 : i32
    %c0_i32_2 = arith.constant 0 : i32
    return %c0_i32, %c0_i32_0, %c0_i32_1 : i32, i32, i32
  }
  func.func @transform_8(%arg0: i32) -> (i32, i32, i32) {
    %c0_i32 = arith.constant 0 : i32
    %c0_i32_0 = arith.constant 0 : i32
    %c0_i32_1 = arith.constant 0 : i32
    %c0_i32_2 = arith.constant 0 : i32
    return %c0_i32, %c0_i32_0, %c0_i32_1 : i32, i32, i32
  }
  func.func @transform_9(%arg0: i32) -> (i32, i32, i32) {
    %c0_i32 = arith.constant 0 : i32
    %c0_i32_0 = arith.constant 0 : i32
    %c0_i32_1 = arith.constant 0 : i32
    %c0_i32_2 = arith.constant 0 : i32
    return %c0_i32, %c0_i32_0, %c0_i32_1 : i32, i32, i32
  }
  func.func @transform_10(%arg0: i32) -> (i32, i32, i32) {
    %c0_i32 = arith.constant 0 : i32
    %c0_i32_0 = arith.constant 0 : i32
    %c0_i32_1 = arith.constant 0 : i32
    %c0_i32_2 = arith.constant 0 : i32
    return %c0_i32, %c0_i32_0, %c0_i32_1 : i32, i32, i32
  }
  func.func @transform_11(%arg0: i32) -> (i32, i32, i32) {
    %c0_i32 = arith.constant 0 : i32
    %c0_i32_0 = arith.constant 0 : i32
    %c0_i32_1 = arith.constant 0 : i32
    %c0_i32_2 = arith.constant 0 : i32
    return %c0_i32, %c0_i32_0, %c0_i32_1 : i32, i32, i32
  }
  func.func @transform_12(%arg0: i32) -> (i32, i32) {
    %c0_i32 = arith.constant 0 : i32
    %c0_i32_0 = arith.constant 0 : i32
    return %c0_i32, %arg0 : i32, i32
  }
  func.func @transform_13(%arg0: i32) -> (i32, i32) {
    %c0_i32 = arith.constant 0 : i32
    %c0_i32_0 = arith.constant 0 : i32
    return %c0_i32, %arg0 : i32, i32
  }
}

</mosaic_0001>

<bundles_post_ra>
// kernel: realnvp_forward.1
= control target key start
LH: loop header
LB: loop body
LE: loop exit
PB: predicated region body
PF: predicated region fallthrough
CT: control target
= control target key end

     0   :  { %v5776_v0 = vmov 0   ;;  %vm407_vm0 = vcmask 1043456   ;;  %vm358_vm1 = vcmask 64512   ;;  %s7944_s3 = inlined_call_operand.vmem [shape: f32[4,256,1], index: 3, kind: input, shape index: {}]   ;;  %s7945_s1 = inlined_call_operand.vmem [shape: f32[4,8,1], index: 1, kind: input, shape index: {}]   ;;  %s7946_s5 = inlined_call_operand.vmem [shape: f32[4,128,1], index: 5, kind: input, shape index: {}]   ;;  %s7947_s0 = inlined_call_operand.vmem [shape: f32[8,128], index: 0, kind: input, shape index: {}]   ;;  %s7948_s9 = inlined_call_operand.vmem [shape: f32[4,128,1], index: 9, kind: input, shape index: {}]   ;;  %s7949_s2 = inlined_call_operand.vmem [shape: bf16[4,256,8], index: 2, kind: input, shape index: {}]   ;;  %s7950_s7 = inlined_call_operand.vmem [shape: f32[4,8,1], index: 7, kind: input, shape index: {}]   ;;  %s7951_s11 = inlined_call_operand.vmem [shape: f32[4,8,1], index: 11, kind: input, shape index: {}]   ;;  %s7952_s4 = inlined_call_operand.vmem [shape: bf16[4,128,128], index: 4, kind: input, shape index: {}]   ;;  %s7953_s8 = inlined_call_operand.vmem [shape: bf16[4,128,128], index: 8, kind: input, shape index: {}]   ;;  %s7954_s6 = inlined_call_operand.vmem [shape: bf16[4,8,128], index: 6, kind: input, shape index: {}]   ;;  %s7955_s10 = inlined_call_operand.vmem [shape: bf16[4,8,128], index: 10, kind: input, shape index: {}]   ;;  %s7956_s13 = inlined_call_operand.vmem [shape: f32[1,128], index: 13, kind: output, shape index: {1}]   ;;  %s7957_s12 = inlined_call_operand.vmem [shape: f32[8,128], index: 12, kind: output, shape index: {0}]  }
   0x1   :  { %5758 = vset.pattern.permute.xlu2 %v5776_v0  ;;  %5757 = vset.pattern.permute.xlu1 %v5776_v0  ;;  %v101_v1 = vld [vmem:[%s7944_s3 + $0x78] sm:$0xff]  ;;  %v99_v2 = vld [vmem:[%s7944_s3 + $0x68] sm:$0xff]  ;;  %v5856_v3 = vld [vmem:[%s7945_s1] sm:$0xff] }
   0x2   :  { %5756 = vset.pattern.permute.xlu0 %v5776_v0  ;;  %195 = vperm.xlu1 %5757, %v101_v1   ;;  %v98_v4 = vld [vmem:[%s7944_s3 + $0x60] sm:$0xff]  ;;  %v96_v5 = vld [vmem:[%s7944_s3 + $0x50] sm:$0xff]  ;;  %v95_v8 = vld [vmem:[%s7944_s3 + $0x48] sm:$0xff] }
   0x3   :  { %185 = vperm.xlu2 %5758, %v99_v2   ;;  %49 = vperm.xlu0 %5756, %v5856_v3   ;;  %v100_v6 = vld [vmem:[%s7944_s3 + $0x70] sm:$0xff]  ;;  %v94_v7 = vld [vmem:[%s7944_s3 + $0x40] sm:$0xff]  ;;  %v97_v9 = vld [vmem:[%s7944_s3 + $0x58] sm:$0xff] }
   0x4   :  { %v117_v10 = vld [vmem:[%s7944_s3 + $0xf8] sm:$0xff]  ;;  %v92_v11 = vld [vmem:[%s7944_s3 + $0x30] sm:$0xff]  ;;  %v114_v13 = vld [vmem:[%s7944_s3 + $0xe0] sm:$0xff] }
   0x5   :  { %v116_v12 = vld [vmem:[%s7944_s3 + $0xf0] sm:$0xff]  ;;  %v115_v14 = vld [vmem:[%s7944_s3 + $0xe8] sm:$0xff]  ;;  %v93_v15 = vld [vmem:[%s7944_s3 + $0x38] sm:$0xff] }
   0x6   :  { %v91_v16 = vld [vmem:[%s7944_s3 + $0x28] sm:$0xff]  ;;  %v112_v17 = vld [vmem:[%s7944_s3 + $0xd0] sm:$0xff]  ;;  %v90_v18 = vld [vmem:[%s7944_s3 + $0x20] sm:$0xff] }
   0x7   :  { %v88_v19 = vld [vmem:[%s7944_s3 + $0x10] sm:$0xff]  ;;  %v89_v20 = vld [vmem:[%s7944_s3 + $0x18] sm:$0xff]  ;;  %v111_v22 = vld [vmem:[%s7944_s3 + $0xc8] sm:$0xff] }
   0x8   :  { %v113_v21 = vld [vmem:[%s7944_s3 + $0xd8] sm:$0xff]  ;;  %v86_v23 = vld [vmem:[%s7944_s3] sm:$0xff]  ;;  %v108_v25 = vld [vmem:[%s7944_s3 + $0xb0] sm:$0xff] }
   0x9   :  { %v110_v24 = vld [vmem:[%s7944_s3 + $0xc0] sm:$0xff]  ;;  %v109_v26 = vld [vmem:[%s7944_s3 + $0xb8] sm:$0xff]  ;;  %v87_v27 = vld [vmem:[%s7944_s3 + $0x8] sm:$0xff] }
   0xa   :  { %180 = vperm.xlu1 %5757, %v98_v4   ;;  %v107_v28 = vld [vmem:[%s7944_s3 + $0xa8] sm:$0xff]  ;;  %v104_v29 = vld [vmem:[%s7944_s3 + $0x90] sm:$0xff]  ;;  %v106_v30 = vld [vmem:[%s7944_s3 + $0xa0] sm:$0xff] }
   0xb   :  { %170 = vperm.xlu2 %5758, %v96_v5   ;;  %190 = vperm.xlu0 %5756, %v100_v6   ;;  %v102_v31 = vld [vmem:[%s7944_s3 + $0x80] sm:$0xff]  ;;  %v103_v32 = vld [vmem:[%s7944_s3 + $0x88] sm:$0xff]  ;;  %v105_v33 = vld [vmem:[%s7944_s3 + $0x98] sm:$0xff] }
   0xc   :  { %v595_v34 = vld [vmem:[%s7946_s5 + $0x78] sm:$0xff]  ;;  %v592_v35 = vld [vmem:[%s7946_s5 + $0x60] sm:$0xff]  ;;  %v594_v36 = vld [vmem:[%s7946_s5 + $0x70] sm:$0xff] }
   0xd   :  { %v590_v37 = vld [vmem:[%s7946_s5 + $0x50] sm:$0xff]  ;;  %v591_v38 = vld [vmem:[%s7946_s5 + $0x58] sm:$0xff]  ;;  %v593_v39 = vld [vmem:[%s7946_s5 + $0x68] sm:$0xff] }
   0xe   :  { %v589_v40 = vld [vmem:[%s7946_s5 + $0x48] sm:$0xff]  ;;  %v586_v41 = vld [vmem:[%s7946_s5 + $0x30] sm:$0xff]  ;;  %v588_v42 = vld [vmem:[%s7946_s5 + $0x40] sm:$0xff] }
   0xf   :  { %v584_v43 = vld [vmem:[%s7946_s5 + $0x20] sm:$0xff]  ;;  %v585_v44 = vld [vmem:[%s7946_s5 + $0x28] sm:$0xff]  ;;  %v587_v45 = vld [vmem:[%s7946_s5 + $0x38] sm:$0xff] }
  0x10   :  { %v44_v46 = vld [vmem:[%s7947_s0] sm:$0xff]  ;;  %v876_v49 = vld [vmem:[%s7948_s9 + $0x78] sm:$0xff]  ;;  %v582_v50 = vld [vmem:[%s7946_s5 + $0x10] sm:$0xff] }
  0x11   :  { %v875_v51 = vld [vmem:[%s7948_s9 + $0x70] sm:$0xff]  ;;  %v5625_v54 = vld [vmem:[%s7949_s2] sm:$0xff]  ;;  %v874_v56 = vld [vmem:[%s7948_s9 + $0x68] sm:$0xff] }
  0x12   :  { %160 = vperm.xlu1 %5757, %v94_v7   ;;  %v873_v55 = vld [vmem:[%s7948_s9 + $0x60] sm:$0xff]  ;;  %v583_v57 = vld [vmem:[%s7946_s5 + $0x18] sm:$0xff]  ;;  %v581_v58 = vld [vmem:[%s7946_s5 + $0x8] sm:$0xff] }
  0x13   :  { %165 = vperm.xlu2 %5758, %v95_v8   ;;  %175 = vperm.xlu0 %5756, %v97_v9   ;;  %v871_v59 = vld [vmem:[%s7948_s9 + $0x50] sm:$0xff]  ;;  %v580_v60 = vld [vmem:[%s7946_s5] sm:$0xff]  ;;  %v5626_v61 = vld [vmem:[%s7949_s2 + $0x8] sm:$0xff] }
  0x14   :  { %v869_v62 = vld [vmem:[%s7948_s9 + $0x40] sm:$0xff]  ;;  %v870_v63 = vld [vmem:[%s7948_s9 + $0x48] sm:$0xff]  ;;  %v872_v0 = vld [vmem:[%s7948_s9 + $0x58] sm:$0xff] }
  0x15   :  { %v868_v1 = vld [vmem:[%s7948_s9 + $0x38] sm:$0xff]  ;;  %v865_v2 = vld [vmem:[%s7948_s9 + $0x20] sm:$0xff]  ;;  %v867_v4 = vld [vmem:[%s7948_s9 + $0x30] sm:$0xff] }
  0x16   :  { %v5627_v5 = vld [vmem:[%s7949_s2 + $0x10] sm:$0xff]  ;;  %v864_v7 = vld [vmem:[%s7948_s9 + $0x18] sm:$0xff]  ;;  %v866_v8 = vld [vmem:[%s7948_s9 + $0x28] sm:$0xff] }
  0x17   :  { %v863_v6 = vld [vmem:[%s7948_s9 + $0x10] sm:$0xff]  ;;  %v862_v9 = vld [vmem:[%s7948_s9 + $0x8] sm:$0xff] }
  0x1a   :  { %275 = vperm.xlu1 %5757, %v117_v10   ;;  %v1127_v10 = vld [vmem:[%s7950_s7] sm:$0xff] }
  0x1b   :  { %150 = vperm.xlu2 %5758, %v92_v11   ;;  %270 = vperm.xlu0 %5756, %v116_v12   ;;  %v861_v11 = vld [vmem:[%s7948_s9] sm:$0xff]  ;;  %v5628_v12 = vld [vmem:[%s7949_s2 + $0x18] sm:$0xff] }
  0x22   :  { %260 = vperm.xlu1 %5757, %v114_v13   ;;  %v46_v13 = vsub.f32 1.0, %v5856_v3 }
  0x23   :  { %265 = vperm.xlu2 %5758, %v115_v14   ;;  %155 = vperm.xlu0 %5756, %v93_v15   ;;  %v1154_v14 = vld [vmem:[%s7951_s11] sm:$0xff]  ;;  %v6079_v15 = vld [vmem:[%s7945_s1 + $0x8] sm:$0xff] }
  0x2a   :  { %145 = vperm.xlu1 %5757, %v91_v16   ;;  %v4842_v16 = vld [vmem:[%s7944_s3 + $0x178] sm:$0xff] }
  0x2b   :  { %250 = vperm.xlu2 %5758, %v112_v17   ;;  %140 = vperm.xlu0 %5756, %v90_v18   ;;  %v4839_v17 = vld [vmem:[%s7944_s3 + $0x160] sm:$0xff]  ;;  %v4841_v18 = vld [vmem:[%s7944_s3 + $0x170] sm:$0xff] }
  0x32   :  { %130 = vperm.xlu1 %5757, %v88_v19   ;;  %v5629_v19 = vld [vmem:[%s7949_s2 + $0x20] sm:$0xff] }
  0x33   :  { %135 = vperm.xlu2 %5758, %v89_v20   ;;  %255 = vperm.xlu0 %5756, %v113_v21   ;;  %v4837_v21 = vld [vmem:[%s7944_s3 + $0x150] sm:$0xff] }
  0x3a   :  { %245 = vperm.xlu1 %5757, %v111_v22   ;;  %v4838_v22 = vld [vmem:[%s7944_s3 + $0x158] sm:$0xff] }
  0x3b   :  { %120 = vperm.xlu2 %5758, %v86_v23   ;;  %240 = vperm.xlu0 %5756, %v110_v24   ;;  %v4840_v23 = vld [vmem:[%s7944_s3 + $0x168] sm:$0xff] }
  0x42   :  { %230 = vperm.xlu1 %5757, %v108_v25   ;;  %v4836_v25 = vld [vmem:[%s7944_s3 + $0x148] sm:$0xff] }
  0x43   :  { %235 = vperm.xlu2 %5758, %v109_v26   ;;  %125 = vperm.xlu0 %5756, %v87_v27   ;;  %v4857_v27 = vld [vmem:[%s7944_s3 + $0x1f0] sm:$0xff] }
  0x4a   :  { %225 = vperm.xlu1 %5757, %v107_v28   ;;  %v4835_v28 = vld [vmem:[%s7944_s3 + $0x140] sm:$0xff] }
  0x4b   :  { %210 = vperm.xlu2 %5758, %v104_v29   ;;  %220 = vperm.xlu0 %5756, %v106_v30   ;;  %v5630_v29 = vld [vmem:[%s7949_s2 + $0x28] sm:$0xff] }
  0x52   :  { %200 = vperm.xlu1 %5757, %v102_v31   ;;  %v4833_v31 = vld [vmem:[%s7944_s3 + $0x130] sm:$0xff] }
  0x53   :  { %205 = vperm.xlu2 %5758, %v103_v32   ;;  %215 = vperm.xlu0 %5756, %v105_v33   ;;  %v4834_v32 = vld [vmem:[%s7944_s3 + $0x138] sm:$0xff] }
  0x54   :  { %v4858_v33 = vld [vmem:[%s7944_s3 + $0x1f8] sm:$0xff] }
  0x5a   :  { %673 = vperm.xlu1 %5757, %v595_v34  }
  0x5b   :  { %658 = vperm.xlu2 %5758, %v592_v35   ;;  %668 = vperm.xlu0 %5756, %v594_v36  }
  0x5d   :  { %v6085_v3 = vpop.permute.xlu2 %185 }
  0x62   :  { %648 = vperm.xlu1 %5757, %v590_v37   ;;  %v4856_v37 = vld [vmem:[%s7944_s3 + $0x1e8] sm:$0xff] }
  0x63   :  { %653 = vperm.xlu2 %5758, %v591_v38   ;;  %663 = vperm.xlu0 %5756, %v593_v39   ;;  %v4831_v38 = vld [vmem:[%s7944_s3 + $0x120] sm:$0xff] }
  0x64   :  { %v4855_v39 = vld [vmem:[%s7944_s3 + $0x1e0] sm:$0xff] }
  0x65   :  { %v6108_v24 = vpop.permute.xlu2 %170 }
  0x6a   :  { %643 = vperm.xlu1 %5757, %v589_v40  }
  0x6b   :  { %628 = vperm.xlu2 %5758, %v586_v41   ;;  %638 = vperm.xlu0 %5756, %v588_v42   ;;  %v5631_v41 = vld [vmem:[%s7949_s2 + $0x30] sm:$0xff] }
  0x6d   :  { %v6124_v30 = vpop.permute.xlu2 %165 }
  0x72   :  { %618 = vperm.xlu1 %5757, %v584_v43   ;;  %v4853_v43 = vld [vmem:[%s7944_s3 + $0x1d0] sm:$0xff] }
  0x73   :  { %623 = vperm.xlu2 %5758, %v585_v44   ;;  %633 = vperm.xlu0 %5756, %v587_v45   ;;  %v4854_v45 = vld [vmem:[%s7944_s3 + $0x1d8] sm:$0xff] }
  0x74   :  { %v6136_v34 = vpop.permute.xlu1 %195 }
  0x75   :  { %v50_v47 = vpop.permute.xlu0 %49  ;;  %v6140_v36 = vpop.permute.xlu2 %150 }
  0x76   :  { %v5988_v48 = vmul.f32 %v50_v47, %v44_v46  ;;  %v4832_v46 = vld [vmem:[%s7944_s3 + $0x128] sm:$0xff] }
  0x78   :  { %7959 = vst [vmem:[#allocation2_spill] sm:$0xff] %v5988_v48  ;;  %v53_v52 = vpack.c.bf16 %v5988_v48, %v5988_v48 }
  0x7a   :  { %954 = vperm.xlu1 %5757, %v876_v49   ;;  %v409_v53 = vsel %vm407_vm0, %v53_v52, 0  ;;  %v4829_v52 = vld [vmem:[%s7944_s3 + $0x110] sm:$0xff] }
  0x7b   :  { %608 = vperm.xlu2 %5758, %v582_v50   ;;  %949 = vperm.xlu0 %5756, %v875_v51   ;;  %v4830_v50 = vld [vmem:[%s7944_s3 + $0x118] sm:$0xff]  ;;  %v4851_v51 = vld [vmem:[%s7944_s3 + $0x1c0] sm:$0xff] }
  0x7c   :  { %418 = vmatpush.bf16.msra.mxu0 %v409_v53  ;;  %v6151_v40 = vpop.permute.xlu1 %180 }
  0x7d   :  { %v6096_v20 = vpop.permute.xlu0 %190  ;;  %v6162_v44 = vpop.permute.xlu2 %265 }
  0x7f   :  { %4714 = vmatmul.msk.bf16.vlgmr.msra.gmra.mxu0 %vm358_vm1, %v5625_v54  ;;  %v5632_v54 = vld [vmem:[%s7949_s2 + $0x38] sm:$0xff] }
  0x82   :  { %939 = vperm.xlu1 %5757, %v873_v55  }
  0x83   :  { %944 = vperm.xlu2 %5758, %v874_v56   ;;  %613 = vperm.xlu0 %5756, %v583_v57   ;;  %v4827_v56 = vld [vmem:[%s7944_s3 + $0x100] sm:$0xff] }
  0x84   :  { %v6170_v47 = vpop.permute.xlu1 %160 }
  0x85   :  { %v6113_v26 = vpop.permute.xlu0 %175  ;;  %v6183_v53 = vpop.permute.xlu2 %250 }
  0x8a   :  { %603 = vperm.xlu1 %5757, %v581_v58   ;;  %v4828_v58 = vld [vmem:[%s7944_s3 + $0x108] sm:$0xff] }
  0x8b   :  { %929 = vperm.xlu2 %5758, %v871_v59   ;;  %598 = vperm.xlu0 %5756, %v580_v60   ;;  %v4852_v59 = vld [vmem:[%s7944_s3 + $0x1c8] sm:$0xff] }
  0x8c   :  { %v6188_v55 = vpop.permute.xlu1 %275 }
  0x8d   :  { %v6138_v35 = vpop.permute.xlu0 %270  ;;  %v136_v60 = vpop.permute.xlu2 %135 }
  0x8f   :  { %4715 = vmatmul.msk.bf16.gmra.mxu0 %vm358_vm1, %v5626_v61  ;;  %v4850_v61 = vld [vmem:[%s7944_s3 + $0x1b8] sm:$0xff] }
  0x92   :  { %919 = vperm.xlu1 %5757, %v869_v62   ;;  %v4847_v62 = vld [vmem:[%s7944_s3 + $0x1a0] sm:$0xff] }
  0x93   :  { %924 = vperm.xlu2 %5758, %v870_v63   ;;  %934 = vperm.xlu0 %5756, %v872_v0   ;;  %v4849_v63 = vld [vmem:[%s7944_s3 + $0x1b0] sm:$0xff] }
  0x94   :  { %v6211_v0 = vpop.permute.xlu1 %260 }
  0x95   :  { %v6156_v42 = vpop.permute.xlu0 %155 }
  0x9a   :  { %914 = vperm.xlu1 %5757, %v868_v1  }
  0x9b   :  { %899 = vperm.xlu2 %5758, %v865_v2   ;;  %909 = vperm.xlu0 %5756, %v867_v4   ;;  %v5633_v2 = vld [vmem:[%s7949_s2 + $0x40] sm:$0xff] }
  0x9d   :  { %v6172_v49 = vpop.permute.xlu0 %140 }
  0x9f   :  { %4716 = vmatmul.msk.bf16.gmra.mxu0 %vm358_vm1, %v5627_v5  ;;  %v121_v5 = vpop.permute.xlu2 %120 }
  0xa2   :  { %889 = vperm.xlu1 %5757, %v863_v6  }
  0xa3   :  { %894 = vperm.xlu2 %5758, %v864_v7   ;;  %904 = vperm.xlu0 %5756, %v866_v8   ;;  %v4845_v7 = vld [vmem:[%s7944_s3 + $0x190] sm:$0xff]  ;;  %v4846_v8 = vld [vmem:[%s7944_s3 + $0x198] sm:$0xff] }
  0xa5   :  { %v6194_v57 = vpop.permute.xlu0 %255 }
  0xaa   :  { %884 = vperm.xlu1 %5757, %v862_v9   ;;  %v4848_v9 = vld [vmem:[%s7944_s3 + $0x1a8] sm:$0xff] }
  0xab   :  { %1130 = vperm.xlu2 %5758, %v1127_v10   ;;  %879 = vperm.xlu0 %5756, %v861_v11   ;;  %v146_v10 = vpop.permute.xlu1 %145 }
  0xad   :  { %v6213_v1 = vpop.permute.xlu0 %240 }
  0xaf   :  { %4717 = vmatmul.msk.bf16.gmra.mxu0 %vm358_vm1, %v5628_v12 }
  0xb2   :  { %1157 = vperm.xlu1 %5757, %v1154_v14  }
  0xb3   :  { %1192 = vperm.xlu2 %5758, %v6079_v15   ;;  %1149 = vperm.xlu0 %5756, %v46_v13  }
  0xb5   :  { %v126_v12 = vpop.permute.xlu0 %125 }
  0xba   :  { %1340 = vperm.xlu1 %5757, %v4842_v16  }
  0xbb   :  { %1325 = vperm.xlu2 %5758, %v4839_v17   ;;  %1335 = vperm.xlu0 %5756, %v4841_v18   ;;  %v4844_v18 = vld [vmem:[%s7944_s3 + $0x188] sm:$0xff] }
  0xbf   :  { %4718 = vmatmul.msk.bf16.gmra.mxu0 %vm358_vm1, %v5629_v19  ;;  %v4969_v19 = vld [vmem:[%s7946_s5 + $0xf0] sm:$0xff] }
  0xc2   :  { %1315 = vperm.xlu1 %5757, %v4837_v21   ;;  %v4843_v21 = vld [vmem:[%s7944_s3 + $0x180] sm:$0xff] }
  0xc3   :  { %1320 = vperm.xlu2 %5758, %v4838_v22   ;;  %1330 = vperm.xlu0 %5756, %v4840_v23  }
  0xca   :  { %1310 = vperm.xlu1 %5757, %v4836_v25  }
  0xcb   :  { %1415 = vperm.xlu2 %5758, %v4857_v27   ;;  %1305 = vperm.xlu0 %5756, %v4835_v28   ;;  %v5634_v27 = vld [vmem:[%s7949_s2 + $0x48] sm:$0xff] }
  0xcf   :  { %4719 = vmatmul.msk.bf16.gmra.mxu0 %vm358_vm1, %v5630_v29 }
  0xd2   :  { %1295 = vperm.xlu1 %5757, %v4833_v31   ;;  %v131_v31 = vpop.permute.xlu1 %130 }
  0xd3   :  { %1300 = vperm.xlu2 %5758, %v4834_v32   ;;  %1420 = vperm.xlu0 %5756, %v4858_v33   ;;  %v4967_v33 = vld [vmem:[%s7946_s5 + $0xe0] sm:$0xff] }
  0xda   :  { %1410 = vperm.xlu1 %5757, %v4856_v37   ;;  %v4968_v37 = vld [vmem:[%s7946_s5 + $0xe8] sm:$0xff] }
  0xdb   :  { %1285 = vperm.xlu2 %5758, %v4831_v38   ;;  %1405 = vperm.xlu0 %5756, %v4855_v39   ;;  %v4970_v38 = vld [vmem:[%s7946_s5 + $0xf8] sm:$0xff] }
  0xdf   :  { %4720 = vmatmul.msk.bf16.gmra.mxu0 %vm358_vm1, %v5631_v41 }
  0xe2   :  { %1395 = vperm.xlu1 %5757, %v4853_v43  }
  0xe3   :  { %1400 = vperm.xlu2 %5758, %v4854_v45   ;;  %1290 = vperm.xlu0 %5756, %v4832_v46  }
  0xea   :  { %1280 = vperm.xlu1 %5757, %v4830_v50   ;;  %v4966_v50 = vld [vmem:[%s7946_s5 + $0xd8] sm:$0xff] }
  0xeb   :  { %1385 = vperm.xlu2 %5758, %v4851_v51   ;;  %1275 = vperm.xlu0 %5756, %v4829_v52   ;;  %v4963_v51 = vld [vmem:[%s7946_s5 + $0xc0] sm:$0xff]  ;;  %v4965_v52 = vld [vmem:[%s7946_s5 + $0xd0] sm:$0xff] }
  0xef   :  { %4721 = vmatmul.msk.bf16.gmra.mxu0 %vm358_vm1, %v5632_v54 }
  0xf2   :  { %1265 = vperm.xlu1 %5757, %v4827_v56  }
  0xf3   :  { %1270 = vperm.xlu2 %5758, %v4828_v58   ;;  %1390 = vperm.xlu0 %5756, %v4852_v59   ;;  %v5635_v59 = vld [vmem:[%s7949_s2 + $0x50] sm:$0xff] }
  0xfa   :  { %1380 = vperm.xlu1 %5757, %v4850_v61  }
  0xfb   :  { %1365 = vperm.xlu2 %5758, %v4847_v62   ;;  %1375 = vperm.xlu0 %5756, %v4849_v63   ;;  %v4961_v63 = vld [vmem:[%s7946_s5 + $0xb0] sm:$0xff] }
  0xfc   :  { %v420_v4 = vpop.f32.mrf.mxu0 }
  0xfd   :  { %v421_v6 = vadd.f32 %v420_v4, %v121_v5  ;;  %v4964_v4 = vld [vmem:[%s7946_s5 + $0xc8] sm:$0xff] }
  0xff   :  { %4722 = vmatmul.msk.bf16.gmra.mxu0 %vm358_vm1, %v5633_v2  ;;  %v500_v11 = vmax.f32 %v421_v6, 0.0  ;;  %v4962_v2 = vld [vmem:[%s7946_s5 + $0xb8] sm:$0xff] }
 0x101   :  { %v532_v16 = vpack.c.bf16 %v500_v11, %v500_v11  ;;  %v5033_v11 = vld [vmem:[%s7948_s9 + $0xf0] sm:$0xff] }
 0x102   :  { %1355 = vperm.xlu1 %5757, %v4845_v7  }
 0x103   :  { %1360 = vperm.xlu2 %5758, %v4846_v8   ;;  %1370 = vperm.xlu0 %5756, %v4848_v9   ;;  %v740_v23 = vunpack.c.l.b16 %v532_v16  ;;  %v4960_v9 = vld [vmem:[%s7946_s5 + $0xa8] sm:$0xff] }
 0x104   :  { %v422_v13 = vpop.f32.mrf.mxu0 }
 0x105   :  { %v423_v14 = vadd.f32 %v422_v13, %v126_v12  ;;  %v4959_v12 = vld [vmem:[%s7946_s5 + $0xa0] sm:$0xff] }
 0x107   :  { %v501_v17 = vmax.f32 %v423_v14, 0.0 }
 0x109   :  { %v533_v22 = vpack.c.bf16 %v501_v17, %v501_v17 }
 0x10a   :  { %1350 = vperm.xlu1 %5757, %v4844_v18  }
 0x10b   :  { %v741_v25 = vunpack.c.l.b16 %v533_v22  ;;  %1813 = vperm.xlu2 %5758, %v4969_v19   ;;  %1345 = vperm.xlu0 %5756, %v4843_v21   ;;  %v4957_v21 = vld [vmem:[%s7946_s5 + $0x90] sm:$0xff]  ;;  %v4958_v22 = vld [vmem:[%s7946_s5 + $0x98] sm:$0xff] }
 0x10c   :  { %v425_v28 = vpop.f32.mrf.mxu0 }
 0x10d   :  { %v6240_v29 = vpack.c.b16 %v741_v25, %v740_v23  ;;  %v426_v32 = vadd.f32 %v425_v28, %v131_v31  ;;  %v5034_v23 = vld [vmem:[%s7948_s9 + $0xf8] sm:$0xff] }
 0x10f   :  { %4723 = vmatmul.msk.bf16.gmra.mxu0 %vm358_vm1, %v5634_v27  ;;  %v502_v39 = vmax.f32 %v426_v32, 0.0  ;;  %v5032_v32 = vld [vmem:[%s7948_s9 + $0xe8] sm:$0xff] }
 0x111   :  { %v534_v45 = vpack.c.bf16 %v502_v39, %v502_v39 }
 0x112   :  { %1803 = vperm.xlu1 %5757, %v4967_v33   ;;  %v4955_v33 = vld [vmem:[%s7946_s5 + $0x80] sm:$0xff] }
 0x113   :  { %1808 = vperm.xlu2 %5758, %v4968_v37   ;;  %1818 = vperm.xlu0 %5756, %v4970_v38   ;;  %v742_v56 = vunpack.c.l.b16 %v534_v45  ;;  %v5031_v37 = vld [vmem:[%s7948_s9 + $0xe0] sm:$0xff] }
 0x114   :  { %v427_v41 = vpop.f32.mrf.mxu0 }
 0x115   :  { %v428_v43 = vadd.f32 %v427_v41, %v136_v60 }
 0x117   :  { %v503_v46 = vmax.f32 %v428_v43, 0.0 }
 0x119   :  { %v535_v54 = vpack.c.bf16 %v503_v46, %v503_v46  ;;  %v5029_v46 = vld [vmem:[%s7948_s9 + $0xd0] sm:$0xff] }
 0x11a   :  { %1798 = vperm.xlu1 %5757, %v4966_v50   ;;  %v5030_v50 = vld [vmem:[%s7948_s9 + $0xd8] sm:$0xff] }
 0x11b   :  { %v743_v58 = vunpack.c.l.b16 %v535_v54  ;;  %1783 = vperm.xlu2 %5758, %v4963_v51   ;;  %1793 = vperm.xlu0 %5756, %v4965_v52   ;;  %v4956_v51 = vld [vmem:[%s7946_s5 + $0x88] sm:$0xff] }
 0x11c   :  { %v430_v60 = vpop.f32.mrf.mxu0  ;;  %v5028_v54 = vld [vmem:[%s7948_s9 + $0xc8] sm:$0xff] }
 0x11d   :  { %v6264_v61 = vpack.c.b16 %v743_v58, %v742_v56  ;;  %v431_v62 = vadd.f32 %v430_v60, %v6172_v49  ;;  %v5025_v56 = vld [vmem:[%s7948_s9 + $0xb0] sm:$0xff]  ;;  %v5027_v58 = vld [vmem:[%s7948_s9 + $0xc0] sm:$0xff] }
 0x11f   :  { %4724 = vmatmul.msk.bf16.gmra.mxu0 %vm358_vm1, %v5635_v59  ;;  %v504_v5 = vmax.f32 %v431_v62, 0.0  ;;  %v5638_v59 = vld [vmem:[%s7949_s2 + $0x68] sm:$0xff]  ;;  %v5023_v62 = vld [vmem:[%s7948_s9 + $0xa0] sm:$0xff] }
 0x121   :  { %v536_v7 = vpack.c.bf16 %v504_v5, %v504_v5  ;;  %v5022_v5 = vld [vmem:[%s7948_s9 + $0x98] sm:$0xff] }
 0x122   :  { %1773 = vperm.xlu1 %5757, %v4961_v63   ;;  %v5024_v63 = vld [vmem:[%s7948_s9 + $0xa8] sm:$0xff] }
 0x123   :  { %1778 = vperm.xlu2 %5758, %v4962_v2   ;;  %1788 = vperm.xlu0 %5756, %v4964_v4   ;;  %v744_v14 = vunpack.c.l.b16 %v536_v7  ;;  %v5026_v2 = vld [vmem:[%s7948_s9 + $0xb8] sm:$0xff]  ;;  %v5639_v7 = vld [vmem:[%s7949_s2 + $0x70] sm:$0xff] }
 0x124   :  { %v432_v6 = vpop.f32.mrf.mxu0 }
 0x125   :  { %v433_v49 = vadd.f32 %v432_v6, %v146_v10  ;;  %v5636_v10 = vld [vmem:[%s7949_s2 + $0x58] sm:$0xff]  ;;  %v5019_v6 = vld [vmem:[%s7948_s9 + $0x80] sm:$0xff] }
 0x127   :  { %v505_v8 = vmax.f32 %v433_v49, 0.0  ;;  %v5021_v49 = vld [vmem:[%s7948_s9 + $0x90] sm:$0xff] }
 0x129   :  { %v537_v13 = vpack.c.bf16 %v505_v8, %v505_v8 }
 0x12a   :  { %1768 = vperm.xlu1 %5757, %v4960_v9   ;;  %v1189_v9 = vsub.f32 1.0, %v6079_v15  ;;  %v5118_v15 = vld [vmem:[%s7944_s3 + $0x270] sm:$0xff] }
 0x12b   :  { %v745_v16 = vunpack.c.l.b16 %v537_v13  ;;  %2096 = vperm.xlu2 %5758, %v5033_v11   ;;  %1763 = vperm.xlu0 %5756, %v4959_v12   ;;  %v5068_v11 = vld [vmem:[%s7950_s7 + $0x8] sm:$0xff] }
 0x12c   :  { %v435_v17 = vpop.f32.mrf.mxu0  ;;  %v5020_v12 = vld [vmem:[%s7948_s9 + $0x88] sm:$0xff] }
 0x12d   :  { %v6289_v18 = vpack.c.b16 %v745_v16, %v744_v14  ;;  %v436_v19 = vadd.f32 %v435_v17, %v6140_v36  ;;  %v6376_v14 = vld [vmem:[%s7945_s1 + $0x10] sm:$0xff]  ;;  %v5070_v16 = vld [vmem:[%s7951_s11 + $0x8] sm:$0xff] }
 0x12f   :  { %4725 = vmatmul.msk.bf16.gmra.mxu0 %vm358_vm1, %v5636_v10  ;;  %v506_v25 = vmax.f32 %v436_v19, 0.0  ;;  %v5640_v10 = vld [vmem:[%s7949_s2 + $0x78] sm:$0xff] }
 0x131   :  { %v538_v28 = vpack.c.bf16 %v506_v25, %v506_v25 }
 0x132   :  { %1753 = vperm.xlu1 %5757, %v4957_v21   ;;  %v5116_v21 = vld [vmem:[%s7944_s3 + $0x260] sm:$0xff] }
 0x133   :  { %1758 = vperm.xlu2 %5758, %v4958_v22   ;;  %2101 = vperm.xlu0 %5756, %v5034_v23   ;;  %v746_v39 = vunpack.c.l.b16 %v538_v28  ;;  %v5117_v22 = vld [vmem:[%s7944_s3 + $0x268] sm:$0xff]  ;;  %v5119_v23 = vld [vmem:[%s7944_s3 + $0x278] sm:$0xff] }
 0x134   :  { %v437_v27 = vpop.f32.mrf.mxu0 }
 0x135   :  { %v438_v36 = vadd.f32 %v437_v27, %v6156_v42  ;;  %v5637_v42 = vld [vmem:[%s7949_s2 + $0x60] sm:$0xff] }
 0x137   :  { %v507_v31 = vmax.f32 %v438_v36, 0.0 }
 0x139   :  { %v539_v38 = vpack.c.bf16 %v507_v31, %v507_v31 }
 0x13a   :  { %2091 = vperm.xlu1 %5757, %v5032_v32  }
 0x13b   :  { %v747_v41 = vunpack.c.l.b16 %v539_v38  ;;  %1743 = vperm.xlu2 %5758, %v4955_v33   ;;  %2086 = vperm.xlu0 %5756, %v5031_v37  }
 0x13c   :  { %v6315_v43 = vpop.f32.mrf.mxu0 }
 0x13d   :  { %v6317_v45 = vpack.c.b16 %v747_v41, %v746_v39 }
 0x13f   :  { %4726 = vmatmul.msk.bf16.gmra.mxu0 %vm358_vm1, %v5637_v42 }
 0x142   :  { %2076 = vperm.xlu1 %5757, %v5029_v46   ;;  %v441_v46 = vadd.f32 %v6315_v43, %v6170_v47  ;;  %v5110_v47 = vld [vmem:[%s7944_s3 + $0x230] sm:$0xff]  ;;  %v5111_v43 = vld [vmem:[%s7944_s3 + $0x238] sm:$0xff] }
 0x143   :  { %2081 = vperm.xlu2 %5758, %v5030_v50   ;;  %1748 = vperm.xlu0 %5756, %v4956_v51  }
 0x144   :  { %v6329_v52 = vpop.f32.mrf.mxu0 }
 0x14a   :  { %2071 = vperm.xlu1 %5757, %v5028_v54  }
 0x14b   :  { %2056 = vperm.xlu2 %5758, %v5025_v56   ;;  %2066 = vperm.xlu0 %5756, %v5027_v58  }
 0x14c   :  { %v445_v60 = vpop.f32.mrf.mxu0 }
 0x14d   :  { %v446_v33 = vadd.f32 %v445_v60, %v6108_v24 }
 0x14f   :  { %4727 = vmatmul.msk.bf16.gmra.mxu0 %vm358_vm1, %v5638_v59  ;;  %v510_v50 = vmax.f32 %v446_v33, 0.0  ;;  %v5132_v33 = vld [vmem:[%s7944_s3 + $0x2e0] sm:$0xff] }
 0x152   :  { %2046 = vperm.xlu1 %5757, %v5023_v62  }
 0x153   :  { %2051 = vperm.xlu2 %5758, %v5024_v63   ;;  %2061 = vperm.xlu0 %5756, %v5026_v2   ;;  %v542_v2 = vpack.c.bf16 %v510_v50, %v510_v50 }
 0x154   :  { %v447_v4 = vpop.f32.mrf.mxu0 }
 0x155   :  { %v448_v28 = vadd.f32 %v447_v4, %v6113_v26  ;;  %v5114_v26 = vld [vmem:[%s7944_s3 + $0x250] sm:$0xff] }
 0x157   :  { %v511_v41 = vmax.f32 %v448_v28, 0.0  ;;  %v6460_v28 = vpop.permute.xlu0 %220 }
 0x159   :  { %v543_v60 = vpack.c.bf16 %v511_v41, %v511_v41 }
 0x15a   :  { %2041 = vperm.xlu1 %5757, %v5022_v5  }
 0x15b   :  { %2026 = vperm.xlu2 %5758, %v5019_v6   ;;  %2036 = vperm.xlu0 %5756, %v5021_v49   ;;  %v751_v6 = vunpack.c.l.b16 %v543_v60 }
 0x15c   :  { %v450_v8 = vpop.f32.mrf.mxu0 }
 0x15d   :  { %v451_v27 = vadd.f32 %v450_v8, %v6151_v40  ;;  %v5112_v40 = vld [vmem:[%s7944_s3 + $0x240] sm:$0xff] }
 0x15f   :  { %4728 = vmatmul.msk.bf16.gmra.mxu0 %vm358_vm1, %v5639_v7  ;;  %v512_v37 = vmax.f32 %v451_v27, 0.0  ;;  %v5113_v7 = vld [vmem:[%s7944_s3 + $0x248] sm:$0xff]  ;;  %v5135_v27 = vld [vmem:[%s7944_s3 + $0x2f8] sm:$0xff] }
 0x161   :  { %v544_v51 = vpack.c.bf16 %v512_v37, %v512_v37  ;;  %v5641_v37 = vld [vmem:[%s7952_s4] sm:$0xff] }
 0x162   :  { %2279 = vperm.xlu1 %5757, %v5068_v11  }
 0x163   :  { %2298 = vperm.xlu2 %5758, %v1189_v9   ;;  %2031 = vperm.xlu0 %5756, %v5020_v12   ;;  %v752_v4 = vunpack.c.l.b16 %v544_v51  ;;  %v750_v9 = vunpack.c.l.b16 %v542_v2  ;;  %v5128_v51 = vld [vmem:[%s7944_s3 + $0x2c0] sm:$0xff] }
 0x164   :  { %v452_v13 = vpop.f32.mrf.mxu0 }
 0x165   :  { %v453_v25 = vadd.f32 %v452_v13, %v6085_v3  ;;  %v5115_v3 = vld [vmem:[%s7944_s3 + $0x258] sm:$0xff]  ;;  %v761_v13 = vpack.c.b16 %v751_v6, %v750_v9 }
 0x167   :  { %v513_v31 = vmax.f32 %v453_v25, 0.0  ;;  %v5134_v25 = vld [vmem:[%s7944_s3 + $0x2f0] sm:$0xff] }
 0x169   :  { %v545_v24 = vpack.c.bf16 %v513_v31, %v513_v31 }
 0x16a   :  { %2343 = vperm.xlu1 %5757, %v6376_v14  }
 0x16b   :  { %2486 = vperm.xlu2 %5758, %v5118_v15   ;;  %2308 = vperm.xlu0 %5756, %v5070_v16   ;;  %v753_v62 = vunpack.c.l.b16 %v545_v24  ;;  %v5109_v16 = vld [vmem:[%s7944_s3 + $0x228] sm:$0xff] }
 0x16c   :  { %v455_v17 = vpop.f32.mrf.mxu0  ;;  %v5129_v24 = vld [vmem:[%s7944_s3 + $0x2c8] sm:$0xff] }
 0x16d   :  { %v456_v19 = vadd.f32 %v455_v17, %v6096_v20  ;;  %v762_v49 = vpack.c.b16 %v753_v62, %v752_v4  ;;  %v5106_v17 = vld [vmem:[%s7944_s3 + $0x210] sm:$0xff]  ;;  %v5125_v62 = vld [vmem:[%s7944_s3 + $0x2a8] sm:$0xff] }
 0x16f   :  { %4729 = vmatmul.msk.bf16.gmra.mxu0 %vm358_vm1, %v5640_v10  ;;  %v514_v20 = vmax.f32 %v456_v19, 0.0 }
 0x171   :  { %v546_v38 = vpack.c.bf16 %v514_v20, %v514_v20  ;;  %v5107_v20 = vld [vmem:[%s7944_s3 + $0x218] sm:$0xff] }
 0x172   :  { %2476 = vperm.xlu1 %5757, %v5116_v21   ;;  %v5108_v21 = vld [vmem:[%s7944_s3 + $0x220] sm:$0xff] }
 0x173   :  { %2481 = vperm.xlu2 %5758, %v5117_v22   ;;  %2491 = vperm.xlu0 %5756, %v5119_v23   ;;  %v754_v54 = vunpack.c.l.b16 %v546_v38  ;;  %v6443_v22 = vpop.permute.xlu2 %235 }
 0x174   :  { %v457_v36 = vpop.f32.mrf.mxu0 }
 0x175   :  { %v458_v32 = vadd.f32 %v457_v36, %v6136_v34  ;;  %v443_v34 = vadd.f32 %v6329_v52, %v6124_v30  ;;  %v6419_v30 = vpop.permute.xlu1 %245  ;;  %v508_v52 = vmax.f32 %v441_v46, 0.0  ;;  %v5126_v46 = vld [vmem:[%s7944_s3 + $0x2b0] sm:$0xff] }
 0x177   :  { %v515_v39 = vmax.f32 %v458_v32, 0.0  ;;  %v509_v59 = vmax.f32 %v443_v34, 0.0  ;;  %v540_v8 = vpack.c.bf16 %v508_v52, %v508_v52  ;;  %v5105_v32 = vld [vmem:[%s7944_s3 + $0x208] sm:$0xff] }
 0x179   :  { %v547_v42 = vpack.c.bf16 %v515_v39, %v515_v39  ;;  %v541_v5 = vpack.c.bf16 %v509_v59, %v509_v59  ;;  %v748_v15 = vunpack.c.l.b16 %v540_v8  ;;  %v6484_v39 = vpop.permute.xlu0 %215  ;;  %v5124_v59 = vld [vmem:[%s7944_s3 + $0x2a0] sm:$0xff] }
 0x17a   :  { %2471 = vperm.xlu1 %5757, %v5115_v3  }
 0x17b   :  { %2456 = vperm.xlu2 %5758, %v5112_v40   ;;  %2466 = vperm.xlu0 %5756, %v5114_v26   ;;  %v755_v56 = vunpack.c.l.b16 %v547_v42  ;;  %v749_v12 = vunpack.c.l.b16 %v541_v5  ;;  %v6464_v31 = vpop.permute.xlu2 %210  ;;  %v5130_v40 = vld [vmem:[%s7944_s3 + $0x2d0] sm:$0xff]  ;;  %v5131_v26 = vld [vmem:[%s7944_s3 + $0x2d8] sm:$0xff] }
 0x17c   :  { %v6417_v58 = vpop.f32.mrf.mxu0  ;;  %v5122_v5 = vld [vmem:[%s7944_s3 + $0x290] sm:$0xff] }
 0x17d   :  { %v763_v63 = vpack.c.b16 %v755_v56, %v754_v54  ;;  %v6435_v10 = vpop.permute.xlu1 %230  ;;  %v760_v19 = vpack.c.b16 %v749_v12, %v748_v15  ;;  %v5642_v54 = vld [vmem:[%s7952_s4 + $0x8] sm:$0xff]  ;;  %v5246_v12 = vld [vmem:[%s7946_s5 + $0x170] sm:$0xff] }
 0x17e   :  { %v5121_v15 = vld [vmem:[%s7944_s3 + $0x288] sm:$0xff] }
 0x17f   :  { %772 = vmatpush.bf16.msra.mxu1 %v763_v63  ;;  %v5127_v63 = vld [vmem:[%s7944_s3 + $0x2b8] sm:$0xff] }
 0x181   :  { %v6504_v42 = vpop.permute.xlu0 %668 }
 0x182   :  { %2446 = vperm.xlu1 %5757, %v5110_v47   ;;  %v5123_v47 = vld [vmem:[%s7944_s3 + $0x298] sm:$0xff] }
 0x183   :  { %773 = vmatpush.bf16.msra.mxu1 %v762_v49  ;;  %2451 = vperm.xlu2 %5758, %v5111_v43   ;;  %v6486_v3 = vpop.permute.xlu2 %205  ;;  %v5120_v43 = vld [vmem:[%s7944_s3 + $0x280] sm:$0xff]  ;;  %v5643_v49 = vld [vmem:[%s7952_s4 + $0x10] sm:$0xff] }
 0x184   :  { %2461 = vperm.xlu0 %5756, %v5113_v7   ;;  %v6430_v11 = vpop.f32.mrf.mxu0 }
 0x185   :  { %v6457_v36 = vpop.permute.xlu1 %225 }
 0x187   :  { %774 = vmatpush.bf16.msra.mxu1 %v761_v13  ;;  %v5247_v13 = vld [vmem:[%s7946_s5 + $0x178] sm:$0xff] }
 0x189   :  { %v6530_v52 = vpop.permute.xlu0 %663 }
 0x18a   :  { %2441 = vperm.xlu1 %5757, %v5109_v16  }
 0x18b   :  { %775 = vmatpush.bf16.msra.mxu1 %v760_v19  ;;  %2426 = vperm.xlu2 %5758, %v5106_v17   ;;  %v6509_v50 = vpop.permute.xlu2 %658 }
 0x18c   :  { %2436 = vperm.xlu0 %5756, %v5108_v21   ;;  %v6445_v23 = vpop.f32.mrf.mxu0 }
 0x18f   :  { %776 = vmatpush.bf16.msra.mxu1 %v6317_v45 }
 0x191   :  { %v6550_v7 = vpop.permute.xlu0 %638 }
 0x192   :  { %2566 = vperm.xlu1 %5757, %v5134_v25   ;;  %v5245_v25 = vld [vmem:[%s7946_s5 + $0x168] sm:$0xff] }
 0x193   :  { %777 = vmatpush.bf16.msra.mxu1 %v6289_v18  ;;  %2571 = vperm.xlu2 %5758, %v5135_v27   ;;  %v5104_v18 = vld [vmem:[%s7944_s3 + $0x200] sm:$0xff]  ;;  %v6532_v2 = vpop.permute.xlu2 %653  ;;  %v5242_v27 = vld [vmem:[%s7946_s5 + $0x150] sm:$0xff] }
 0x194   :  { %2431 = vperm.xlu0 %5756, %v5107_v20   ;;  %v6462_v45 = vpop.f32.mrf.mxu0  ;;  %v5244_v20 = vld [vmem:[%s7946_s5 + $0x160] sm:$0xff] }
 0x197   :  { %778 = vmatpush.bf16.msra.mxu1 %v6264_v61  ;;  %v6480_v61 = vpop.permute.xlu1 %200 }
 0x199   :  { %v6569_v19 = vpop.permute.xlu0 %633 }
 0x19a   :  { %2421 = vperm.xlu1 %5757, %v5105_v32   ;;  %v5644_v32 = vld [vmem:[%s7952_s4 + $0x18] sm:$0xff] }
 0x19b   :  { %779 = vmatpush.bf16.msra.mxu1 %v6240_v29  ;;  %2556 = vperm.xlu2 %5758, %v5132_v33   ;;  %v5133_v29 = vld [vmem:[%s7944_s3 + $0x2e8] sm:$0xff]  ;;  %v6554_v9 = vpop.permute.xlu2 %628 }
 0x19c   :  { %2416 = vperm.xlu0 %5756, %v5104_v18   ;;  %v6482_v38 = vpop.f32.mrf.mxu0 }
 0x19e   :  { %780 = vmatmul.bf16.vlgmr.msra.gmra.mxu1 %v5641_v37  ;;  %v5240_v37 = vld [vmem:[%s7946_s5 + $0x140] sm:$0xff] }
 0x19f   :  { %v6499_v41 = vpop.permute.xlu1 %673 }
 0x1a2   :  { %2546 = vperm.xlu1 %5757, %v5130_v40   ;;  %v6590_v40 = vpop.permute.xlu0 %949 }
 0x1a3   :  { %2551 = vperm.xlu2 %5758, %v5131_v26   ;;  %v6571_v21 = vpop.permute.xlu2 %623  ;;  %v5241_v26 = vld [vmem:[%s7946_s5 + $0x148] sm:$0xff] }
 0x1a4   :  { %2561 = vperm.xlu0 %5756, %v5133_v29   ;;  %v6497_v34 = vpop.f32.mrf.mxu0 }
 0x1a7   :  { %v6522_v60 = vpop.permute.xlu1 %648 }
 0x1aa   :  { %2541 = vperm.xlu1 %5757, %v5129_v24   ;;  %v5243_v24 = vld [vmem:[%s7946_s5 + $0x158] sm:$0xff] }
 0x1ab   :  { %2526 = vperm.xlu2 %5758, %v5126_v46   ;;  %v6595_v29 = vpop.permute.xlu2 %608 }
 0x1ac   :  { %2536 = vperm.xlu0 %5756, %v5128_v51   ;;  %v6517_v56 = vpop.f32.mrf.mxu0  ;;  %v5239_v51 = vld [vmem:[%s7946_s5 + $0x138] sm:$0xff] }
 0x1ae   :  { %785 = vmatmul.bf16.gmra.mxu1 %v5642_v54 }
 0x1af   :  { %v6545_v6 = vpop.permute.xlu1 %643 }
 0x1b2   :  { %2516 = vperm.xlu1 %5757, %v5124_v59   ;;  %v5236_v59 = vld [vmem:[%s7946_s5 + $0x120] sm:$0xff] }
 0x1b3   :  { %2521 = vperm.xlu2 %5758, %v5125_v62   ;;  %v5238_v62 = vld [vmem:[%s7946_s5 + $0x130] sm:$0xff] }
 0x1b4   :  { %2531 = vperm.xlu0 %5756, %v5127_v63   ;;  %v6534_v4 = vpop.f32.mrf.mxu0  ;;  %v6611_v63 = vpop.permute.xlu0 %613 }
 0x1b7   :  { %v6565_v16 = vpop.permute.xlu1 %618 }
 0x1ba   :  { %2511 = vperm.xlu1 %5757, %v5123_v47   ;;  %v5645_v47 = vld [vmem:[%s7952_s4 + $0x20] sm:$0xff] }
 0x1bb   :  { %2496 = vperm.xlu2 %5758, %v5120_v43   ;;  %v6616_v43 = vpop.permute.xlu2 %944 }
 0x1bc   :  { %2506 = vperm.xlu0 %5756, %v5122_v5   ;;  %v6552_v8 = vpop.f32.mrf.mxu0 }
 0x1be   :  { %790 = vmatmul.bf16.gmra.mxu1 %v5643_v49  ;;  %v5310_v49 = vld [vmem:[%s7948_s9 + $0x170] sm:$0xff] }
 0x1bf   :  { %v6585_v18 = vpop.permute.xlu1 %954 }
 0x1c2   :  { %2964 = vperm.xlu1 %5757, %v5246_v12   ;;  %v5311_v12 = vld [vmem:[%s7948_s9 + $0x178] sm:$0xff] }
 0x1c3   :  { %2969 = vperm.xlu2 %5758, %v5247_v13   ;;  %v5237_v13 = vld [vmem:[%s7946_s5 + $0x128] sm:$0xff] }
 0x1c4   :  { %2501 = vperm.xlu0 %5756, %v5121_v15   ;;  %v6567_v17 = vpop.f32.mrf.mxu0 }
 0x1c7   :  { %v6603_v54 = vpop.permute.xlu1 %939 }
 0x1ca   :  { %2959 = vperm.xlu1 %5757, %v5245_v25   ;;  %v6629_v25 = vpop.permute.xlu0 %598 }
 0x1cb   :  { %2944 = vperm.xlu2 %5758, %v5242_v27  }
 0x1cc   :  { %2954 = vperm.xlu0 %5756, %v5244_v20   ;;  %v485_v33 = vpop.f32.mrf.mxu0  ;;  %v6631_v20 = vpop.permute.xlu2 %929 }
 0x1cd   :  { %7960 = vst [vmem:[#allocation3_spill] sm:$0xff] %v6631_v20 }
 0x1ce   :  { %795 = vmatmul.bf16.gmra.mxu1 %v5644_v32  ;;  %v5235_v32 = vld [vmem:[%s7946_s5 + $0x118] sm:$0xff] }
 0x1cf   :  { %v6627_v15 = vpop.permute.xlu1 %603 }
 0x1d2   :  { %2934 = vperm.xlu1 %5757, %v5240_v37   ;;  %v5308_v37 = vld [vmem:[%s7948_s9 + $0x160] sm:$0xff] }
 0x1d3   :  { %2939 = vperm.xlu2 %5758, %v5241_v26   ;;  %v5234_v26 = vld [vmem:[%s7946_s5 + $0x110] sm:$0xff] }
 0x1d4   :  { %2949 = vperm.xlu0 %5756, %v5243_v24   ;;  %v487_v46 = vpop.f32.mrf.mxu0  ;;  %v5646_v24 = vld [vmem:[%s7952_s4 + $0x28] sm:$0xff] }
 0x1da   :  { %2929 = vperm.xlu1 %5757, %v5239_v51   ;;  %v6645_v51 = vpop.permute.xlu1 %919 }
 0x1db   :  { %2914 = vperm.xlu2 %5758, %v5236_v59   ;;  %7961 = vst [vmem:[#allocation4_spill] sm:$0xff] %v6645_v51 }
 0x1dc   :  { %2924 = vperm.xlu0 %5756, %v5238_v62   ;;  %v490_v5 = vpop.f32.mrf.mxu0  ;;  %v6647_v62 = vpop.permute.xlu0 %934 }
 0x1dd   :  { %7962 = vst [vmem:[#allocation5_spill] sm:$0xff] %v6647_v62 }
 0x1de   :  { %800 = vmatmul.bf16.gmra.mxu1 %v5645_v47  ;;  %v6649_v47 = vpop.permute.xlu2 %924 }
 0x1df   :  { %7963 = vst [vmem:[#allocation6_spill] sm:$0xff] %v6649_v47 }
 0x1e2   :  { %3247 = vperm.xlu1 %5757, %v5310_v49   ;;  %v6665_v47 = vpop.permute.xlu1 %914 }
 0x1e3   :  { %3252 = vperm.xlu2 %5758, %v5311_v12   ;;  %v5232_v12 = vld [vmem:[%s7946_s5 + $0x100] sm:$0xff] }
 0x1e4   :  { %2919 = vperm.xlu0 %5756, %v5237_v13   ;;  %v492_v27 = vpop.f32.mrf.mxu0  ;;  %v5233_v13 = vld [vmem:[%s7946_s5 + $0x108] sm:$0xff] }
 0x1ea   :  { %2909 = vperm.xlu1 %5757, %v5235_v32   ;;  %v493_v32 = vadd.f32 %v492_v27, %v6162_v44  ;;  %v486_v44 = vadd.f32 %v485_v33, %v6183_v53  ;;  %v5306_v33 = vld [vmem:[%s7948_s9 + $0x150] sm:$0xff] }
 0x1eb   :  { %3237 = vperm.xlu2 %5758, %v5308_v37   ;;  %v5309_v37 = vld [vmem:[%s7948_s9 + $0x168] sm:$0xff] }
 0x1ec   :  { %2904 = vperm.xlu0 %5756, %v5234_v26   ;;  %v495_v59 = vpop.f32.mrf.mxu0  ;;  %v491_v26 = vadd.f32 %v490_v5, %v6211_v0  ;;  %v529_v48 = vmax.f32 %v493_v32, 0.0  ;;  %v5307_v0 = vld [vmem:[%s7948_s9 + $0x158] sm:$0xff]  ;;  %v6671_v5 = vpop.permute.xlu0 %909  ;;  %v526_v32 = vmax.f32 %v486_v44, 0.0 }
 0x1ed   :  { %v496_v49 = vadd.f32 %v495_v59, %v6138_v35  ;;  %v488_v59 = vadd.f32 %v487_v46, %v6194_v57  ;;  %v5304_v57 = vld [vmem:[%s7948_s9 + $0x140] sm:$0xff]  ;;  %v6676_v46 = vpop.permute.xlu2 %899  ;;  %v6695_v44 = vpop.permute.xlu1 %889 }
 0x1ee   :  { %805 = vmatmul.bf16.gmra.mxu1 %v5646_v24  ;;  %v528_v27 = vmax.f32 %v491_v26, 0.0  ;;  %v561_v53 = vpack.c.bf16 %v529_v48, %v529_v48  ;;  %v478_v48 = vadd.f32 %v6534_v4, %v6443_v22  ;;  %v473_v22 = vadd.f32 %v6497_v34, %v6457_v36  ;;  %v5303_v4 = vld [vmem:[%s7948_s9 + $0x138] sm:$0xff] }
 0x1ef   :  { %v530_v24 = vmax.f32 %v496_v49, 0.0  ;;  %v527_v49 = vmax.f32 %v488_v59, 0.0  ;;  %v558_v59 = vpack.c.bf16 %v526_v32, %v526_v32  ;;  %v471_v36 = vadd.f32 %v6482_v38, %v6460_v28  ;;  %v5301_v28 = vld [vmem:[%s7948_s9 + $0x128] sm:$0xff] }
 0x1f0   :  { %v463_v38 = vadd.f32 %v6430_v11, %v6486_v3  ;;  %v461_v11 = vadd.f32 %v6417_v58, %v6480_v61  ;;  %v5296_v58 = vld [vmem:[%s7948_s9 + $0x100] sm:$0xff]  ;;  %v5297_v61 = vld [vmem:[%s7948_s9 + $0x108] sm:$0xff] }
 0x1f1   :  { %v562_v20 = vpack.c.bf16 %v530_v24, %v530_v24  ;;  %v559_v24 = vpack.c.bf16 %v527_v49, %v527_v49 }
 0x1f2   :  { %2894 = vperm.xlu1 %5757, %v5232_v12   ;;  %v481_v12 = vadd.f32 %v6552_v8, %v6213_v1  ;;  %v476_v1 = vadd.f32 %v6517_v56, %v6435_v10 }
 0x1f3   :  { %2899 = vperm.xlu2 %5758, %v5233_v13   ;;  %v5647_v13 = vld [vmem:[%s7952_s4 + $0x30] sm:$0xff]  ;;  %v1035_v26 = vunpack.c.l.b16 %v562_v20  ;;  %v1032_v10 = vunpack.c.l.b16 %v559_v24 }
 0x1f4   :  { %3242 = vperm.xlu0 %5756, %v5309_v37   ;;  %v497_v35 = vpop.f32.mrf.mxu0  ;;  %v560_v37 = vpack.c.bf16 %v528_v27, %v528_v27  ;;  %v524_v8 = vmax.f32 %v481_v12, 0.0  ;;  %v5302_v20 = vld [vmem:[%s7948_s9 + $0x130] sm:$0xff]  ;;  %v523_v27 = vmax.f32 %v478_v48, 0.0  ;;  %v6705_v49 = vpop.permute.xlu0 %904  ;;  %v522_v34 = vmax.f32 %v476_v1, 0.0 }
 0x1f5   :  { %v498_v51 = vadd.f32 %v497_v35, %v6188_v55  ;;  %v483_v55 = vadd.f32 %v6567_v17, %v6419_v30  ;;  %v468_v12 = vadd.f32 %v6462_v45, %v6484_v39  ;;  %v520_v48 = vmax.f32 %v471_v36, 0.0  ;;  %v5298_v45 = vld [vmem:[%s7948_s9 + $0x110] sm:$0xff] }
 0x1f6   :  { %v555_v32 = vpack.c.bf16 %v523_v27, %v523_v27 }
 0x1f7   :  { %v531_v62 = vmax.f32 %v498_v51, 0.0  ;;  %v525_v17 = vmax.f32 %v483_v55, 0.0  ;;  %v5305_v55 = vld [vmem:[%s7948_s9 + $0x148] sm:$0xff]  ;;  %v519_v39 = vmax.f32 %v468_v12, 0.0  ;;  %v5299_v12 = vld [vmem:[%s7948_s9 + $0x118] sm:$0xff] }
 0x1f9   :  { %v563_v51 = vpack.c.bf16 %v531_v62, %v531_v62  ;;  %v1034_v62 = vunpack.c.l.b16 %v561_v53  ;;  %v6707_v53 = vpop.permute.xlu2 %894  ;;  %v551_v27 = vpack.c.bf16 %v519_v39, %v519_v39  ;;  %v5345_v39 = vld [vmem:[%s7950_s7 + $0x10] sm:$0xff] }
 0x1fa   :  { %3232 = vperm.xlu1 %5757, %v5307_v0   ;;  %v1033_v0 = vunpack.c.l.b16 %v560_v37 }
 0x1fb   :  { %3217 = vperm.xlu2 %5758, %v5304_v57   ;;  %v1036_v30 = vunpack.c.l.b16 %v563_v51  ;;  %v557_v57 = vpack.c.bf16 %v525_v17, %v525_v17  ;;  %v1031_v51 = vunpack.c.l.b16 %v558_v59  ;;  %v554_v17 = vpack.c.bf16 %v522_v34, %v522_v34 }
 0x1fc   :  { %3227 = vperm.xlu0 %5756, %v5306_v33   ;;  %v1043_v56 = vpack.c.b16 %v1034_v62, %v1033_v0  ;;  %v556_v33 = vpack.c.bf16 %v524_v8, %v524_v8  ;;  %v5648_v8 = vld [vmem:[%s7952_s4 + $0x38] sm:$0xff]  ;;  %v552_v59 = vpack.c.bf16 %v520_v48, %v520_v48 }
 0x1fd   :  { %v1044_v35 = vpack.c.b16 %v1036_v30, %v1035_v26  ;;  %v1030_v37 = vunpack.c.l.b16 %v557_v57  ;;  %v1042_v26 = vpack.c.b16 %v1032_v10, %v1031_v51  ;;  %v466_v30 = vadd.f32 %v6445_v23, %v6464_v31  ;;  %v5300_v23 = vld [vmem:[%s7948_s9 + $0x120] sm:$0xff]  ;;  %v6726_v31 = vpop.permute.xlu1 %884 }
 0x1fe   :  { %810 = vmatmul.bf16.gmra.mxu1 %v5647_v13  ;;  %v521_v13 = vmax.f32 %v473_v22, 0.0  ;;  %v1029_v24 = vunpack.c.l.b16 %v556_v33  ;;  %v1027_v0 = vunpack.c.l.b16 %v554_v17  ;;  %v1025_v36 = vunpack.c.l.b16 %v552_v59 }
 0x1ff   :  { %1053 = vmatpush.bf16.msra.mxu2 %v1044_v35  ;;  %v1028_v35 = vunpack.c.l.b16 %v555_v32  ;;  %v518_v3 = vmax.f32 %v466_v30, 0.0  ;;  %v1024_v33 = vunpack.c.l.b16 %v551_v27  ;;  %v2340_v17 = vsub.f32 1.0, %v6376_v14  ;;  %v5391_v27 = vld [vmem:[%s7944_s3 + $0x350] sm:$0xff] }
 0x200   :  { %v553_v62 = vpack.c.bf16 %v521_v13, %v521_v13  ;;  %v1041_v1 = vpack.c.b16 %v1030_v37, %v1029_v24 }
 0x201   :  { %v6735_v22 = vpop.permute.xlu2 %1130  ;;  %v1040_v10 = vpack.c.b16 %v1028_v35, %v1027_v0  ;;  %v5394_v0 = vld [vmem:[%s7944_s3 + $0x368] sm:$0xff] }
 0x202   :  { %3207 = vperm.xlu1 %5757, %v5302_v20   ;;  %v6733_v20 = vpop.permute.xlu0 %879  ;;  %v1026_v57 = vunpack.c.l.b16 %v553_v62  ;;  %v5649_v62 = vld [vmem:[%s7953_s8] sm:$0xff] }
 0x203   :  { %1054 = vmatpush.bf16.msra.mxu2 %v1043_v56  ;;  %3212 = vperm.xlu2 %5758, %v5303_v4   ;;  %v517_v4 = vmax.f32 %v463_v38, 0.0  ;;  %v516_v56 = vmax.f32 %v461_v11, 0.0  ;;  %v5347_v38 = vld [vmem:[%s7951_s11 + $0x10] sm:$0xff] }
 0x204   :  { %3222 = vperm.xlu0 %5756, %v5305_v55   ;;  %v550_v55 = vpack.c.bf16 %v518_v3, %v518_v3  ;;  %v1039_v51 = vpack.c.b16 %v1026_v57, %v1025_v36  ;;  %v6779_v3 = vld [vmem:[%s7945_s1 + $0x18] sm:$0xff]  ;;  %v5393_v57 = vld [vmem:[%s7944_s3 + $0x360] sm:$0xff] }
 0x205   :  { %v549_v34 = vpack.c.bf16 %v517_v4, %v517_v4  ;;  %v548_v13 = vpack.c.bf16 %v516_v56, %v516_v56  ;;  %v6746_v37 = vpop.permute.xlu1 %1157  ;;  %v5650_v56 = vld [vmem:[%s7953_s8 + $0x8] sm:$0xff] }
 0x206   :  { %v1023_v32 = vunpack.c.l.b16 %v550_v55 }
 0x207   :  { %1055 = vmatpush.bf16.msra.mxu2 %v1042_v26  ;;  %v1022_v26 = vunpack.c.l.b16 %v549_v34  ;;  %v5392_v34 = vld [vmem:[%s7944_s3 + $0x358] sm:$0xff] }
 0x208   :  { %v1038_v30 = vpack.c.b16 %v1024_v33, %v1023_v32  ;;  %v5388_v32 = vld [vmem:[%s7944_s3 + $0x338] sm:$0xff] }
 0x209   :  { %v6751_v24 = vpop.permute.xlu2 %1192 }
 0x20a   :  { %3202 = vperm.xlu1 %5757, %v5301_v28   ;;  %v6748_v48 = vpop.permute.xlu0 %1149  ;;  %v1021_v28 = vunpack.c.l.b16 %v548_v13 }
 0x20b   :  { %1056 = vmatpush.bf16.msra.mxu2 %v1041_v1  ;;  %3187 = vperm.xlu2 %5758, %v5298_v45   ;;  %v5395_v1 = vld [vmem:[%s7944_s3 + $0x370] sm:$0xff] }
 0x20c   :  { %3197 = vperm.xlu0 %5756, %v5300_v23   ;;  %v1037_v45 = vpack.c.b16 %v1022_v26, %v1021_v28  ;;  %v5411_v26 = vld [vmem:[%s7944_s3 + $0x3f0] sm:$0xff] }
 0x20d   :  { %v6764_v14 = vpop.permute.xlu1 %1340 }
 0x20e   :  { %815 = vmatmul.bf16.gmra.mxu1 %v5648_v8  ;;  %7964 = vst [vmem:[#allocation7_spill] sm:$0xff] %v6764_v14  ;;  %v5396_v8 = vld [vmem:[%s7944_s3 + $0x378] sm:$0xff] }
 0x20f   :  { %1057 = vmatpush.bf16.msra.mxu2 %v1040_v10 }
 0x211   :  { %v6774_v11 = vpop.permute.xlu2 %1325 }
 0x212   :  { %3177 = vperm.xlu1 %5757, %v5296_v58   ;;  %v6769_v23 = vpop.permute.xlu0 %1335  ;;  %7965 = vst [vmem:[#allocation8_spill] sm:$0xff] %v6774_v11  ;;  %v5389_v58 = vld [vmem:[%s7944_s3 + $0x340] sm:$0xff]  ;;  %v5586_v11 = vld [vmem:[%s7948_s9 + $0x1e8] sm:$0xff] }
 0x213   :  { %1058 = vmatpush.bf16.msra.mxu2 %v1039_v51  ;;  %3182 = vperm.xlu2 %5758, %v5297_v61   ;;  %v5390_v61 = vld [vmem:[%s7944_s3 + $0x348] sm:$0xff] }
 0x214   :  { %3192 = vperm.xlu0 %5756, %v5299_v12  }
 0x215   :  { %v6787_v4 = vpop.permute.xlu1 %1315 }
 0x216   :  { %7966 = vst [vmem:[#allocation9_spill] sm:$0xff] %v6787_v4 }
 0x217   :  { %1059 = vmatpush.bf16.msra.mxu2 %v1038_v30  ;;  %v5387_v30 = vld [vmem:[%s7944_s3 + $0x330] sm:$0xff] }
 0x219   :  { %v6800_v55 = vpop.permute.xlu2 %1320 }
 0x21a   :  { %3449 = vperm.xlu1 %5757, %v2340_v17   ;;  %v6795_v10 = vpop.permute.xlu0 %1330  ;;  %7968 = vst [vmem:[#allocation11_spill] sm:$0xff] %v6800_v55  ;;  %v5651_v17 = vld [vmem:[%s7953_s8 + $0x10] sm:$0xff] }
 0x21b   :  { %v6762_v35 = vpop.f32.mrf.mxu1  ;;  %1060 = vmatpush.bf16.msra.mxu2 %v1037_v45  ;;  %3459 = vperm.xlu2 %5758, %v5347_v38   ;;  %7967 = vst [vmem:[#allocation10_spill] sm:$0xff] %v6795_v10 }
 0x21c   :  { %3430 = vperm.xlu0 %5756, %v5345_v39  }
 0x21d   :  { %v6813_v33 = vpop.permute.xlu1 %1310 }
 0x21e   :  { %1061 = vmatmul.bf16.vlgmr.msra.gmra.mxu2 %v5649_v62  ;;  %7969 = vst [vmem:[#allocation12_spill] sm:$0xff] %v6813_v33  ;;  %v5385_v62 = vld [vmem:[%s7944_s3 + $0x320] sm:$0xff]  ;;  %v5515_v33 = vld [vmem:[%s7946_s5 + $0x1b0] sm:$0xff] }
 0x221   :  { %v6819_v13 = vpop.permute.xlu2 %1415 }
 0x222   :  { %3637 = vperm.xlu1 %5757, %v5395_v1   ;;  %v6817_v12 = vpop.permute.xlu0 %1305  ;;  %7971 = vst [vmem:[#allocation14_spill] sm:$0xff] %v6819_v13  ;;  %v5386_v1 = vld [vmem:[%s7944_s3 + $0x328] sm:$0xff] }
 0x223   :  { %v6781_v59 = vpop.f32.mrf.mxu1  ;;  %3642 = vperm.xlu2 %5758, %v5396_v8   ;;  %7970 = vst [vmem:[#allocation13_spill] sm:$0xff] %v6817_v12  ;;  %v5412_v8 = vld [vmem:[%s7944_s3 + $0x3f8] sm:$0xff]  ;;  %v5402_v13 = vld [vmem:[%s7944_s3 + $0x3a8] sm:$0xff]  ;;  %v5587_v12 = vld [vmem:[%s7948_s9 + $0x1f0] sm:$0xff] }
 0x224   :  { %3494 = vperm.xlu0 %5756, %v6779_v3  }
 0x225   :  { %v6835_v38 = vpop.permute.xlu1 %1295 }
 0x229   :  { %v6839_v39 = vpop.permute.xlu2 %1300 }
 0x22a   :  { %3632 = vperm.xlu1 %5757, %v5394_v0   ;;  %v6837_v45 = vpop.permute.xlu0 %1420 }
 0x22b   :  { %v6802_v36 = vpop.f32.mrf.mxu1  ;;  %3617 = vperm.xlu2 %5758, %v5391_v27   ;;  %7972 = vst [vmem:[#allocation15_spill] sm:$0xff] %v6837_v45 }
 0x22c   :  { %3627 = vperm.xlu0 %5756, %v5393_v57   ;;  %v5410_v57 = vld [vmem:[%s7944_s3 + $0x3e8] sm:$0xff] }
 0x22d   :  { %v6852_v27 = vpop.permute.xlu1 %1410 }
 0x22e   :  { %1066 = vmatmul.bf16.gmra.mxu2 %v5650_v56  ;;  %7973 = vst [vmem:[#allocation16_spill] sm:$0xff] %v6852_v27  ;;  %v5406_v27 = vld [vmem:[%s7944_s3 + $0x3c8] sm:$0xff] }
 0x232   :  { %3607 = vperm.xlu1 %5757, %v5389_v58   ;;  %v6857_v56 = vpop.permute.xlu0 %1405  ;;  %v5383_v58 = vld [vmem:[%s7944_s3 + $0x310] sm:$0xff] }
 0x233   :  { %v6815_v51 = vpop.f32.mrf.mxu1  ;;  %3612 = vperm.xlu2 %5758, %v5390_v61   ;;  %7974 = vst [vmem:[#allocation17_spill] sm:$0xff] %v6857_v56  ;;  %v6862_v61 = vpop.permute.xlu2 %1285  ;;  %v5403_v56 = vld [vmem:[%s7944_s3 + $0x3b0] sm:$0xff] }
 0x234   :  { %3622 = vperm.xlu0 %5756, %v5392_v34   ;;  %7975 = vst [vmem:[#allocation18_spill] sm:$0xff] %v6862_v61  ;;  %v5409_v34 = vld [vmem:[%s7944_s3 + $0x3e0] sm:$0xff] }
 0x23a   :  { %3602 = vperm.xlu1 %5757, %v5388_v32   ;;  %v5652_v32 = vld [vmem:[%s7953_s8 + $0x18] sm:$0xff] }
 0x23b   :  { %v6833_v28 = vpop.f32.mrf.mxu1  ;;  %3717 = vperm.xlu2 %5758, %v5411_v26  }
 0x23c   :  { %3597 = vperm.xlu0 %5756, %v5387_v30   ;;  %v5407_v30 = vld [vmem:[%s7944_s3 + $0x3d0] sm:$0xff] }
 0x23e   :  { %1071 = vmatmul.bf16.gmra.mxu2 %v5651_v17  ;;  %v6875_v17 = vpop.permute.xlu1 %1395 }
 0x23f   :  { %7976 = vst [vmem:[#allocation19_spill] sm:$0xff] %v6875_v17  ;;  %v5381_v17 = vld [vmem:[%s7944_s3 + $0x300] sm:$0xff] }
 0x242   :  { %3587 = vperm.xlu1 %5757, %v5385_v62   ;;  %v5408_v62 = vld [vmem:[%s7944_s3 + $0x3d8] sm:$0xff] }
 0x243   :  { %v6850_v0 = vpop.f32.mrf.mxu1  ;;  %3592 = vperm.xlu2 %5758, %v5386_v1   ;;  %v5384_v1 = vld [vmem:[%s7944_s3 + $0x318] sm:$0xff] }
 0x244   :  { %3722 = vperm.xlu0 %5756, %v5412_v8   ;;  %v6883_v8 = vpop.permute.xlu0 %1290 }
 0x245   :  { %7977 = vst [vmem:[#allocation20_spill] sm:$0xff] %v6883_v8  ;;  %v5520_v8 = vld [vmem:[%s7946_s5 + $0x1d8] sm:$0xff] }
 0x246   :  { %v6898_v45 = vpop.permute.xlu1 %1280 }
 0x247   :  { %7979 = vst [vmem:[#allocation22_spill] sm:$0xff] %v6898_v45 }
 0x24a   :  { %3712 = vperm.xlu1 %5757, %v5410_v57   ;;  %v6885_v57 = vpop.permute.xlu2 %1400 }
 0x24b   :  { %v6870_v26 = vpop.f32.mrf.mxu1  ;;  %3577 = vperm.xlu2 %5758, %v5383_v58   ;;  %7978 = vst [vmem:[#allocation21_spill] sm:$0xff] %v6885_v57 }
 0x24c   :  { %3707 = vperm.xlu0 %5756, %v5409_v34   ;;  %v5382_v34 = vld [vmem:[%s7944_s3 + $0x308] sm:$0xff] }
 0x24e   :  { %1076 = vmatmul.bf16.gmra.mxu2 %v5652_v32  ;;  %v5405_v32 = vld [vmem:[%s7944_s3 + $0x3c0] sm:$0xff] }
 0x252   :  { %3697 = vperm.xlu1 %5757, %v5407_v30   ;;  %v5653_v30 = vld [vmem:[%s7953_s8 + $0x20] sm:$0xff]  ;;  %v6907_v57 = vpop.permute.xlu2 %1385 }
 0x253   :  { %v6887_v58 = vpop.f32.mrf.mxu1  ;;  %3702 = vperm.xlu2 %5758, %v5408_v62   ;;  %7981 = vst [vmem:[#allocation24_spill] sm:$0xff] %v6907_v57 }
 0x254   :  { %3582 = vperm.xlu0 %5756, %v5384_v1   ;;  %v6905_v1 = vpop.permute.xlu0 %1275 }
 0x255   :  { %7980 = vst [vmem:[#allocation23_spill] sm:$0xff] %v6905_v1  ;;  %v5399_v1 = vld [vmem:[%s7944_s3 + $0x390] sm:$0xff] }
 0x25a   :  { %3572 = vperm.xlu1 %5757, %v5382_v34   ;;  %v5404_v34 = vld [vmem:[%s7944_s3 + $0x3b8] sm:$0xff]  ;;  %v6924_v57 = vpop.permute.xlu2 %1270 }
 0x25b   :  { %v6903_v62 = vpop.f32.mrf.mxu1  ;;  %3687 = vperm.xlu2 %5758, %v5405_v32   ;;  %7984 = vst [vmem:[#allocation27_spill] sm:$0xff] %v6924_v57 }
 0x25c   :  { %3567 = vperm.xlu0 %5756, %v5381_v17   ;;  %v6920_v17 = vpop.permute.xlu1 %1265 }
 0x25d   :  { %7982 = vst [vmem:[#allocation25_spill] sm:$0xff] %v6920_v17  ;;  %v5397_v17 = vld [vmem:[%s7944_s3 + $0x380] sm:$0xff] }
 0x25e   :  { %1081 = vmatmul.bf16.gmra.mxu2 %v5653_v30  ;;  %v6922_v30 = vpop.permute.xlu0 %1390 }
 0x25f   :  { %7983 = vst [vmem:[#allocation26_spill] sm:$0xff] %v6922_v30 }
 0x262   :  { %3677 = vperm.xlu1 %5757, %v5403_v56   ;;  %v5401_v56 = vld [vmem:[%s7944_s3 + $0x3a0] sm:$0xff]  ;;  %v6950_v45 = vpop.permute.xlu2 %1365 }
 0x263   :  { %v6918_v32 = vpop.f32.mrf.mxu1  ;;  %3682 = vperm.xlu2 %5758, %v5404_v34   ;;  %7987 = vst [vmem:[#allocation30_spill] sm:$0xff] %v6950_v45  ;;  %v5523_v45 = vld [vmem:[%s7946_s5 + $0x1f0] sm:$0xff] }
 0x264   :  { %3692 = vperm.xlu0 %5756, %v5406_v27   ;;  %v5654_v27 = vld [vmem:[%s7953_s8 + $0x28] sm:$0xff]  ;;  %v6940_v30 = vpop.permute.xlu1 %1380 }
 0x265   :  { %7985 = vst [vmem:[#allocation28_spill] sm:$0xff] %v6940_v30 }
 0x266   :  { %v6945_v57 = vpop.permute.xlu0 %1375 }
 0x267   :  { %7986 = vst [vmem:[#allocation29_spill] sm:$0xff] %v6945_v57  ;;  %v5521_v57 = vld [vmem:[%s7946_s5 + $0x1e0] sm:$0xff] }
 0x26a   :  { %3672 = vperm.xlu1 %5757, %v5402_v13   ;;  %v5398_v13 = vld [vmem:[%s7944_s3 + $0x388] sm:$0xff] }
 0x26b   :  { %v6938_v34 = vpop.f32.mrf.mxu1  ;;  %3657 = vperm.xlu2 %5758, %v5399_v1   ;;  %v5400_v1 = vld [vmem:[%s7944_s3 + $0x398] sm:$0xff] }
 0x26c   :  { %3667 = vperm.xlu0 %5756, %v5401_v56   ;;  %v6958_v30 = vpop.permute.xlu1 %1355 }
 0x26d   :  { %7988 = vst [vmem:[#allocation31_spill] sm:$0xff] %v6958_v30  ;;  %v5519_v30 = vld [vmem:[%s7946_s5 + $0x1d0] sm:$0xff] }
 0x26e   :  { %1086 = vmatmul.bf16.gmra.mxu2 %v5654_v27  ;;  %v5524_v27 = vld [vmem:[%s7946_s5 + $0x1f8] sm:$0xff]  ;;  %v6966_v61 = vpop.permute.xlu0 %1370 }
 0x26f   :  { %7989 = vst [vmem:[#allocation32_spill] sm:$0xff] %v6966_v61 }
 0x272   :  { %3647 = vperm.xlu1 %5757, %v5397_v17   ;;  %v5655_v17 = vld [vmem:[%s7953_s8 + $0x30] sm:$0xff] }
 0x273   :  { %v808_v56 = vpop.f32.mrf.mxu1  ;;  %3652 = vperm.xlu2 %5758, %v5398_v13   ;;  %v6971_v13 = vpop.permute.xlu2 %1360 }
 0x274   :  { %3662 = vperm.xlu0 %5756, %v5400_v1   ;;  %7990 = vst [vmem:[#allocation33_spill] sm:$0xff] %v6971_v13  ;;  %v6982_v61 = vpop.permute.xlu1 %1350 }
 0x275   :  { %7991 = vst [vmem:[#allocation34_spill] sm:$0xff] %v6982_v61  ;;  %v5517_v61 = vld [vmem:[%s7946_s5 + $0x1c0] sm:$0xff] }
 0x27a   :  { %4120 = vperm.xlu1 %5757, %v5524_v27   ;;  %v5522_v27 = vld [vmem:[%s7946_s5 + $0x1e8] sm:$0xff] }
 0x27b   :  { %v811_v1 = vpop.f32.mrf.mxu1  ;;  %4105 = vperm.xlu2 %5758, %v5521_v57   ;;  %v6984_v57 = vpop.permute.xlu0 %1345 }
 0x27c   :  { %4115 = vperm.xlu0 %5756, %v5523_v45   ;;  %7992 = vst [vmem:[#allocation35_spill] sm:$0xff] %v6984_v57  ;;  %v6986_v45 = vpop.permute.xlu2 %1813  ;;  %v812_v4 = vadd.f32 %v811_v1, %v6509_v50  ;;  %v5585_v50 = vld [vmem:[%s7948_s9 + $0x1e0] sm:$0xff] }
 0x27d   :  { %7993 = vst [vmem:[#allocation36_spill] sm:$0xff] %v6986_v45 }
 0x27e   :  { %1091 = vmatmul.bf16.gmra.mxu2 %v5655_v17  ;;  %v5518_v17 = vld [vmem:[%s7946_s5 + $0x1c8] sm:$0xff]  ;;  %v833_v1 = vmax.f32 %v812_v4, 0.0 }
 0x282   :  { %4095 = vperm.xlu1 %5757, %v5519_v30  }
 0x283   :  { %v813_v13 = vpop.f32.mrf.mxu1  ;;  %4100 = vperm.xlu2 %5758, %v5520_v8   ;;  %v5656_v8 = vld [vmem:[%s7953_s8 + $0x38] sm:$0xff]  ;;  %v7002_v45 = vpop.permute.xlu0 %1818 }
 0x284   :  { %4110 = vperm.xlu0 %5756, %v5522_v27   ;;  %v7000_v27 = vpop.permute.xlu1 %1803  ;;  %7995 = vst [vmem:[#allocation38_spill] sm:$0xff] %v7002_v45  ;;  %v7004_v57 = vpop.permute.xlu2 %1808 }
 0x285   :  { %7994 = vst [vmem:[#allocation37_spill] sm:$0xff] %v7000_v27 }
 0x286   :  { %7996 = vst [vmem:[#allocation39_spill] sm:$0xff] %v7004_v57 }
 0x28a   :  { %4090 = vperm.xlu1 %5757, %v5518_v17   ;;  %v5516_v17 = vld [vmem:[%s7946_s5 + $0x1b8] sm:$0xff] }
 0x28b   :  { %v816_v30 = vpop.f32.mrf.mxu1  ;;  %4398 = vperm.xlu2 %5758, %v5587_v12   ;;  %v5588_v12 = vld [vmem:[%s7948_s9 + $0x1f8] sm:$0xff]  ;;  %v7024_v10 = vpop.permute.xlu0 %1793 }
 0x28c   :  { %4085 = vperm.xlu0 %5756, %v5517_v61   ;;  %v817_v27 = vadd.f32 %v816_v30, %v6504_v42  ;;  %v7018_v57 = vpop.permute.xlu1 %1798  ;;  %v809_v42 = vadd.f32 %v808_v56, %v6532_v2  ;;  %v804_v2 = vadd.f32 %v6918_v32, %v6545_v6  ;;  %v802_v56 = vadd.f32 %v6903_v62, %v6550_v7  ;;  %v5584_v6 = vld [vmem:[%s7948_s9 + $0x1d8] sm:$0xff]  ;;  %v5514_v7 = vld [vmem:[%s7946_s5 + $0x1a8] sm:$0xff] }
 0x28e   :  { %1096 = vmatmul.bf16.gmra.mxu2 %v5656_v8  ;;  %v814_v8 = vadd.f32 %v813_v13, %v6530_v52  ;;  %v835_v14 = vmax.f32 %v817_v27, 0.0  ;;  %v7030_v52 = vpop.permute.xlu2 %1783  ;;  %v807_v13 = vadd.f32 %v6938_v34, %v6522_v60  ;;  %v5583_v27 = vld [vmem:[%s7948_s9 + $0x1d0] sm:$0xff]  ;;  %v830_v4 = vmax.f32 %v804_v2, 0.0 }
 0x292   :  { %4075 = vperm.xlu1 %5757, %v5515_v33   ;;  %v834_v33 = vmax.f32 %v814_v8, 0.0 }
 0x293   :  { %v818_v61 = vpop.f32.mrf.mxu1  ;;  %4080 = vperm.xlu2 %5758, %v5516_v17   ;;  %v7056_v62 = vpop.permute.xlu0 %1788  ;;  %v797_v17 = vadd.f32 %v6870_v26, %v6554_v9  ;;  %v5512_v9 = vld [vmem:[%s7946_s5 + $0x198] sm:$0xff]  ;;  %v789_v26 = vadd.f32 %v6815_v51, %v6611_v63  ;;  %v784_v51 = vadd.f32 %v6781_v59, %v6627_v15  ;;  %v5510_v15 = vld [vmem:[%s7946_s5 + $0x188] sm:$0xff] }
 0x294   :  { %v819_v45 = vadd.f32 %v818_v61, %v6499_v41  ;;  %4403 = vperm.xlu0 %5756, %v5588_v12   ;;  %v5513_v41 = vld [vmem:[%s7946_s5 + $0x1a0] sm:$0xff]  ;;  %v7044_v60 = vpop.permute.xlu1 %1773  ;;  %v829_v12 = vmax.f32 %v802_v56, 0.0 }
 0x296   :  { %v836_v55 = vmax.f32 %v819_v45, 0.0  ;;  %v831_v45 = vmax.f32 %v807_v13, 0.0  ;;  %v841_v8 = vpack.c.bf16 %v830_v4, %v829_v12 }
 0x298   :  { %v844_v30 = vpack.c.bf16 %v836_v55, %v835_v14  ;;  %v832_v14 = vmax.f32 %v809_v42, 0.0  ;;  %v843_v55 = vpack.c.bf16 %v834_v33, %v833_v1  ;;  %v792_v42 = vadd.f32 %v6833_v28, %v6565_v16  ;;  %v5511_v16 = vld [vmem:[%s7946_s5 + $0x190] sm:$0xff] }
 0x299   :  { %v827_v33 = vmax.f32 %v797_v17, 0.0  ;;  %v824_v1 = vmax.f32 %v789_v26, 0.0  ;;  %v5577_v17 = vld [vmem:[%s7948_s9 + $0x1a0] sm:$0xff] }
 0x29a   :  { %1133 = vmatpush.bf16.msra.mxu3 %v844_v30  ;;  %4393 = vperm.xlu1 %5757, %v5586_v11   ;;  %v799_v11 = vadd.f32 %v6887_v58, %v6569_v19  ;;  %v842_v34 = vpack.c.bf16 %v832_v14, %v831_v45  ;;  %v7060_v19 = vpop.permute.xlu2 %1778  ;;  %v794_v58 = vadd.f32 %v6850_v0, %v6571_v21  ;;  %v5581_v21 = vld [vmem:[%s7948_s9 + $0x1c0] sm:$0xff]  ;;  %v825_v13 = vmax.f32 %v792_v42, 0.0 }
 0x29b   :  { %4065 = vperm.xlu2 %5758, %v5513_v41   ;;  %v7083_v63 = vpop.permute.xlu0 %1763 }
 0x29c   :  { %4388 = vperm.xlu0 %5756, %v5585_v50   ;;  %v828_v61 = vmax.f32 %v799_v11, 0.0  ;;  %v826_v30 = vmax.f32 %v794_v58, 0.0  ;;  %v7079_v28 = vpop.permute.xlu1 %1768  ;;  %v787_v50 = vadd.f32 %v6802_v36, %v6595_v29  ;;  %v5509_v29 = vld [vmem:[%s7946_s5 + $0x180] sm:$0xff]  ;;  %v822_v36 = vmax.f32 %v784_v51, 0.0  ;;  %v5579_v58 = vld [vmem:[%s7948_s9 + $0x1b0] sm:$0xff] }
 0x29e   :  { %1134 = vmatpush.bf16.msra.mxu3 %v843_v55  ;;  %v840_v41 = vpack.c.bf16 %v828_v61, %v827_v33  ;;  %v839_v2 = vpack.c.bf16 %v826_v30, %v825_v13  ;;  %v782_v55 = vadd.f32 %v6762_v35, %v6629_v25  ;;  %v823_v56 = vmax.f32 %v787_v50, 0.0  ;;  %v5576_v33 = vld [vmem:[%s7948_s9 + $0x198] sm:$0xff]  ;;  %v5578_v30 = vld [vmem:[%s7948_s9 + $0x1a8] sm:$0xff]  ;;  %v5573_v13 = vld [vmem:[%s7948_s9 + $0x180] sm:$0xff] }
 0x2a0   :  { %v838_v45 = vpack.c.bf16 %v824_v1, %v823_v56  ;;  %v821_v11 = vmax.f32 %v782_v55, 0.0  ;;  %v3491_v55 = vsub.f32 1.0, %v6779_v3 }
 0x2a1   :  { %v7051_v32 = vpop.f32.mrf.mxu2 }
 0x2a2   :  { %1135 = vmatpush.bf16.msra.mxu3 %v842_v34  ;;  %4378 = vperm.xlu1 %5757, %v5583_v27   ;;  %v7087_v14 = vpop.permute.xlu2 %2096  ;;  %v5582_v27 = vld [vmem:[%s7948_s9 + $0x1c8] sm:$0xff]  ;;  %v837_v35 = vpack.c.bf16 %v822_v36, %v821_v11  ;;  %v1126_v34 = vld [vmem:[%s7954_s6] sm:$0xf] }
 0x2a3   :  { %4383 = vperm.xlu2 %5758, %v5584_v6   ;;  %v7104_v4 = vpop.permute.xlu0 %2101 }
 0x2a4   :  { %4070 = vperm.xlu0 %5756, %v5514_v7   ;;  %v7102_v25 = vpop.permute.xlu1 %1753  ;;  %7997 = vst [vmem:[#allocation40_spill] sm:$0xff] %v7104_v4  ;;  %v5580_v7 = vld [vmem:[%s7948_s9 + $0x1b8] sm:$0xff] }
 0x2a6   :  { %1136 = vmatpush.bf16.msra.mxu3 %v841_v8  ;;  %v5575_v8 = vld [vmem:[%s7948_s9 + $0x190] sm:$0xff] }
 0x2a9   :  { %v7074_v0 = vpop.f32.mrf.mxu2 }
 0x2aa   :  { %1137 = vmatpush.bf16.msra.mxu3 %v840_v41  ;;  %4060 = vperm.xlu1 %5757, %v5512_v9   ;;  %v7109_v6 = vpop.permute.xlu2 %1758  ;;  %v5574_v41 = vld [vmem:[%s7948_s9 + $0x188] sm:$0xff] }
 0x2ab   :  { %4368 = vperm.xlu2 %5758, %v5581_v21   ;;  %v7127_v42 = vpop.permute.xlu0 %2086 }
 0x2ac   :  { %4055 = vperm.xlu0 %5756, %v5511_v16   ;;  %v7122_v61 = vpop.permute.xlu1 %2091  ;;  %7999 = vst [vmem:[#allocation42_spill] sm:$0xff] %v7127_v42  ;;  %v5622_v16 = vld [vmem:[%s7950_s7 + $0x18] sm:$0xff]  ;;  %v8006_v42 = vld [vmem:[#allocation6_spill] sm:$0xff] }
 0x2ad   :  { %7998 = vst [vmem:[#allocation41_spill] sm:$0xff] %v7122_v61  ;;  %v8007_v61 = vld [vmem:[#allocation4_spill] sm:$0xff] }
 0x2ae   :  { %1138 = vmatpush.bf16.msra.mxu3 %v839_v2  ;;  %v5624_v2 = vld [vmem:[%s7951_s11 + $0x18] sm:$0xff] }
 0x2b1   :  { %v7097_v59 = vpop.f32.mrf.mxu2 }
 0x2b2   :  { %1139 = vmatpush.bf16.msra.mxu3 %v838_v45  ;;  %4045 = vperm.xlu1 %5757, %v5509_v29   ;;  %v7132_v9 = vpop.permute.xlu2 %1743 }
 0x2b3   :  { %4050 = vperm.xlu2 %5758, %v5510_v15   ;;  %v7148_v51 = vpop.permute.xlu0 %1748 }
 0x2b4   :  { %4373 = vperm.xlu0 %5756, %v5582_v27   ;;  %v7140_v21 = vpop.permute.xlu1 %2076 }
 0x2b5   :  { %8000 = vst [vmem:[#allocation43_spill] sm:$0xff] %v7140_v21 }
 0x2b6   :  { %1140 = vmatpush.bf16.msra.mxu3 %v837_v35 }
 0x2b9   :  { %v7117_v12 = vpop.f32.mrf.mxu2  ;;  %1141 = vmatmul.bf16.vlgmr.msra.gmra.mxu3 %v1126_v34 }
 0x2ba   :  { %4363 = vperm.xlu1 %5757, %v5580_v7   ;;  %v7150_v1 = vpop.permute.xlu2 %2081 }
 0x2bb   :  { %4348 = vperm.xlu2 %5758, %v5577_v17   ;;  %8001 = vst [vmem:[#allocation44_spill] sm:$0xff] %v7150_v1  ;;  %v7158_v36 = vpop.permute.xlu0 %2066 }
 0x2bc   :  { %4358 = vperm.xlu0 %5756, %v5579_v58   ;;  %v7156_v29 = vpop.permute.xlu1 %2071  ;;  %8003 = vst [vmem:[#allocation46_spill] sm:$0xff] %v7158_v36 }
 0x2bd   :  { %8002 = vst [vmem:[#allocation45_spill] sm:$0xff] %v7156_v29  ;;  %v8005_v29 = vld [vmem:[#allocation3_spill] sm:$0xff] }
 0x2c1   :  { %v1072_v26 = vpop.f32.mrf.mxu2 }
 0x2c2   :  { %4338 = vperm.xlu1 %5757, %v5575_v8  }
 0x2c3   :  { %4343 = vperm.xlu2 %5758, %v5576_v33  }
 0x2c4   :  { %4353 = vperm.xlu0 %5756, %v5578_v30  }
 0x2c9   :  { %v1074_v50 = vpop.f32.mrf.mxu2 }
 0x2ca   :  { %4333 = vperm.xlu1 %5757, %v5574_v41  }
 0x2cb   :  { %4581 = vperm.xlu2 %5758, %v5622_v16  }
 0x2cc   :  { %4328 = vperm.xlu0 %5756, %v5573_v13   ;;  %v8004_v13 = vld [vmem:[#allocation5_spill] sm:$0xff] }
 0x2d1   :  { %v1077_v56 = vpop.f32.mrf.mxu2 }
 0x2d2   :  { %4610 = vperm.xlu1 %5757, %v5624_v2  }
 0x2d4   :  { %4600 = vperm.xlu0 %5756, %v3491_v55  }
 0x2d9   :  { %v1079_v45 = vpop.f32.mrf.mxu2 }
 0x2e1   :  { %v1082_v15 = vpop.f32.mrf.mxu2 }
 0x2e9   :  { %v1084_v27 = vpop.f32.mrf.mxu2 }
 0x2ea   :  { %v1085_v4 = vadd.f32 %v1084_v27, %v8006_v42  ;;  %v1073_v42 = vadd.f32 %v1072_v26, %v6676_v46  ;;  %v1063_v46 = vadd.f32 %v7051_v32, %v6733_v20 }
 0x2f1   :  { %v1087_v11 = vpop.f32.mrf.mxu2 }
 0x2f2   :  { %v1088_v21 = vadd.f32 %v1087_v11, %v8005_v29  ;;  %v1075_v29 = vadd.f32 %v1074_v50, %v6705_v49 }
 0x2f9   :  { %v1089_v35 = vpop.f32.mrf.mxu2 }
 0x2fa   :  { %v1090_v2 = vadd.f32 %v1089_v35, %v8004_v13  ;;  %v1078_v35 = vadd.f32 %v1077_v56, %v6671_v5  ;;  %v1065_v5 = vadd.f32 %v7074_v0, %v6726_v31  ;;  %v8008_v13 = vld [vmem:[#allocation2_spill] sm:$0xff] }
 0x2fc   :  { %v1108_v27 = vmax.f32 %v1078_v35, 0.0  ;;  %v1103_v56 = vmax.f32 %v1065_v5, 0.0  ;;  %v5663_v35 = vld [vmem:[%s7949_s2 + $0xb0] sm:$0xff] }
 0x301   :  { %v1092_v34 = vpop.f32.mrf.mxu2 }
 0x302   :  { %v1093_v30 = vadd.f32 %v1092_v34, %v6603_v54  ;;  %v1111_v54 = vmax.f32 %v1085_v4, 0.0  ;;  %v1106_v4 = vmax.f32 %v1073_v42, 0.0  ;;  %v5668_v42 = vld [vmem:[%s7949_s2 + $0xd8] sm:$0xff] }
 0x304   :  { %v1114_v1 = vmax.f32 %v1093_v30, 0.0 }
 0x309   :  { %v1094_v7 = vpop.f32.mrf.mxu2 }
 0x30a   :  { %v1095_v3 = vadd.f32 %v1094_v7, %v6616_v43  ;;  %v1083_v43 = vadd.f32 %v1082_v15, %v8007_v61  ;;  %v1112_v7 = vmax.f32 %v1088_v21, 0.0  ;;  %v1070_v61 = vadd.f32 %v7117_v12, %v6707_v53 }
 0x30b   :  { %v1107_v21 = vmax.f32 %v1075_v29, 0.0  ;;  %v1102_v53 = vmax.f32 %v1063_v46, 0.0  ;;  %v5665_v29 = vld [vmem:[%s7949_s2 + $0xc0] sm:$0xff] }
 0x30c   :  { %v1115_v55 = vmax.f32 %v1095_v3, 0.0  ;;  %v1105_v49 = vmax.f32 %v1070_v61, 0.0  ;;  %v5775_v3 = vld [vmem:[%s7947_s0] sm:$0xff] }
 0x30d   :  { %v1120_v50 = vpack.c.bf16 %v1107_v21, %v1106_v4  ;;  %v1118_v12 = vpack.c.bf16 %v1103_v56, %v1102_v53  ;;  %v5669_v4 = vld [vmem:[%s7949_s2 + $0xe0] sm:$0xff] }
 0x311   :  { %v1097_v17 = vpop.f32.mrf.mxu2 }
 0x312   :  { %v1098_v58 = vadd.f32 %v1097_v17, %v6590_v40  ;;  %v1113_v40 = vmax.f32 %v1090_v2, 0.0  ;;  %v1124_v17 = vpack.c.bf16 %v1115_v55, %v1114_v1 }
 0x314   :  { %v1116_v41 = vmax.f32 %v1098_v58, 0.0  ;;  %v1123_v34 = vpack.c.bf16 %v1113_v40, %v1112_v7  ;;  %v1110_v58 = vmax.f32 %v1083_v43, 0.0 }
 0x319   :  { %v1099_v8 = vpop.f32.mrf.mxu2 }
 0x31a   :  { %v1100_v33 = vadd.f32 %v1099_v8, %v6585_v18  ;;  %v1080_v18 = vadd.f32 %v1079_v45, %v6665_v47  ;;  %v1068_v47 = vadd.f32 %v7097_v59, %v6695_v44  ;;  %v1153_v44 = vld [vmem:[%s7955_s10] sm:$0xf] }
 0x31c   :  { %v1117_v16 = vmax.f32 %v1100_v33, 0.0  ;;  %v1109_v11 = vmax.f32 %v1080_v18, 0.0  ;;  %v1104_v26 = vmax.f32 %v1068_v47, 0.0  ;;  %v1174_v33 = vmul.f32 %v5775_v3, %v6748_v48  ;;  %v5658_v18 = vld [vmem:[%s7949_s2 + $0x88] sm:$0xff] }
 0x31e   :  { %v1125_v36 = vpack.c.bf16 %v1117_v16, %v1116_v41  ;;  %v1121_v1 = vpack.c.bf16 %v1109_v11, %v1108_v27  ;;  %v1119_v45 = vpack.c.bf16 %v1105_v49, %v1104_v26  ;;  %v5666_v11 = vld [vmem:[%s7949_s2 + $0xc8] sm:$0xff] }
 0x320   :  { %1160 = vmatpush.bf16.msrb.mxu3 %v1125_v36  ;;  %v1122_v36 = vpack.c.bf16 %v1111_v54, %v1110_v58  ;;  %v5661_v54 = vld [vmem:[%s7949_s2 + $0xa0] sm:$0xff]  ;;  %v5664_v58 = vld [vmem:[%s7949_s2 + $0xb8] sm:$0xff] }
 0x324   :  { %1161 = vmatpush.bf16.msrb.mxu3 %v1124_v17 }
 0x328   :  { %1162 = vmatpush.bf16.msrb.mxu3 %v1123_v34  ;;  %v5662_v34 = vld [vmem:[%s7949_s2 + $0xa8] sm:$0xff] }
 0x32c   :  { %1163 = vmatpush.bf16.msrb.mxu3 %v1122_v36  ;;  %v5667_v36 = vld [vmem:[%s7949_s2 + $0xd0] sm:$0xff] }
 0x330   :  { %1164 = vmatpush.bf16.msrb.mxu3 %v1121_v1 }
 0x334   :  { %1165 = vmatpush.bf16.msrb.mxu3 %v1120_v50 }
 0x338   :  { %1166 = vmatpush.bf16.msrb.mxu3 %v1119_v45 }
 0x33c   :  { %v1142_v15 = vpop.f32.mrf.mxu3  ;;  %1167 = vmatpush.bf16.msrb.mxu3 %v1118_v12 }
 0x33d   :  { %v1143_v0 = vadd.f32 %v1142_v15, %v6735_v22  ;;  %v5671_v15 = vld [vmem:[%s7949_s2 + $0xf0] sm:$0xff] }
 0x33f   :  { %1168 = vmatmul.bf16.vlgmr.msrb.gmra.mxu3 %v1153_v44  ;;  %5759 = vtanh.f32 %v1143_v0 }
 0x344   :  { %v1144_v31 = vpop.f32.mrf.mxu3 }
 0x345   :  { %v5760_v59 = vpop.eup %5759 }
 0x346   :  { %v7185_v20 = vmul.f32 %v5760_v59, %v6748_v48  ;;  %v5672_v59 = vld [vmem:[%s7949_s2 + $0xf8] sm:$0xff] }
 0x348   :  { %v1175_v32 = vmul.f32 1.442695, %v7185_v20 }
 0x34a   :  { %5761 = vpow2.f32 %v1175_v32 }
 0x350   :  { %v5762_v8 = vpop.eup %5761 }
 0x351   :  { %v1177_v30 = vmul.f32 %v5762_v8, %v1174_v33  ;;  %v8009_v33 = vld [vmem:[#allocation10_spill] sm:$0xff] }
 0x353   :  { %v1178_v2 = vadd.f32 %v1177_v30, %v8008_v13 }
 0x3c2   :  { %v1169_v41 = vpop.f32.mrf.mxu3 }
 0x3c3   :  { %v1170_v16 = vadd.f32 %v1169_v41, %v6746_v37  ;;  %v5657_v37 = vld [vmem:[%s7949_s2 + $0x80] sm:$0xff]  ;;  %v8010_v41 = vld [vmem:[#allocation8_spill] sm:$0xff] }
 0x3c5   :  { %v1173_v22 = vmul.f32 %v1170_v16, %v6748_v48  ;;  %v5659_v48 = vld [vmem:[%s7949_s2 + $0x90] sm:$0xff] }
 0x3c7   :  { %v7195_v55 = vadd.f32 %v1178_v2, %v1173_v22 }
 0x3c9   :  { %v7199_v40 = vmul.f32 %v6751_v24, %v7195_v55  ;;  %v5660_v24 = vld [vmem:[%s7949_s2 + $0x98] sm:$0xff] }
 0x3ca   :  { %v1171_v17 = vpop.f32.mrf.mxu3 }
 0x3cb   :  { %v1196_v43 = vpack.c.bf16 %v7199_v40, %v7199_v40  ;;  %v8011_v17 = vld [vmem:[#allocation11_spill] sm:$0xff] }
 0x3cd   :  { %v1552_v7 = vsel %vm407_vm0, %v1196_v43, 0 }
 0x3ce   :  { %1561 = vmatpush.bf16.msrb.mxu0 %v1552_v7  ;;  %5753 = vmatpush.bf16.msrb.mxu2 %v1552_v7 }
 0x3cf   :  { %5754 = vmatpush.bf16.msra.mxu3 %v1552_v7 }
 0x3d1   :  { %4923 = vmatmul.msk.bf16.vlgmr.msrb.gmra.mxu0 %vm358_vm1, %v5657_v37  ;;  %4925 = vmatmul.msk.bf16.vlgmr.msrb.gmra.mxu2 %vm358_vm1, %v5659_v48  ;;  %v8012_v37 = vld [vmem:[#allocation7_spill] sm:$0xff] }
 0x3d2   :  { %4926 = vmatmul.msk.bf16.vlgmr.msra.gmra.mxu3 %vm358_vm1, %v5660_v24  ;;  %v8013_v24 = vld [vmem:[#allocation9_spill] sm:$0xff] }
 0x3e1   :  { %4924 = vmatmul.msk.bf16.gmra.mxu0 %vm358_vm1, %v5658_v18 }
 0x3e2   :  { %4927 = vmatmul.msk.bf16.gmra.mxu3 %vm358_vm1, %v5661_v54 }
 0x3f2   :  { %4928 = vmatmul.msk.bf16.gmra.mxu3 %vm358_vm1, %v5662_v34 }
 0x402   :  { %4929 = vmatmul.msk.bf16.gmra.mxu3 %vm358_vm1, %v5663_v35 }
 0x412   :  { %4930 = vmatmul.msk.bf16.gmra.mxu3 %vm358_vm1, %v5664_v58 }
 0x422   :  { %4931 = vmatmul.msk.bf16.gmra.mxu3 %vm358_vm1, %v5665_v29  ;;  %v8014_v29 = vld [vmem:[#allocation12_spill] sm:$0xff] }
 0x432   :  { %4932 = vmatmul.msk.bf16.gmra.mxu3 %vm358_vm1, %v5666_v11 }
 0x442   :  { %4933 = vmatmul.msk.bf16.gmra.mxu3 %vm358_vm1, %v5667_v36 }
 0x44e   :  { %v1563_v31 = vpop.f32.mrf.mxu0 }
 0x452   :  { %4934 = vmatmul.msk.bf16.gmra.mxu3 %vm358_vm1, %v5668_v42 }
 0x454   :  { %v1573_v13 = vpop.f32.mrf.mxu2 }
 0x455   :  { %v1578_v27 = vpop.f32.mrf.mxu3 }
 0x456   :  { %v1579_v61 = vadd.f32 %v1578_v27, %v6835_v38  ;;  %v5670_v38 = vld [vmem:[%s7949_s2 + $0xe8] sm:$0xff]  ;;  %v1565_v8 = vpop.f32.mrf.mxu0  ;;  %v8015_v27 = vld [vmem:[#allocation13_spill] sm:$0xff] }
 0x458   :  { %v1649_v21 = vmax.f32 %v1579_v61, 0.0 }
 0x45a   :  { %v1681_v5 = vpack.c.bf16 %v1649_v21, %v1649_v21 }
 0x45c   :  { %v1891_v46 = vunpack.c.l.b16 %v1681_v5 }
 0x45d   :  { %v1580_v1 = vpop.f32.mrf.mxu3 }
 0x45e   :  { %v1581_v47 = vadd.f32 %v1580_v1, %v6839_v39  ;;  %v1568_v58 = vpop.f32.mrf.mxu0 }
 0x460   :  { %v1650_v49 = vmax.f32 %v1581_v47, 0.0 }
 0x462   :  { %v1682_v50 = vpack.c.bf16 %v1650_v49, %v1650_v49  ;;  %4935 = vmatmul.msk.bf16.gmra.mxu3 %vm358_vm1, %v5669_v4 }
 0x464   :  { %v1892_v26 = vunpack.c.l.b16 %v1682_v50 }
 0x465   :  { %v1583_v56 = vpop.f32.mrf.mxu3 }
 0x466   :  { %v7258_v45 = vpack.c.b16 %v1892_v26, %v1891_v46  ;;  %v1584_v61 = vadd.f32 %v1583_v56, %v8015_v27 }
 0x46d   :  { %v1585_v53 = vpop.f32.mrf.mxu3 }
 0x472   :  { %4936 = vmatmul.msk.bf16.gmra.mxu3 %vm358_vm1, %v5670_v38  ;;  %v1575_v38 = vpop.f32.mrf.mxu2 }
 0x475   :  { %v1588_v39 = vpop.f32.mrf.mxu3 }
 0x476   :  { %v1589_v18 = vadd.f32 %v1588_v39, %v8013_v24  ;;  %v1651_v39 = vmax.f32 %v1584_v61, 0.0 }
 0x478   :  { %v1653_v21 = vmax.f32 %v1589_v18, 0.0 }
 0x47d   :  { %v1590_v12 = vpop.f32.mrf.mxu3 }
 0x47e   :  { %v1591_v43 = vadd.f32 %v1590_v12, %v8011_v17  ;;  %v1685_v12 = vpack.c.bf16 %v1653_v21, %v1653_v21 }
 0x480   :  { %v1654_v11 = vmax.f32 %v1591_v43, 0.0 }
 0x482   :  { %4937 = vmatmul.msk.bf16.gmra.mxu3 %vm358_vm1, %v5671_v15  ;;  %v1686_v50 = vpack.c.bf16 %v1654_v11, %v1654_v11 }
 0x485   :  { %v1593_v44 = vpop.f32.mrf.mxu3 }
 0x486   :  { %v1594_v16 = vadd.f32 %v1593_v44, %v8010_v41  ;;  %v1895_v41 = vunpack.c.l.b16 %v1685_v12 }
 0x488   :  { %v1655_v54 = vmax.f32 %v1594_v16, 0.0 }
 0x48a   :  { %v1687_v1 = vpack.c.bf16 %v1655_v54, %v1655_v54  ;;  %v8020_v54 = vld [vmem:[#allocation27_spill] sm:$0xff] }
 0x48c   :  { %v1897_v15 = vunpack.c.l.b16 %v1687_v1 }
 0x48d   :  { %v1595_v0 = vpop.f32.mrf.mxu3 }
 0x48e   :  { %v1596_v30 = vadd.f32 %v1595_v0, %v8009_v33 }
 0x490   :  { %v1656_v7 = vmax.f32 %v1596_v30, 0.0  ;;  %v1683_v30 = vpack.c.bf16 %v1651_v39, %v1651_v39 }
 0x492   :  { %4938 = vmatmul.msk.bf16.gmra.mxu3 %vm358_vm1, %v5672_v59  ;;  %v1688_v36 = vpack.c.bf16 %v1656_v7, %v1656_v7  ;;  %v1896_v59 = vunpack.c.l.b16 %v1686_v50  ;;  %v1893_v18 = vunpack.c.l.b16 %v1683_v30  ;;  %v5676_v30 = vld [vmem:[%s7952_s4 + $0x58] sm:$0xff] }
 0x494   :  { %v1898_v46 = vunpack.c.l.b16 %v1688_v36  ;;  %v1906_v7 = vpack.c.b16 %v1896_v59, %v1895_v41 }
 0x495   :  { %v1598_v32 = vpop.f32.mrf.mxu3 }
 0x496   :  { %v1599_v3 = vadd.f32 %v1598_v32, %v6769_v23  ;;  %v1586_v23 = vadd.f32 %v1585_v53, %v8014_v29  ;;  %v8016_v53 = vld [vmem:[#allocation20_spill] sm:$0xff]  ;;  %v1907_v56 = vpack.c.b16 %v1898_v46, %v1897_v15  ;;  %v1570_v32 = vpop.f32.mrf.mxu0 }
 0x497   :  { %v1576_v44 = vadd.f32 %v1575_v38, %v8016_v53  ;;  %v5673_v53 = vld [vmem:[%s7952_s4 + $0x40] sm:$0xff] }
 0x498   :  { %v1657_v22 = vmax.f32 %v1599_v3, 0.0  ;;  %v1652_v49 = vmax.f32 %v1586_v23, 0.0  ;;  %v8017_v3 = vld [vmem:[#allocation18_spill] sm:$0xff]  ;;  %v8021_v23 = vld [vmem:[#allocation25_spill] sm:$0xff] }
 0x499   :  { %v1574_v33 = vadd.f32 %v1573_v13, %v8017_v3  ;;  %v1564_v11 = vadd.f32 %v1563_v31, %v8021_v23  ;;  %v8025_v23 = vld [vmem:[#allocation21_spill] sm:$0xff] }
 0x49a   :  { %v1689_v34 = vpack.c.bf16 %v1657_v22, %v1657_v22  ;;  %v1684_v0 = vpack.c.bf16 %v1652_v49, %v1652_v49  ;;  %v1648_v22 = vmax.f32 %v1576_v44, 0.0 }
 0x49c   :  { %v1899_v47 = vunpack.c.l.b16 %v1689_v34  ;;  %v1894_v43 = vunpack.c.l.b16 %v1684_v0  ;;  %v1566_v34 = vadd.f32 %v1565_v8, %v8020_v54  ;;  %v5674_v0 = vld [vmem:[%s7952_s4 + $0x48] sm:$0xff] }
 0x49d   :  { %v1600_v2 = vpop.f32.mrf.mxu3 }
 0x49e   :  { %v1601_v48 = vadd.f32 %v1600_v2, %v8012_v37  ;;  %v8018_v2 = vld [vmem:[#allocation22_spill] sm:$0xff]  ;;  %v1647_v37 = vmax.f32 %v1574_v33, 0.0  ;;  %v1905_v13 = vpack.c.b16 %v1894_v43, %v1893_v18  ;;  %v1644_v61 = vmax.f32 %v1566_v34, 0.0  ;;  %v8023_v18 = vld [vmem:[#allocation16_spill] sm:$0xff]  ;;  %v8024_v34 = vld [vmem:[#allocation17_spill] sm:$0xff] }
 0x49f   :  { %v1571_v17 = vadd.f32 %v1570_v32, %v8018_v2  ;;  %v5675_v32 = vld [vmem:[%s7952_s4 + $0x50] sm:$0xff]  ;;  %v5677_v2 = vld [vmem:[%s7952_s4 + $0x60] sm:$0xff] }
 0x4a0   :  { %v1658_v35 = vmax.f32 %v1601_v48, 0.0  ;;  %v8019_v48 = vld [vmem:[#allocation23_spill] sm:$0xff]  ;;  %v1679_v36 = vpack.c.bf16 %v1647_v37, %v1647_v37  ;;  %v1676_v49 = vpack.c.bf16 %v1644_v61, %v1644_v61 }
 0x4a1   :  { %v1569_v24 = vadd.f32 %v1568_v58, %v8019_v48  ;;  %v1646_v29 = vmax.f32 %v1571_v17, 0.0  ;;  %v8022_v48 = vld [vmem:[#allocation14_spill] sm:$0xff] }
 0x4a2   :  { %v1690_v42 = vpack.c.bf16 %v1658_v35, %v1658_v35  ;;  %v1680_v35 = vpack.c.bf16 %v1648_v22, %v1648_v22  ;;  %v1886_v38 = vunpack.c.l.b16 %v1676_v49  ;;  %v8028_v49 = vld [vmem:[#allocation26_spill] sm:$0xff] }
 0x4a3   :  { %v1678_v1 = vpack.c.bf16 %v1646_v29, %v1646_v29 }
 0x4a4   :  { %v1900_v4 = vunpack.c.l.b16 %v1690_v42  ;;  %v1645_v42 = vmax.f32 %v1569_v24, 0.0  ;;  %v1890_v21 = vunpack.c.l.b16 %v1680_v35 }
 0x4a5   :  { %v7280_v5 = vpop.f32.mrf.mxu3  ;;  %v1888_v8 = vunpack.c.l.b16 %v1678_v1 }
 0x4a6   :  { %v1908_v26 = vpack.c.b16 %v1900_v4, %v1899_v47  ;;  %v1643_v47 = vmax.f32 %v1564_v11, 0.0  ;;  %v1889_v4 = vunpack.c.l.b16 %v1679_v36  ;;  %v1677_v58 = vpack.c.bf16 %v1645_v42, %v1645_v42  ;;  %v8026_v42 = vld [vmem:[#allocation15_spill] sm:$0xff] }
 0x4a8   :  { %1917 = vmatpush.bf16.msrb.mxu1 %v1908_v26  ;;  %v1903_v50 = vpack.c.b16 %v1890_v21, %v1889_v4  ;;  %v1675_v46 = vpack.c.bf16 %v1643_v47, %v1643_v47  ;;  %v1887_v26 = vunpack.c.l.b16 %v1677_v58  ;;  %v8027_v21 = vld [vmem:[#allocation19_spill] sm:$0xff] }
 0x4aa   :  { %v1902_v39 = vpack.c.b16 %v1888_v8, %v1887_v26  ;;  %v1885_v12 = vunpack.c.l.b16 %v1675_v46 }
 0x4ac   :  { %1918 = vmatpush.bf16.msrb.mxu1 %v1907_v56  ;;  %v1901_v15 = vpack.c.b16 %v1886_v38, %v1885_v12  ;;  %v8029_v38 = vld [vmem:[#allocation24_spill] sm:$0xff] }
 0x4ad   :  { %v7284_v16 = vpop.f32.mrf.mxu3  ;;  %v5679_v12 = vld [vmem:[%s7952_s4 + $0x70] sm:$0xff] }
 0x4b0   :  { %1919 = vmatpush.bf16.msrb.mxu1 %v1906_v7  ;;  %v5678_v7 = vld [vmem:[%s7952_s4 + $0x68] sm:$0xff] }
 0x4b4   :  { %1920 = vmatpush.bf16.msrb.mxu1 %v1905_v13 }
 0x4b5   :  { %v7290_v27 = vpop.f32.mrf.mxu3 }
 0x4b8   :  { %1921 = vmatpush.bf16.msrb.mxu1 %v7258_v45 }
 0x4bc   :  { %1922 = vmatpush.bf16.msrb.mxu1 %v1903_v50 }
 0x4bd   :  { %v7293_v31 = vpop.f32.mrf.mxu3 }
 0x4c0   :  { %1923 = vmatpush.bf16.msrb.mxu1 %v1902_v39 }
 0x4c4   :  { %1924 = vmatpush.bf16.msrb.mxu1 %v1901_v15 }
 0x4c5   :  { %v1613_v44 = vpop.f32.mrf.mxu3 }
 0x4c7   :  { %1925 = vmatmul.bf16.vlgmr.msrb.gmra.mxu1 %v5673_v53 }
 0x4cd   :  { %v1615_v45 = vpop.f32.mrf.mxu3 }
 0x4d5   :  { %v1618_v59 = vpop.f32.mrf.mxu3 }
 0x4d7   :  { %1930 = vmatmul.bf16.gmra.mxu1 %v5674_v0 }
 0x4dd   :  { %v1620_v56 = vpop.f32.mrf.mxu3 }
 0x4e5   :  { %v1623_v3 = vpop.f32.mrf.mxu3 }
 0x4e6   :  { %v1624_v39 = vadd.f32 %v1623_v3, %v8029_v38 }
 0x4e7   :  { %1935 = vmatmul.bf16.gmra.mxu1 %v5675_v32 }
 0x4ed   :  { %v1625_v33 = vpop.f32.mrf.mxu3 }
 0x4ee   :  { %v1626_v8 = vadd.f32 %v1625_v33, %v8028_v49  ;;  %v8031_v33 = vld [vmem:[#allocation29_spill] sm:$0xff] }
 0x4f5   :  { %v1628_v41 = vpop.f32.mrf.mxu3 }
 0x4f6   :  { %v1629_v1 = vadd.f32 %v1628_v41, %v8027_v21 }
 0x4f7   :  { %1940 = vmatmul.bf16.gmra.mxu1 %v5676_v30  ;;  %v8030_v30 = vld [vmem:[#allocation28_spill] sm:$0xff] }
 0x4f8   :  { %v1669_v15 = vmax.f32 %v1629_v1, 0.0  ;;  %v1621_v41 = vadd.f32 %v1620_v56, %v8030_v30 }
 0x4fd   :  { %v1630_v22 = vpop.f32.mrf.mxu3 }
 0x4fe   :  { %v1631_v11 = vadd.f32 %v1630_v22, %v8025_v23  ;;  %v1668_v22 = vmax.f32 %v1626_v8, 0.0 }
 0x500   :  { %v1670_v50 = vmax.f32 %v1631_v11, 0.0 }
 0x505   :  { %v1633_v17 = vpop.f32.mrf.mxu3 }
 0x506   :  { %v1634_v35 = vadd.f32 %v1633_v17, %v8024_v34  ;;  %v1700_v34 = vpack.c.bf16 %v1668_v22, %v1668_v22 }
 0x507   :  { %1945 = vmatmul.bf16.gmra.mxu1 %v5677_v2  ;;  %v1702_v2 = vpack.c.bf16 %v1670_v50, %v1670_v50  ;;  %v8036_v50 = vld [vmem:[#allocation34_spill] sm:$0xff] }
 0x508   :  { %v1671_v47 = vmax.f32 %v1634_v35, 0.0  ;;  %v2177_v1 = vunpack.c.l.b16 %v1700_v34 }
 0x509   :  { %v2179_v35 = vunpack.c.l.b16 %v1702_v2 }
 0x50a   :  { %v1703_v53 = vpack.c.bf16 %v1671_v47, %v1671_v47 }
 0x50c   :  { %v2180_v3 = vunpack.c.l.b16 %v1703_v53 }
 0x50d   :  { %v1635_v43 = vpop.f32.mrf.mxu3 }
 0x50e   :  { %v1636_v54 = vadd.f32 %v1635_v43, %v8023_v18 }
 0x510   :  { %v1672_v36 = vmax.f32 %v1636_v54, 0.0  ;;  %v1666_v54 = vmax.f32 %v1621_v41, 0.0 }
 0x512   :  { %v1704_v46 = vpack.c.bf16 %v1672_v36, %v1672_v36  ;;  %v1698_v21 = vpack.c.bf16 %v1666_v54, %v1666_v54  ;;  %v5681_v54 = vld [vmem:[%s7953_s8 + $0x40] sm:$0xff] }
 0x514   :  { %v2181_v17 = vunpack.c.l.b16 %v1704_v46  ;;  %v2175_v38 = vunpack.c.l.b16 %v1698_v21  ;;  %v5685_v21 = vld [vmem:[%s7953_s8 + $0x60] sm:$0xff] }
 0x515   :  { %v1638_v37 = vpop.f32.mrf.mxu3 }
 0x516   :  { %v1639_v24 = vadd.f32 %v1638_v37, %v8022_v48  ;;  %v1667_v37 = vmax.f32 %v1624_v39, 0.0  ;;  %v1701_v48 = vpack.c.bf16 %v1669_v15, %v1669_v15 }
 0x517   :  { %1950 = vmatmul.bf16.gmra.mxu1 %v5678_v7  ;;  %v1619_v7 = vadd.f32 %v1618_v59, %v8031_v33 }
 0x518   :  { %v1673_v29 = vmax.f32 %v1639_v24, 0.0  ;;  %v8032_v24 = vld [vmem:[#allocation32_spill] sm:$0xff]  ;;  %v1699_v11 = vpack.c.bf16 %v1667_v37, %v1667_v37  ;;  %v2178_v36 = vunpack.c.l.b16 %v1701_v48 }
 0x519   :  { %v1616_v18 = vadd.f32 %v1615_v45, %v8032_v24  ;;  %v1665_v56 = vmax.f32 %v1619_v7, 0.0 }
 0x51a   :  { %v1705_v4 = vpack.c.bf16 %v1673_v29, %v1673_v29  ;;  %v2190_v29 = vpack.c.b16 %v2181_v17, %v2180_v3  ;;  %v2189_v47 = vpack.c.b16 %v2179_v35, %v2178_v36  ;;  %v2176_v8 = vunpack.c.l.b16 %v1699_v11 }
 0x51b   :  { %v1664_v59 = vmax.f32 %v1616_v18, 0.0  ;;  %v1697_v49 = vpack.c.bf16 %v1665_v56, %v1665_v56  ;;  %v5683_v56 = vld [vmem:[%s7953_s8 + $0x50] sm:$0xff] }
 0x51c   :  { %v2182_v0 = vunpack.c.l.b16 %v1705_v4  ;;  %v8035_v4 = vld [vmem:[#allocation31_spill] sm:$0xff]  ;;  %v2188_v39 = vpack.c.b16 %v2177_v1, %v2176_v8 }
 0x51d   :  { %v1640_v13 = vpop.f32.mrf.mxu3  ;;  %v1609_v45 = vadd.f32 %v7290_v27, %v8035_v4  ;;  %v5686_v4 = vld [vmem:[%s7953_s8 + $0x68] sm:$0xff] }
 0x51e   :  { %v1641_v61 = vadd.f32 %v1640_v13, %v8026_v42  ;;  %v8033_v13 = vld [vmem:[#allocation30_spill] sm:$0xff]  ;;  %v8034_v42 = vld [vmem:[#allocation33_spill] sm:$0xff] }
 0x51f   :  { %v1614_v23 = vadd.f32 %v1613_v44, %v8033_v13  ;;  %v1606_v44 = vadd.f32 %v7284_v16, %v8036_v50  ;;  %v1661_v53 = vmax.f32 %v1609_v45, 0.0 }
 0x520   :  { %v1674_v58 = vmax.f32 %v1641_v61, 0.0  ;;  %v1611_v61 = vadd.f32 %v7293_v31, %v8034_v42  ;;  %v5680_v31 = vld [vmem:[%s7952_s4 + $0x78] sm:$0xff] }
 0x521   :  { %v1693_v2 = vpack.c.bf16 %v1661_v53, %v1661_v53  ;;  %v5684_v42 = vld [vmem:[%s7953_s8 + $0x58] sm:$0xff] }
 0x522   :  { %v1706_v26 = vpack.c.bf16 %v1674_v58, %v1674_v58  ;;  %v1663_v58 = vmax.f32 %v1614_v23, 0.0  ;;  %v1662_v46 = vmax.f32 %v1611_v61, 0.0 }
 0x523   :  { %v2170_v48 = vunpack.c.l.b16 %v1693_v2 }
 0x524   :  { %v2183_v32 = vunpack.c.l.b16 %v1706_v26  ;;  %v1696_v26 = vpack.c.bf16 %v1664_v59, %v1664_v59  ;;  %v1695_v27 = vpack.c.bf16 %v1663_v58, %v1663_v58  ;;  %v1694_v30 = vpack.c.bf16 %v1662_v46, %v1662_v46 }
 0x526   :  { %v2191_v43 = vpack.c.b16 %v2183_v32, %v2182_v0  ;;  %v2174_v0 = vunpack.c.l.b16 %v1697_v49  ;;  %v1660_v32 = vmax.f32 %v1606_v44, 0.0  ;;  %v2173_v41 = vunpack.c.l.b16 %v1696_v26  ;;  %v5687_v49 = vld [vmem:[%s7953_s8 + $0x70] sm:$0xff]  ;;  %v5688_v44 = vld [vmem:[%s7953_s8 + $0x78] sm:$0xff] }
 0x527   :  { %1955 = vmatmul.bf16.gmra.mxu1 %v5679_v12  ;;  %v8037_v12 = vld [vmem:[#allocation35_spill] sm:$0xff]  ;;  %v2172_v17 = vunpack.c.l.b16 %v1695_v27  ;;  %v2171_v33 = vunpack.c.l.b16 %v1694_v30  ;;  %v8038_v26 = vld [vmem:[#allocation36_spill] sm:$0xff]  ;;  %v8041_v27 = vld [vmem:[#allocation37_spill] sm:$0xff] }
 0x528   :  { %2200 = vmatpush.bf16.msra.mxu2 %v2191_v43  ;;  %v1604_v15 = vadd.f32 %v7280_v5, %v8037_v12  ;;  %v2187_v22 = vpack.c.b16 %v2175_v38, %v2174_v0  ;;  %v1692_v43 = vpack.c.bf16 %v1660_v32, %v1660_v32 }
 0x529   :  { %v2186_v7 = vpack.c.b16 %v2173_v41, %v2172_v17  ;;  %v2185_v3 = vpack.c.b16 %v2171_v33, %v2170_v48 }
 0x52a   :  { %v1659_v16 = vmax.f32 %v1604_v15, 0.0  ;;  %v2169_v5 = vunpack.c.l.b16 %v1692_v43  ;;  %v8040_v15 = vld [vmem:[#allocation38_spill] sm:$0xff] }
 0x52c   :  { %2201 = vmatpush.bf16.msra.mxu2 %v2190_v29  ;;  %v1691_v37 = vpack.c.bf16 %v1659_v16, %v1659_v16  ;;  %v5682_v29 = vld [vmem:[%s7953_s8 + $0x48] sm:$0xff] }
 0x52e   :  { %v2168_v24 = vunpack.c.l.b16 %v1691_v37 }
 0x530   :  { %2202 = vmatpush.bf16.msra.mxu2 %v2189_v47  ;;  %v2184_v18 = vpack.c.b16 %v2169_v5, %v2168_v24 }
 0x534   :  { %2203 = vmatpush.bf16.msra.mxu2 %v2188_v39 }
 0x537   :  { %1960 = vmatmul.bf16.gmra.mxu1 %v5680_v31  ;;  %v8039_v31 = vld [vmem:[#allocation39_spill] sm:$0xff] }
 0x538   :  { %2204 = vmatpush.bf16.msra.mxu2 %v2187_v22 }
 0x53c   :  { %2205 = vmatpush.bf16.msra.mxu2 %v2186_v7 }
 0x540   :  { %2206 = vmatpush.bf16.msra.mxu2 %v2185_v3 }
 0x544   :  { %v7342_v34 = vpop.f32.mrf.mxu1  ;;  %2207 = vmatpush.bf16.msra.mxu2 %v2184_v18 }
 0x547   :  { %2208 = vmatmul.bf16.vlgmr.msra.gmra.mxu2 %v5681_v54 }
 0x54c   :  { %v7344_v35 = vpop.f32.mrf.mxu1 }
 0x554   :  { %v1931_v13 = vpop.f32.mrf.mxu1 }
 0x557   :  { %2213 = vmatmul.bf16.gmra.mxu2 %v5682_v29 }
 0x55c   :  { %v1933_v23 = vpop.f32.mrf.mxu1 }
 0x564   :  { %v1936_v11 = vpop.f32.mrf.mxu1 }
 0x567   :  { %2218 = vmatmul.bf16.gmra.mxu2 %v5683_v56  ;;  %v1937_v56 = vadd.f32 %v1936_v11, %v7083_v63  ;;  %v1927_v63 = vadd.f32 %v7342_v34, %v7132_v9 }
 0x56c   :  { %v1938_v36 = vpop.f32.mrf.mxu1 }
 0x574   :  { %v1941_v61 = vpop.f32.mrf.mxu1 }
 0x577   :  { %2223 = vmatmul.bf16.gmra.mxu2 %v5684_v42 }
 0x57c   :  { %v1943_v59 = vpop.f32.mrf.mxu1 }
 0x57d   :  { %v1944_v5 = vadd.f32 %v1943_v59, %v7060_v19 }
 0x57f   :  { %v1973_v29 = vmax.f32 %v1944_v5, 0.0 }
 0x584   :  { %v1946_v1 = vpop.f32.mrf.mxu1 }
 0x585   :  { %v1947_v37 = vadd.f32 %v1946_v1, %v7030_v52  ;;  %v1934_v52 = vadd.f32 %v1933_v23, %v7109_v6  ;;  %v1932_v1 = vadd.f32 %v1931_v13, %v7102_v25  ;;  %v5067_v25 = vld [vmem:[%s7954_s6 + $0x4] sm:$0xf] }
 0x587   :  { %2228 = vmatmul.bf16.gmra.mxu2 %v5685_v21  ;;  %v1974_v54 = vmax.f32 %v1947_v37, 0.0  ;;  %v1968_v11 = vmax.f32 %v1932_v1, 0.0 }
 0x58c   :  { %v1948_v47 = vpop.f32.mrf.mxu1 }
 0x58d   :  { %v1949_v43 = vadd.f32 %v1948_v47, %v7056_v62  ;;  %v1970_v47 = vmax.f32 %v1937_v56, 0.0 }
 0x58f   :  { %v1975_v3 = vmax.f32 %v1949_v43, 0.0  ;;  %v2057_v43 = vpop.permute.xlu2 %2056 }
 0x591   :  { %v1986_v62 = vpack.c.bf16 %v1975_v3, %v1974_v54 }
 0x594   :  { %v1951_v45 = vpop.f32.mrf.mxu1 }
 0x595   :  { %v1952_v2 = vadd.f32 %v1951_v45, %v7024_v10  ;;  %v1939_v10 = vadd.f32 %v1938_v36, %v7079_v28  ;;  %v1969_v28 = vmax.f32 %v1934_v52, 0.0 }
 0x597   :  { %2233 = vmatmul.bf16.gmra.mxu2 %v5686_v4  ;;  %v1976_v48 = vmax.f32 %v1952_v2, 0.0  ;;  %v1971_v21 = vmax.f32 %v1939_v10, 0.0  ;;  %v1983_v6 = vpack.c.bf16 %v1969_v28, %v1968_v11  ;;  %v1966_v4 = vmax.f32 %v1927_v63, 0.0 }
 0x599   :  { %v1984_v36 = vpack.c.bf16 %v1971_v21, %v1970_v47 }
 0x59c   :  { %v1953_v58 = vpop.f32.mrf.mxu1 }
 0x59d   :  { %v1954_v41 = vadd.f32 %v1953_v58, %v7018_v57  ;;  %v1942_v57 = vadd.f32 %v1941_v61, %v7044_v60  ;;  %v1929_v60 = vadd.f32 %v7344_v35, %v7148_v51 }
 0x59f   :  { %v1977_v33 = vmax.f32 %v1954_v41, 0.0  ;;  %v1972_v42 = vmax.f32 %v1942_v57, 0.0  ;;  %v1967_v61 = vmax.f32 %v1929_v60, 0.0  ;;  %v2062_v41 = vpop.permute.xlu0 %2061  ;;  %v8048_v57 = vld [vmem:[#allocation46_spill] sm:$0xff] }
 0x5a1   :  { %v1987_v24 = vpack.c.bf16 %v1977_v33, %v1976_v48  ;;  %v1985_v19 = vpack.c.bf16 %v1973_v29, %v1972_v42  ;;  %v1982_v45 = vpack.c.bf16 %v1967_v61, %v1966_v4  ;;  %v8046_v33 = vld [vmem:[#allocation43_spill] sm:$0xff]  ;;  %v8047_v48 = vld [vmem:[#allocation45_spill] sm:$0xff] }
 0x5a4   :  { %v1956_v8 = vpop.f32.mrf.mxu1 }
 0x5a5   :  { %v1957_v0 = vadd.f32 %v1956_v8, %v8041_v27  ;;  %v8044_v27 = vld [vmem:[#allocation42_spill] sm:$0xff] }
 0x5a7   :  { %2238 = vmatmul.bf16.gmra.mxu2 %v5687_v49  ;;  %v1978_v17 = vmax.f32 %v1957_v0, 0.0  ;;  %v2037_v42 = vpop.permute.xlu0 %2036 }
 0x5ac   :  { %v1958_v50 = vpop.f32.mrf.mxu1 }
 0x5ad   :  { %v1959_v12 = vadd.f32 %v1958_v50, %v8039_v31  ;;  %v8042_v31 = vld [vmem:[#allocation41_spill] sm:$0xff] }
 0x5af   :  { %v1979_v22 = vmax.f32 %v1959_v12, 0.0 }
 0x5b1   :  { %v1988_v7 = vpack.c.bf16 %v1979_v22, %v1978_v17  ;;  %v8045_v22 = vld [vmem:[#allocation44_spill] sm:$0xff] }
 0x5b4   :  { %v1961_v46 = vpop.f32.mrf.mxu1 }
 0x5b5   :  { %v1962_v38 = vadd.f32 %v1961_v46, %v8038_v26 }
 0x5b7   :  { %2243 = vmatmul.bf16.gmra.mxu2 %v5688_v44  ;;  %v1980_v32 = vmax.f32 %v1962_v38, 0.0 }
 0x5bc   :  { %v1963_v39 = vpop.f32.mrf.mxu1 }
 0x5bd   :  { %v1964_v53 = vadd.f32 %v1963_v39, %v8040_v15  ;;  %v8043_v15 = vld [vmem:[#allocation40_spill] sm:$0xff] }
 0x5bf   :  { %v1981_v30 = vmax.f32 %v1964_v53, 0.0 }
 0x5c1   :  { %v1989_v16 = vpack.c.bf16 %v1981_v30, %v1980_v32 }
 0x5c3   :  { %2282 = vmatpush.bf16.msra.mxu0 %v1989_v16 }
 0x5c7   :  { %2283 = vmatpush.bf16.msra.mxu0 %v1988_v7 }
 0x5ca   :  { %v7376_v18 = vpop.f32.mrf.mxu2 }
 0x5cb   :  { %2284 = vmatpush.bf16.msra.mxu0 %v1987_v24 }
 0x5cf   :  { %2285 = vmatpush.bf16.msra.mxu0 %v1986_v62 }
 0x5d2   :  { %v7382_v59 = vpop.f32.mrf.mxu2 }
 0x5d3   :  { %2286 = vmatpush.bf16.msra.mxu0 %v1985_v19  ;;  %v2052_v19 = vpop.permute.xlu2 %2051 }
 0x5d7   :  { %2287 = vmatpush.bf16.msra.mxu0 %v1984_v36 }
 0x5da   :  { %v2214_v23 = vpop.f32.mrf.mxu2 }
 0x5db   :  { %2288 = vmatpush.bf16.msra.mxu0 %v1983_v6  ;;  %v2215_v4 = vadd.f32 %v2214_v23, %v2037_v42  ;;  %v5691_v42 = vld [vmem:[%s7949_s2 + $0x110] sm:$0xff] }
 0x5df   :  { %2289 = vmatpush.bf16.msra.mxu0 %v1982_v45 }
 0x5e2   :  { %v2216_v13 = vpop.f32.mrf.mxu2  ;;  %2290 = vmatmul.bf16.vlgmr.msra.gmra.mxu0 %v5067_v25  ;;  %v2032_v25 = vpop.permute.xlu0 %2031 }
 0x5ea   :  { %v2219_v51 = vpop.f32.mrf.mxu2 }
 0x5f2   :  { %v2221_v35 = vpop.f32.mrf.mxu2 }
 0x5f3   :  { %v2222_v1 = vadd.f32 %v2221_v35, %v2052_v19  ;;  %v5694_v19 = vld [vmem:[%s7949_s2 + $0x128] sm:$0xff] }
 0x5f5   :  { %v2254_v61 = vmax.f32 %v2222_v1, 0.0 }
 0x5fa   :  { %v2224_v58 = vpop.f32.mrf.mxu2 }
 0x5fb   :  { %v2225_v52 = vadd.f32 %v2224_v58, %v2057_v43 }
 0x5fd   :  { %v2255_v63 = vmax.f32 %v2225_v52, 0.0  ;;  %v5692_v52 = vld [vmem:[%s7949_s2 + $0x118] sm:$0xff] }
 0x602   :  { %v2226_v49 = vpop.f32.mrf.mxu2 }
 0x603   :  { %v2227_v29 = vadd.f32 %v2226_v49, %v2062_v41  ;;  %v2212_v49 = vadd.f32 %v7382_v59, %v2032_v25 }
 0x605   :  { %v2256_v47 = vmax.f32 %v2227_v29, 0.0 }
 0x607   :  { %v2268_v6 = vpack.c.bf16 %v2256_v47, %v2255_v63 }
 0x60a   :  { %v2229_v9 = vpop.f32.mrf.mxu2 }
 0x60b   :  { %v2230_v54 = vadd.f32 %v2229_v9, %v8048_v57 }
 0x60d   :  { %v2257_v21 = vmax.f32 %v2230_v54, 0.0 }
 0x612   :  { %v2231_v34 = vpop.f32.mrf.mxu2 }
 0x613   :  { %v2232_v5 = vadd.f32 %v2231_v34, %v8047_v48  ;;  %v2027_v34 = vpop.permute.xlu2 %2026 }
 0x614   :  { %v2210_v35 = vadd.f32 %v7376_v18, %v2027_v34  ;;  %v5069_v18 = vld [vmem:[%s7955_s10 + $0x4] sm:$0xf] }
 0x615   :  { %v2258_v62 = vmax.f32 %v2232_v5, 0.0  ;;  %v5697_v34 = vld [vmem:[%s7949_s2 + $0x140] sm:$0xff] }
 0x616   :  { %v2249_v23 = vmax.f32 %v2210_v35, 0.0 }
 0x617   :  { %v2269_v60 = vpack.c.bf16 %v2258_v62, %v2257_v21  ;;  %v5693_v21 = vld [vmem:[%s7949_s2 + $0x120] sm:$0xff] }
 0x61a   :  { %v2234_v8 = vpop.f32.mrf.mxu2 }
 0x61b   :  { %v2235_v7 = vadd.f32 %v2234_v8, %v8046_v33  ;;  %v2251_v8 = vmax.f32 %v2215_v4, 0.0  ;;  %v5696_v4 = vld [vmem:[%s7949_s2 + $0x138] sm:$0xff] }
 0x61d   :  { %v2259_v10 = vmax.f32 %v2235_v7, 0.0 }
 0x622   :  { %v2236_v50 = vpop.f32.mrf.mxu2 }
 0x623   :  { %v2237_v16 = vadd.f32 %v2236_v50, %v8045_v22 }
 0x625   :  { %v2260_v3 = vmax.f32 %v2237_v16, 0.0 }
 0x627   :  { %v2270_v56 = vpack.c.bf16 %v2260_v3, %v2259_v10 }
 0x62a   :  { %v2239_v44 = vpop.f32.mrf.mxu2 }
 0x62b   :  { %v2240_v0 = vadd.f32 %v2239_v44, %v8044_v27 }
 0x62d   :  { %v2261_v37 = vmax.f32 %v2240_v0, 0.0 }
 0x632   :  { %v2241_v46 = vpop.f32.mrf.mxu2 }
 0x633   :  { %v2242_v12 = vadd.f32 %v2241_v46, %v8042_v31 }
 0x635   :  { %v2262_v2 = vmax.f32 %v2242_v12, 0.0  ;;  %v2299_v12 = vpop.permute.xlu2 %2298 }
 0x637   :  { %v2271_v24 = vpack.c.bf16 %v2262_v2, %v2261_v37 }
 0x63a   :  { %v2244_v26 = vpop.f32.mrf.mxu2 }
 0x63b   :  { %v2245_v38 = vadd.f32 %v2244_v26, %v7087_v14  ;;  %v2047_v14 = vpop.permute.xlu1 %2046  ;;  %v1180_v26 = vrot.slane %v7185_v20, 4 }
 0x63c   :  { %v2220_v36 = vadd.f32 %v2219_v51, %v2047_v14  ;;  %v2250_v51 = vmax.f32 %v2212_v49, 0.0  ;;  %v2309_v14 = vpop.permute.xlu0 %2308 }
 0x63d   :  { %v2263_v32 = vmax.f32 %v2245_v38, 0.0  ;;  %v1181_v59 = vadd.f32 %v1180_v26, %v7185_v20  ;;  %v2325_v20 = vmul.f32 %v2299_v12, %v7195_v55 }
 0x63e   :  { %v2253_v45 = vmax.f32 %v2220_v36, 0.0  ;;  %v2265_v38 = vpack.c.bf16 %v2250_v51, %v2249_v23 }
 0x640   :  { %v2267_v9 = vpack.c.bf16 %v2254_v61, %v2253_v45 }
 0x642   :  { %v2246_v39 = vpop.f32.mrf.mxu2 }
 0x643   :  { %v2247_v53 = vadd.f32 %v2246_v39, %v8043_v15  ;;  %v2042_v28 = vpop.permute.xlu1 %2041  ;;  %v1182_v15 = vrot.slane %v1181_v59, 2 }
 0x644   :  { %v2217_v11 = vadd.f32 %v2216_v13, %v2042_v28  ;;  %v7442_v1 = vpop.permute.xlu0 %2491  ;;  %v5695_v28 = vld [vmem:[%s7949_s2 + $0x130] sm:$0xff] }
 0x645   :  { %v2264_v30 = vmax.f32 %v2247_v53, 0.0 }
 0x646   :  { %v2252_v58 = vmax.f32 %v2217_v11, 0.0  ;;  %v7457_v11 = vpop.permute.xlu2 %2486 }
 0x647   :  { %v2272_v17 = vpack.c.bf16 %v2264_v30, %v2263_v32  ;;  %v1183_v32 = vadd.f32 %v1182_v15, %v1181_v59 }
 0x648   :  { %v2266_v46 = vpack.c.bf16 %v2252_v58, %v2251_v8 }
 0x649   :  { %2311 = vmatpush.bf16.msra.mxu1 %v2272_v17  ;;  %v1184_v22 = vrot.slane %v1183_v32, 1 }
 0x64b   :  { %v2280_v50 = vpop.permute.xlu1 %2279  ;;  %v1185_v33 = vadd.f32 %v1184_v22, %v1183_v32 }
 0x64d   :  { %2312 = vmatpush.bf16.msra.mxu1 %v2271_v24 }
 0x64e   :  { %v7462_v45 = vpop.permute.xlu2 %2481 }
 0x651   :  { %2313 = vmatpush.bf16.msra.mxu1 %v2270_v56  ;;  %v5689_v56 = vld [vmem:[%s7949_s2 + $0x100] sm:$0xff] }
 0x653   :  { %v2344_v54 = vpop.permute.xlu1 %2343 }
 0x655   :  { %2314 = vmatpush.bf16.msra.mxu1 %v2269_v60  ;;  %v7447_v60 = vpop.permute.xlu0 %2466 }
 0x656   :  { %v7465_v58 = vpop.permute.xlu2 %2456 }
 0x659   :  { %2315 = vmatpush.bf16.msra.mxu1 %v2268_v6 }
 0x65b   :  { %v7445_v47 = vpop.permute.xlu1 %2476 }
 0x65d   :  { %2316 = vmatpush.bf16.msra.mxu1 %v2267_v9  ;;  %v7455_v63 = vpop.permute.xlu0 %2461 }
 0x65e   :  { %v2452_v51 = vpop.permute.xlu2 %2451 }
 0x65f   :  { %v2291_v44 = vpop.f32.mrf.mxu0 }
 0x660   :  { %v2292_v13 = vadd.f32 %v2291_v44, %v2280_v50 }
 0x661   :  { %2317 = vmatpush.bf16.msra.mxu1 %v2266_v46 }
 0x662   :  { %5763 = vtanh.f32 %v2292_v13 }
 0x663   :  { %v7452_v36 = vpop.permute.xlu1 %2471 }
 0x665   :  { %2318 = vmatpush.bf16.msra.mxu1 %v2265_v38  ;;  %v2437_v6 = vpop.permute.xlu0 %2436 }
 0x667   :  { %v2293_v39 = vpop.f32.mrf.mxu0 }
 0x668   :  { %v5764_v31 = vpop.eup %5763  ;;  %2319 = vmatmul.bf16.vlgmr.msra.gmra.mxu1 %v5069_v18 }
 0x669   :  { %v2301_v53 = vmul.f32 %v5764_v31, %v2299_v12  ;;  %v5698_v31 = vld [vmem:[%s7949_s2 + $0x148] sm:$0xff] }
 0x66b   :  { %v2326_v27 = vmul.f32 1.442695, %v2301_v53  ;;  %v2331_v0 = vrot.slane %v2301_v53, 4  ;;  %v2447_v61 = vpop.permute.xlu1 %2446 }
 0x66d   :  { %5765 = vpow2.f32 %v2326_v27  ;;  %v2332_v30 = vadd.f32 %v2331_v0, %v2301_v53  ;;  %v2432_v49 = vpop.permute.xlu0 %2431  ;;  %v2427_v53 = vpop.permute.xlu2 %2426 }
 0x66f   :  { %v2333_v41 = vrot.slane %v2332_v30, 2 }
 0x671   :  { %v2334_v16 = vadd.f32 %v2333_v41, %v2332_v30 }
 0x673   :  { %v5766_v2 = vpop.eup %5765  ;;  %v2335_v17 = vrot.slane %v2334_v16, 1  ;;  %v2442_v25 = vpop.permute.xlu1 %2441 }
 0x674   :  { %v2328_v43 = vmul.f32 %v5766_v2, %v2325_v20 }
 0x675   :  { %v2336_v7 = vadd.f32 %v2335_v17, %v2334_v16  ;;  %v2417_v8 = vpop.permute.xlu0 %2416  ;;  %v5699_v17 = vld [vmem:[%s7949_s2 + $0x150] sm:$0xff] }
 0x676   :  { %v2329_v24 = vadd.f32 %v2328_v43, %v7199_v40  ;;  %v5690_v40 = vld [vmem:[%s7949_s2 + $0x108] sm:$0xff] }
 0x677   :  { %v7408_v37 = vadd.f32 %v2336_v7, %v1185_v33 }
 0x67b   :  { %v7467_v9 = vpop.permute.xlu1 %2566 }
 0x683   :  { %v2422_v46 = vpop.permute.xlu1 %2421 }
 0x6e5   :  { %v2320_v48 = vpop.f32.mrf.mxu1 }
 0x6e6   :  { %v2321_v5 = vadd.f32 %v2320_v48, %v2309_v14 }
 0x6e8   :  { %v2324_v3 = vmul.f32 %v2321_v5, %v2299_v12 }
 0x6ea   :  { %v7411_v57 = vadd.f32 %v2329_v24, %v2324_v3 }
 0x6ec   :  { %v7414_v10 = vmul.f32 %v2344_v54, %v7411_v57 }
 0x6ed   :  { %v2322_v55 = vpop.f32.mrf.mxu1 }
 0x6ee   :  { %v2347_v29 = vpack.c.bf16 %v7414_v10, %v7414_v10 }
 0x6f0   :  { %v2703_v62 = vsel %vm407_vm0, %v2347_v29, 0 }
 0x6f1   :  { %2712 = vmatpush.bf16.msrb.mxu0 %v2703_v62  ;;  %v5700_v62 = vld [vmem:[%s7949_s2 + $0x158] sm:$0xff] }
 0x6f4   :  { %5200 = vmatmul.msk.bf16.vlgmr.msrb.gmra.mxu0 %vm358_vm1, %v5689_v56 }
 0x704   :  { %5201 = vmatmul.msk.bf16.gmra.mxu0 %vm358_vm1, %v5690_v40 }
 0x714   :  { %5202 = vmatmul.msk.bf16.gmra.mxu0 %vm358_vm1, %v5691_v42 }
 0x724   :  { %5203 = vmatmul.msk.bf16.gmra.mxu0 %vm358_vm1, %v5692_v52 }
 0x734   :  { %5204 = vmatmul.msk.bf16.gmra.mxu0 %vm358_vm1, %v5693_v21 }
 0x744   :  { %5205 = vmatmul.msk.bf16.gmra.mxu0 %vm358_vm1, %v5694_v19 }
 0x754   :  { %5206 = vmatmul.msk.bf16.gmra.mxu0 %vm358_vm1, %v5695_v28 }
 0x764   :  { %5207 = vmatmul.msk.bf16.gmra.mxu0 %vm358_vm1, %v5696_v4 }
 0x771   :  { %v2714_v35 = vpop.f32.mrf.mxu0 }
 0x772   :  { %v2715_v50 = vadd.f32 %v2714_v35, %v2417_v8 }
 0x774   :  { %5208 = vmatmul.msk.bf16.gmra.mxu0 %vm358_vm1, %v5697_v34  ;;  %v2794_v44 = vmax.f32 %v2715_v50, 0.0  ;;  %v5701_v34 = vld [vmem:[%s7949_s2 + $0x160] sm:$0xff]  ;;  %v5702_v50 = vld [vmem:[%s7949_s2 + $0x168] sm:$0xff] }
 0x776   :  { %v2826_v23 = vpack.c.bf16 %v2794_v44, %v2794_v44 }
 0x778   :  { %v3036_v18 = vunpack.c.l.b16 %v2826_v23  ;;  %v7508_v23 = vpop.permute.xlu0 %2561 }
 0x779   :  { %v2716_v13 = vpop.f32.mrf.mxu0 }
 0x77a   :  { %v2717_v26 = vadd.f32 %v2716_v13, %v2422_v46 }
 0x77c   :  { %v2795_v38 = vmax.f32 %v2717_v26, 0.0  ;;  %v5703_v26 = vld [vmem:[%s7949_s2 + $0x170] sm:$0xff] }
 0x77e   :  { %v2827_v59 = vpack.c.bf16 %v2795_v38, %v2795_v38 }
 0x780   :  { %v3037_v39 = vunpack.c.l.b16 %v2827_v59 }
 0x781   :  { %v2719_v12 = vpop.f32.mrf.mxu0 }
 0x782   :  { %v7476_v15 = vpack.c.b16 %v3037_v39, %v3036_v18  ;;  %v2720_v27 = vadd.f32 %v2719_v12, %v2427_v53  ;;  %v7513_v39 = vpop.permute.xlu0 %2536  ;;  %v5704_v12 = vld [vmem:[%s7949_s2 + $0x178] sm:$0xff] }
 0x784   :  { %5209 = vmatmul.msk.bf16.gmra.mxu0 %vm358_vm1, %v5698_v31  ;;  %v2796_v0 = vmax.f32 %v2720_v27, 0.0 }
 0x786   :  { %v2828_v41 = vpack.c.bf16 %v2796_v0, %v2796_v0 }
 0x788   :  { %v3038_v20 = vunpack.c.l.b16 %v2828_v41 }
 0x789   :  { %v2721_v32 = vpop.f32.mrf.mxu0 }
 0x78a   :  { %v2722_v30 = vadd.f32 %v2721_v32, %v2432_v49  ;;  %v7522_v0 = vpop.permute.xlu0 %2531 }
 0x78c   :  { %v2797_v22 = vmax.f32 %v2722_v30, 0.0 }
 0x78e   :  { %v2829_v16 = vpack.c.bf16 %v2797_v22, %v2797_v22 }
 0x790   :  { %v3039_v2 = vunpack.c.l.b16 %v2829_v16 }
 0x791   :  { %v2724_v43 = vpop.f32.mrf.mxu0 }
 0x792   :  { %v7482_v33 = vpack.c.b16 %v3039_v2, %v3038_v20  ;;  %v2725_v7 = vadd.f32 %v2724_v43, %v2437_v6  ;;  %v7530_v43 = vpop.permute.xlu1 %2546 }
 0x794   :  { %5210 = vmatmul.msk.bf16.gmra.mxu0 %vm358_vm1, %v5699_v17  ;;  %v2798_v14 = vmax.f32 %v2725_v7, 0.0 }
 0x796   :  { %v2830_v3 = vpack.c.bf16 %v2798_v14, %v2798_v14 }
 0x798   :  { %v3040_v55 = vunpack.c.l.b16 %v2830_v3 }
 0x799   :  { %v2726_v48 = vpop.f32.mrf.mxu0 }
 0x79a   :  { %v2727_v5 = vadd.f32 %v2726_v48, %v2442_v25 }
 0x79c   :  { %v2799_v24 = vmax.f32 %v2727_v5, 0.0 }
 0x79e   :  { %v2831_v54 = vpack.c.bf16 %v2799_v24, %v2799_v24  ;;  %v2507_v24 = vpop.permute.xlu0 %2506 }
 0x7a0   :  { %v3041_v29 = vunpack.c.l.b16 %v2831_v54 }
 0x7a1   :  { %v2729_v56 = vpop.f32.mrf.mxu0 }
 0x7a2   :  { %v7488_v40 = vpack.c.b16 %v3041_v29, %v3040_v55  ;;  %v2730_v42 = vadd.f32 %v2729_v56, %v2447_v61 }
 0x7a4   :  { %5211 = vmatmul.msk.bf16.gmra.mxu0 %vm358_vm1, %v5700_v62  ;;  %v2800_v52 = vmax.f32 %v2730_v42, 0.0 }
 0x7a6   :  { %v2832_v28 = vpack.c.bf16 %v2800_v52, %v2800_v52 }
 0x7a8   :  { %v3042_v25 = vunpack.c.l.b16 %v2832_v28 }
 0x7a9   :  { %v2731_v21 = vpop.f32.mrf.mxu0 }
 0x7aa   :  { %v2732_v19 = vadd.f32 %v2731_v21, %v2452_v51  ;;  %v7500_v51 = vpop.permute.xlu2 %2571 }
 0x7ac   :  { %v2801_v6 = vmax.f32 %v2732_v19, 0.0 }
 0x7ae   :  { %v2833_v4 = vpack.c.bf16 %v2801_v6, %v2801_v6 }
 0x7b0   :  { %v3043_v49 = vunpack.c.l.b16 %v2833_v4  ;;  %v7535_v4 = vpop.permute.xlu1 %2541 }
 0x7b1   :  { %v2734_v35 = vpop.f32.mrf.mxu0 }
 0x7b2   :  { %v7494_v8 = vpack.c.b16 %v3043_v49, %v3042_v25  ;;  %v7503_v13 = vpop.permute.xlu2 %2556  ;;  %v2735_v54 = vadd.f32 %v2734_v35, %v7465_v58 }
 0x7b4   :  { %5212 = vmatmul.msk.bf16.gmra.mxu0 %vm358_vm1, %v5701_v34  ;;  %v2802_v19 = vmax.f32 %v2735_v54, 0.0 }
 0x7b6   :  { %v2834_v34 = vpack.c.bf16 %v2802_v19, %v2802_v19 }
 0x7b9   :  { %v2736_v61 = vpop.f32.mrf.mxu0 }
 0x7ba   :  { %v7511_v59 = vpop.permute.xlu2 %2551 }
 0x7c1   :  { %v2739_v44 = vpop.f32.mrf.mxu0 }
 0x7c2   :  { %v7515_v31 = vpop.permute.xlu2 %2526 }
 0x7c4   :  { %5213 = vmatmul.msk.bf16.gmra.mxu0 %vm358_vm1, %v5702_v50  ;;  %v2502_v50 = vpop.permute.xlu0 %2501 }
 0x7c9   :  { %v2741_v46 = vpop.f32.mrf.mxu0 }
 0x7ca   :  { %v7526_v22 = vpop.permute.xlu2 %2521  ;;  %v2742_v20 = vadd.f32 %v2741_v46, %v7452_v36 }
 0x7cc   :  { %v2805_v5 = vmax.f32 %v2742_v20, 0.0 }
 0x7ce   :  { %v2837_v42 = vpack.c.bf16 %v2805_v5, %v2805_v5 }
 0x7d0   :  { %v3047_v49 = vunpack.c.l.b16 %v2837_v42  ;;  %v5706_v42 = vld [vmem:[%s7952_s4 + $0x88] sm:$0xff] }
 0x7d1   :  { %v2744_v38 = vpop.f32.mrf.mxu0 }
 0x7d2   :  { %v2745_v30 = vadd.f32 %v2744_v38, %v7445_v47  ;;  %v2497_v21 = vpop.permute.xlu2 %2496 }
 0x7d4   :  { %5214 = vmatmul.msk.bf16.gmra.mxu0 %vm358_vm1, %v5703_v26  ;;  %v2806_v7 = vmax.f32 %v2745_v30, 0.0  ;;  %v2517_v30 = vpop.permute.xlu1 %2516 }
 0x7d6   :  { %v2838_v36 = vpack.c.bf16 %v2806_v7, %v2806_v7 }
 0x7d8   :  { %v3048_v6 = vunpack.c.l.b16 %v2838_v36 }
 0x7d9   :  { %v2746_v18 = vpop.f32.mrf.mxu0 }
 0x7da   :  { %v2747_v32 = vadd.f32 %v2746_v18, %v7462_v45  ;;  %v2737_v45 = vadd.f32 %v2736_v61, %v7455_v63  ;;  %v3044_v18 = vunpack.c.l.b16 %v2834_v34 }
 0x7dc   :  { %v2807_v2 = vmax.f32 %v2747_v32, 0.0  ;;  %v2803_v56 = vmax.f32 %v2737_v45, 0.0  ;;  %v2512_v7 = vpop.permute.xlu1 %2511 }
 0x7de   :  { %v2839_v47 = vpack.c.bf16 %v2807_v2, %v2807_v2  ;;  %v2835_v25 = vpack.c.bf16 %v2803_v56, %v2803_v56 }
 0x7e0   :  { %v3049_v52 = vunpack.c.l.b16 %v2839_v47  ;;  %v3045_v46 = vunpack.c.l.b16 %v2835_v25 }
 0x7e1   :  { %v2749_v53 = vpop.f32.mrf.mxu0 }
 0x7e2   :  { %v2750_v27 = vadd.f32 %v2749_v53, %v7457_v11  ;;  %v2740_v11 = vadd.f32 %v2739_v44, %v7447_v60  ;;  %v3058_v58 = vpack.c.b16 %v3049_v52, %v3048_v6  ;;  %v3056_v32 = vpack.c.b16 %v3045_v46, %v3044_v18 }
 0x7e4   :  { %5215 = vmatmul.msk.bf16.gmra.mxu0 %vm358_vm1, %v5704_v12  ;;  %v2808_v41 = vmax.f32 %v2750_v27, 0.0  ;;  %v2804_v55 = vmax.f32 %v2740_v11, 0.0 }
 0x7e6   :  { %v2840_v14 = vpack.c.bf16 %v2808_v41, %v2808_v41  ;;  %v2836_v28 = vpack.c.bf16 %v2804_v55, %v2804_v55 }
 0x7e8   :  { %v3050_v29 = vunpack.c.l.b16 %v2840_v14  ;;  %v3046_v35 = vunpack.c.l.b16 %v2836_v28 }
 0x7e9   :  { %v2751_v16 = vpop.f32.mrf.mxu0 }
 0x7ea   :  { %v2752_v17 = vadd.f32 %v2751_v16, %v7442_v1  ;;  %v3057_v38 = vpack.c.b16 %v3047_v49, %v3046_v35 }
 0x7ec   :  { %v2809_v48 = vmax.f32 %v2752_v17, 0.0 }
 0x7ee   :  { %v2841_v3 = vpack.c.bf16 %v2809_v48, %v2809_v48 }
 0x7f0   :  { %v3051_v62 = vunpack.c.l.b16 %v2841_v3  ;;  %v5705_v3 = vld [vmem:[%s7952_s4 + $0x80] sm:$0xff] }
 0x7f1   :  { %v2754_v1 = vpop.f32.mrf.mxu0 }
 0x7f2   :  { %v3059_v60 = vpack.c.b16 %v3051_v62, %v3050_v29  ;;  %v2755_v63 = vadd.f32 %v2754_v1, %v2497_v21 }
 0x7f4   :  { %3068 = vmatpush.bf16.msrb.mxu2 %v3059_v60  ;;  %v2810_v61 = vmax.f32 %v2755_v63, 0.0 }
 0x7f6   :  { %v2842_v12 = vpack.c.bf16 %v2810_v61, %v2810_v61 }
 0x7f8   :  { %3069 = vmatpush.bf16.msrb.mxu2 %v3058_v58  ;;  %v3319_v41 = vunpack.c.l.b16 %v2842_v12  ;;  %v5707_v58 = vld [vmem:[%s7952_s4 + $0x90] sm:$0xff]  ;;  %v5710_v12 = vld [vmem:[%s7952_s4 + $0xa8] sm:$0xff] }
 0x7f9   :  { %v2756_v44 = vpop.f32.mrf.mxu0 }
 0x7fa   :  { %v2757_v26 = vadd.f32 %v2756_v44, %v2502_v50 }
 0x7fc   :  { %v2811_v53 = vmax.f32 %v2757_v26, 0.0  ;;  %3070 = vmatpush.bf16.msrb.mxu2 %v3057_v38  ;;  %v5709_v26 = vld [vmem:[%s7952_s4 + $0xa0] sm:$0xff] }
 0x7fe   :  { %v2843_v27 = vpack.c.bf16 %v2811_v53, %v2811_v53 }
 0x800   :  { %v3320_v16 = vunpack.c.l.b16 %v2843_v27  ;;  %3071 = vmatpush.bf16.msrb.mxu2 %v3056_v32 }
 0x801   :  { %v2759_v20 = vpop.f32.mrf.mxu0 }
 0x802   :  { %v7537_v2 = vpack.c.b16 %v3320_v16, %v3319_v41  ;;  %v2760_v17 = vadd.f32 %v2759_v20, %v2507_v24 }
 0x804   :  { %3072 = vmatpush.bf16.msrb.mxu2 %v7494_v8  ;;  %v2812_v11 = vmax.f32 %v2760_v17, 0.0 }
 0x806   :  { %v2844_v45 = vpack.c.bf16 %v2812_v11, %v2812_v11 }
 0x808   :  { %3073 = vmatpush.bf16.msrb.mxu2 %v7488_v40  ;;  %v3321_v54 = vunpack.c.l.b16 %v2844_v45 }
 0x809   :  { %v2761_v14 = vpop.f32.mrf.mxu0 }
 0x80a   :  { %v2762_v48 = vadd.f32 %v2761_v14, %v2512_v7 }
 0x80c   :  { %v2813_v5 = vmax.f32 %v2762_v48, 0.0  ;;  %3074 = vmatpush.bf16.msrb.mxu2 %v7482_v33 }
 0x80e   :  { %v2845_v47 = vpack.c.bf16 %v2813_v5, %v2813_v5 }
 0x810   :  { %v3322_v55 = vunpack.c.l.b16 %v2845_v47  ;;  %3075 = vmatpush.bf16.msrb.mxu2 %v7476_v15 }
 0x811   :  { %v2764_v8 = vpop.f32.mrf.mxu0 }
 0x812   :  { %v7546_v24 = vpack.c.b16 %v3322_v55, %v3321_v54  ;;  %v2765_v40 = vadd.f32 %v2764_v8, %v2517_v30 }
 0x813   :  { %3076 = vmatmul.bf16.vlgmr.msrb.gmra.mxu2 %v5705_v3 }
 0x814   :  { %v2814_v36 = vmax.f32 %v2765_v40, 0.0 }
 0x816   :  { %v2846_v1 = vpack.c.bf16 %v2814_v36, %v2814_v36 }
 0x818   :  { %v3323_v52 = vunpack.c.l.b16 %v2846_v1 }
 0x819   :  { %v2766_v29 = vpop.f32.mrf.mxu0 }
 0x81a   :  { %v2767_v62 = vadd.f32 %v2766_v29, %v7526_v22 }
 0x81c   :  { %v2815_v33 = vmax.f32 %v2767_v62, 0.0 }
 0x81e   :  { %v2847_v56 = vpack.c.bf16 %v2815_v33, %v2815_v33 }
 0x820   :  { %v3324_v60 = vunpack.c.l.b16 %v2847_v56 }
 0x821   :  { %v2769_v21 = vpop.f32.mrf.mxu0 }
 0x822   :  { %v7552_v15 = vpack.c.b16 %v3324_v60, %v3323_v52  ;;  %v2770_v19 = vadd.f32 %v2769_v21, %v7515_v31  ;;  %v5708_v31 = vld [vmem:[%s7952_s4 + $0x98] sm:$0xff] }
 0x823   :  { %3081 = vmatmul.bf16.gmra.mxu2 %v5706_v42 }
 0x824   :  { %v2816_v28 = vmax.f32 %v2770_v19, 0.0 }
 0x826   :  { %v2848_v22 = vpack.c.bf16 %v2816_v28, %v2816_v28  ;;  %v5712_v28 = vld [vmem:[%s7952_s4 + $0xb8] sm:$0xff] }
 0x828   :  { %v3325_v34 = vunpack.c.l.b16 %v2848_v22 }
 0x829   :  { %v2771_v6 = vpop.f32.mrf.mxu0 }
 0x82a   :  { %v2772_v63 = vadd.f32 %v2771_v6, %v7522_v0  ;;  %v5713_v6 = vld [vmem:[%s7953_s8 + $0x80] sm:$0xff] }
 0x82c   :  { %v2817_v25 = vmax.f32 %v2772_v63, 0.0 }
 0x82e   :  { %v2849_v49 = vpack.c.bf16 %v2817_v25, %v2817_v25  ;;  %v5714_v25 = vld [vmem:[%s7953_s8 + $0x88] sm:$0xff] }
 0x830   :  { %v3326_v35 = vunpack.c.l.b16 %v2849_v49 }
 0x831   :  { %v2774_v61 = vpop.f32.mrf.mxu0 }
 0x832   :  { %v3338_v50 = vpack.c.b16 %v3326_v35, %v3325_v34  ;;  %v5716_v34 = vld [vmem:[%s7953_s8 + $0x98] sm:$0xff] }
 0x833   :  { %3086 = vmatmul.bf16.gmra.mxu2 %v5707_v58 }
 0x839   :  { %v2776_v44 = vpop.f32.mrf.mxu0 }
 0x83a   :  { %v2777_v5 = vadd.f32 %v2776_v44, %v7535_v4 }
 0x83c   :  { %v2819_v8 = vmax.f32 %v2777_v5, 0.0 }
 0x83e   :  { %v2851_v1 = vpack.c.bf16 %v2819_v8, %v2819_v8 }
 0x840   :  { %v3328_v52 = vunpack.c.l.b16 %v2851_v1 }
 0x841   :  { %v2779_v46 = vpop.f32.mrf.mxu0 }
 0x842   :  { %v2780_v7 = vadd.f32 %v2779_v46, %v7530_v43  ;;  %v5718_v46 = vld [vmem:[%s7953_s8 + $0xa8] sm:$0xff] }
 0x843   :  { %3091 = vmatmul.bf16.gmra.mxu2 %v5708_v31 }
 0x849   :  { %v2781_v0 = vpop.f32.mrf.mxu0 }
 0x84a   :  { %v2782_v20 = vadd.f32 %v2781_v0, %v7511_v59  ;;  %v2820_v59 = vmax.f32 %v2780_v7, 0.0 }
 0x84c   :  { %v2821_v47 = vmax.f32 %v2782_v20, 0.0  ;;  %v2852_v4 = vpack.c.bf16 %v2820_v59, %v2820_v59  ;;  %v5720_v20 = vld [vmem:[%s7953_s8 + $0xb8] sm:$0xff] }
 0x84e   :  { %v2853_v43 = vpack.c.bf16 %v2821_v47, %v2821_v47  ;;  %v3329_v42 = vunpack.c.l.b16 %v2852_v4 }
 0x850   :  { %v3330_v33 = vunpack.c.l.b16 %v2853_v43 }
 0x851   :  { %v2784_v38 = vpop.f32.mrf.mxu0 }
 0x852   :  { %v2785_v30 = vadd.f32 %v2784_v38, %v7503_v13  ;;  %v5711_v13 = vld [vmem:[%s7952_s4 + $0xb0] sm:$0xff]  ;;  %v3340_v60 = vpack.c.b16 %v3330_v33, %v3329_v42  ;;  %v2965_v38 = vpop.permute.xlu1 %2964 }
 0x853   :  { %3096 = vmatmul.bf16.gmra.mxu2 %v5709_v26  ;;  %v2970_v26 = vpop.permute.xlu2 %2969 }
 0x854   :  { %v2822_v14 = vmax.f32 %v2785_v30, 0.0  ;;  %v2955_v30 = vpop.permute.xlu0 %2954 }
 0x856   :  { %v2854_v54 = vpack.c.bf16 %v2822_v14, %v2822_v14 }
 0x858   :  { %v3331_v62 = vunpack.c.l.b16 %v2854_v54 }
 0x859   :  { %v2786_v18 = vpop.f32.mrf.mxu0 }
 0x85a   :  { %v2787_v32 = vadd.f32 %v2786_v18, %v7508_v23  ;;  %v2775_v23 = vadd.f32 %v2774_v61, %v7513_v39 }
 0x85c   :  { %v2823_v17 = vmax.f32 %v2787_v32, 0.0  ;;  %v2818_v29 = vmax.f32 %v2775_v23, 0.0 }
 0x85e   :  { %v2850_v56 = vpack.c.bf16 %v2818_v29, %v2818_v29 }
 0x860   :  { %v3327_v21 = vunpack.c.l.b16 %v2850_v56 }
 0x861   :  { %v2789_v53 = vpop.f32.mrf.mxu0 }
 0x862   :  { %v2790_v27 = vadd.f32 %v2789_v53, %v7467_v9  ;;  %v2855_v9 = vpack.c.bf16 %v2823_v17, %v2823_v17  ;;  %v3339_v19 = vpack.c.b16 %v3328_v52, %v3327_v21  ;;  %v2945_v53 = vpop.permute.xlu2 %2944 }
 0x863   :  { %3101 = vmatmul.bf16.gmra.mxu2 %v5710_v12  ;;  %v5719_v12 = vld [vmem:[%s7953_s8 + $0xb0] sm:$0xff] }
 0x864   :  { %v2824_v41 = vmax.f32 %v2790_v27, 0.0  ;;  %v3332_v40 = vunpack.c.l.b16 %v2855_v9  ;;  %v2960_v27 = vpop.permute.xlu1 %2959 }
 0x866   :  { %v2856_v48 = vpack.c.bf16 %v2824_v41, %v2824_v41  ;;  %v3341_v39 = vpack.c.b16 %v3332_v40, %v3331_v62 }
 0x868   :  { %v3333_v55 = vunpack.c.l.b16 %v2856_v48 }
 0x869   :  { %v2791_v16 = vpop.f32.mrf.mxu0 }
 0x86a   :  { %v2792_v11 = vadd.f32 %v2791_v16, %v7500_v51  ;;  %v2940_v41 = vpop.permute.xlu2 %2939 }
 0x86c   :  { %v2825_v45 = vmax.f32 %v2792_v11, 0.0  ;;  %v2935_v17 = vpop.permute.xlu1 %2934  ;;  %v2950_v11 = vpop.permute.xlu0 %2949 }
 0x86e   :  { %v2857_v3 = vpack.c.bf16 %v2825_v45, %v2825_v45 }
 0x870   :  { %v3334_v51 = vunpack.c.l.b16 %v2857_v3 }
 0x872   :  { %v3342_v36 = vpack.c.b16 %v3334_v51, %v3333_v55  ;;  %v2915_v14 = vpop.permute.xlu2 %2914 }
 0x873   :  { %3106 = vmatmul.bf16.gmra.mxu2 %v5711_v13 }
 0x874   :  { %3351 = vmatpush.bf16.msrb.mxu1 %v3342_v36  ;;  %v2930_v48 = vpop.permute.xlu1 %2929  ;;  %v2925_v3 = vpop.permute.xlu0 %2924 }
 0x878   :  { %3352 = vmatpush.bf16.msrb.mxu1 %v3341_v39 }
 0x87a   :  { %v7623_v55 = vpop.permute.xlu2 %3252 }
 0x87c   :  { %3353 = vmatpush.bf16.msrb.mxu1 %v3340_v60  ;;  %v7625_v40 = vpop.permute.xlu1 %3247  ;;  %v2920_v42 = vpop.permute.xlu0 %2919 }
 0x880   :  { %3354 = vmatpush.bf16.msrb.mxu1 %v3339_v19 }
 0x882   :  { %v3238_v19 = vpop.permute.xlu2 %3237 }
 0x883   :  { %3111 = vmatmul.bf16.gmra.mxu2 %v5712_v28 }
 0x884   :  { %3355 = vmatpush.bf16.msrb.mxu1 %v3338_v50  ;;  %v5717_v50 = vld [vmem:[%s7953_s8 + $0xa0] sm:$0xff] }
 0x888   :  { %3356 = vmatpush.bf16.msrb.mxu1 %v7552_v15 }
 0x88c   :  { %3357 = vmatpush.bf16.msrb.mxu1 %v7546_v24  ;;  %v5715_v24 = vld [vmem:[%s7953_s8 + $0x90] sm:$0xff] }
 0x890   :  { %3358 = vmatpush.bf16.msrb.mxu1 %v7537_v2 }
 0x893   :  { %3359 = vmatmul.bf16.vlgmr.msrb.gmra.mxu1 %v5713_v6 }
 0x896   :  { %v7588_v63 = vpop.f32.mrf.mxu2 }
 0x89e   :  { %v7590_v22 = vpop.f32.mrf.mxu2 }
 0x8a3   :  { %3364 = vmatmul.bf16.gmra.mxu1 %v5714_v25  ;;  %v2910_v25 = vpop.permute.xlu1 %2909 }
 0x8a6   :  { %v7595_v49 = vpop.f32.mrf.mxu2 }
 0x8ae   :  { %v7597_v15 = vpop.f32.mrf.mxu2 }
 0x8b3   :  { %3369 = vmatmul.bf16.gmra.mxu1 %v5715_v24 }
 0x8b6   :  { %v7602_v2 = vpop.f32.mrf.mxu2 }
 0x8be   :  { %v7604_v58 = vpop.f32.mrf.mxu2 }
 0x8bf   :  { %v3090_v24 = vadd.f32 %v7604_v58, %v2920_v42 }
 0x8c3   :  { %3374 = vmatmul.bf16.gmra.mxu1 %v5716_v34 }
 0x8c6   :  { %v3092_v35 = vpop.f32.mrf.mxu2 }
 0x8c7   :  { %v3093_v28 = vadd.f32 %v3092_v35, %v2925_v3 }
 0x8ce   :  { %v3094_v61 = vpop.f32.mrf.mxu2 }
 0x8cf   :  { %v3095_v52 = vadd.f32 %v3094_v61, %v2930_v48  ;;  %v3122_v61 = vmax.f32 %v3090_v24, 0.0 }
 0x8d1   :  { %v3124_v34 = vmax.f32 %v3095_v52, 0.0 }
 0x8d3   :  { %3379 = vmatmul.bf16.gmra.mxu1 %v5717_v50 }
 0x8d6   :  { %v3097_v44 = vpop.f32.mrf.mxu2 }
 0x8d7   :  { %v3098_v39 = vadd.f32 %v3097_v44, %v2935_v17  ;;  %v3123_v44 = vmax.f32 %v3093_v28, 0.0 }
 0x8d9   :  { %v3125_v6 = vmax.f32 %v3098_v39, 0.0 }
 0x8de   :  { %v3099_v31 = vpop.f32.mrf.mxu2 }
 0x8df   :  { %v3100_v4 = vadd.f32 %v3099_v31, %v2940_v41 }
 0x8e1   :  { %v3126_v60 = vmax.f32 %v3100_v4, 0.0 }
 0x8e3   :  { %3384 = vmatmul.bf16.gmra.mxu1 %v5718_v46  ;;  %v3137_v50 = vpack.c.bf16 %v3126_v60, %v3125_v6  ;;  %v3088_v46 = vadd.f32 %v7602_v2, %v2915_v14 }
 0x8e6   :  { %v3102_v0 = vpop.f32.mrf.mxu2 }
 0x8e7   :  { %v3103_v36 = vadd.f32 %v3102_v0, %v2945_v53  ;;  %v3085_v0 = vadd.f32 %v7597_v15, %v2910_v25 }
 0x8e9   :  { %v3127_v56 = vmax.f32 %v3103_v36, 0.0  ;;  %v3120_v53 = vmax.f32 %v3085_v0, 0.0 }
 0x8ee   :  { %v3104_v18 = vpop.f32.mrf.mxu2 }
 0x8ef   :  { %v3105_v51 = vadd.f32 %v3104_v18, %v2950_v11  ;;  %v3121_v18 = vmax.f32 %v3088_v46, 0.0 }
 0x8f1   :  { %v3128_v62 = vmax.f32 %v3105_v51, 0.0 }
 0x8f3   :  { %3389 = vmatmul.bf16.gmra.mxu1 %v5719_v12  ;;  %v3138_v21 = vpack.c.bf16 %v3128_v62, %v3127_v56  ;;  %v2900_v12 = vpop.permute.xlu2 %2899 }
 0x8f4   :  { %v3080_v58 = vadd.f32 %v7590_v22, %v2900_v12  ;;  %v5344_v22 = vld [vmem:[%s7954_s6 + $0x8] sm:$0xf] }
 0x8f6   :  { %v3107_v32 = vpop.f32.mrf.mxu2  ;;  %v3118_v15 = vmax.f32 %v3080_v58, 0.0 }
 0x8f7   :  { %v3108_v13 = vadd.f32 %v3107_v32, %v2955_v30  ;;  %v2895_v32 = vpop.permute.xlu1 %2894 }
 0x8f8   :  { %v3078_v2 = vadd.f32 %v7588_v63, %v2895_v32 }
 0x8f9   :  { %v3129_v29 = vmax.f32 %v3108_v13, 0.0 }
 0x8fe   :  { %v3109_v16 = vpop.f32.mrf.mxu2 }
 0x8ff   :  { %v3110_v47 = vadd.f32 %v3109_v16, %v2960_v27  ;;  %v3135_v27 = vpack.c.bf16 %v3122_v61, %v3121_v18  ;;  %v3233_v51 = vpop.permute.xlu1 %3232 }
 0x901   :  { %v3130_v8 = vmax.f32 %v3110_v47, 0.0 }
 0x903   :  { %3394 = vmatmul.bf16.gmra.mxu1 %v5720_v20  ;;  %v3139_v1 = vpack.c.bf16 %v3130_v8, %v3129_v29  ;;  %v3117_v20 = vmax.f32 %v3078_v2, 0.0 }
 0x905   :  { %v3133_v17 = vpack.c.bf16 %v3118_v15, %v3117_v20 }
 0x906   :  { %v3112_v7 = vpop.f32.mrf.mxu2 }
 0x907   :  { %v3113_v45 = vadd.f32 %v3112_v7, %v2965_v38  ;;  %v2905_v38 = vpop.permute.xlu0 %2904 }
 0x908   :  { %v3083_v35 = vadd.f32 %v7595_v49, %v2905_v38 }
 0x909   :  { %v3131_v59 = vmax.f32 %v3113_v45, 0.0 }
 0x90a   :  { %v3119_v41 = vmax.f32 %v3083_v35, 0.0 }
 0x90c   :  { %v3134_v16 = vpack.c.bf16 %v3120_v53, %v3119_v41 }
 0x90e   :  { %v3114_v5 = vpop.f32.mrf.mxu2 }
 0x90f   :  { %v3115_v9 = vadd.f32 %v3114_v5, %v2970_v26  ;;  %v3136_v26 = vpack.c.bf16 %v3124_v34, %v3123_v44 }
 0x910   :  { %v7621_v23 = vpop.f32.mrf.mxu1 }
 0x911   :  { %v3132_v54 = vmax.f32 %v3115_v9, 0.0  ;;  %v3243_v9 = vpop.permute.xlu0 %3242 }
 0x913   :  { %v3140_v43 = vpack.c.bf16 %v3132_v54, %v3131_v59  ;;  %v3218_v54 = vpop.permute.xlu2 %3217 }
 0x915   :  { %3433 = vmatpush.bf16.msrb.mxu3 %v3140_v43 }
 0x918   :  { %v7627_v33 = vpop.f32.mrf.mxu1 }
 0x919   :  { %3434 = vmatpush.bf16.msrb.mxu3 %v3139_v1  ;;  %v3228_v13 = vpop.permute.xlu0 %3227 }
 0x91b   :  { %v3213_v56 = vpop.permute.xlu2 %3212 }
 0x91d   :  { %3435 = vmatpush.bf16.msrb.mxu3 %v3138_v21  ;;  %v3208_v21 = vpop.permute.xlu1 %3207 }
 0x920   :  { %v7630_v31 = vpop.f32.mrf.mxu1 }
 0x921   :  { %3436 = vmatpush.bf16.msrb.mxu3 %v3137_v50  ;;  %v3223_v43 = vpop.permute.xlu0 %3222 }
 0x923   :  { %v3188_v0 = vpop.permute.xlu2 %3187 }
 0x924   :  { %v3366_v15 = vadd.f32 %v7630_v31, %v3188_v0  ;;  %v5346_v31 = vld [vmem:[%s7955_s10 + $0x8] sm:$0xf] }
 0x925   :  { %3437 = vmatpush.bf16.msrb.mxu3 %v3136_v26  ;;  %v3203_v38 = vpop.permute.xlu1 %3202 }
 0x928   :  { %v7636_v30 = vpop.f32.mrf.mxu1 }
 0x929   :  { %3438 = vmatpush.bf16.msrb.mxu3 %v3135_v27 }
 0x92b   :  { %v3183_v20 = vpop.permute.xlu2 %3182 }
 0x92d   :  { %3439 = vmatpush.bf16.msrb.mxu3 %v3134_v16 }
 0x930   :  { %v3370_v49 = vpop.f32.mrf.mxu1 }
 0x931   :  { %3440 = vmatpush.bf16.msrb.mxu3 %v3133_v17  ;;  %v3363_v17 = vadd.f32 %v7627_v33, %v3183_v20  ;;  %v5729_v20 = vld [vmem:[%s7949_s2 + $0x1c0] sm:$0xff] }
 0x934   :  { %3441 = vmatmul.bf16.vlgmr.msrb.gmra.mxu3 %v5344_v22 }
 0x938   :  { %v3372_v11 = vpop.f32.mrf.mxu1 }
 0x939   :  { %v3373_v35 = vadd.f32 %v3372_v11, %v3203_v38  ;;  %v3178_v11 = vpop.permute.xlu1 %3177  ;;  %v5727_v38 = vld [vmem:[%s7949_s2 + $0x1b0] sm:$0xff] }
 0x93b   :  { %v3405_v2 = vmax.f32 %v3373_v35, 0.0 }
 0x940   :  { %v3375_v7 = vpop.f32.mrf.mxu1 }
 0x941   :  { %v3376_v61 = vadd.f32 %v3375_v7, %v3208_v21 }
 0x943   :  { %v3406_v53 = vmax.f32 %v3376_v61, 0.0 }
 0x948   :  { %v3377_v14 = vpop.f32.mrf.mxu1 }
 0x949   :  { %v3378_v44 = vadd.f32 %v3377_v14, %v3213_v56  ;;  %v3361_v14 = vadd.f32 %v7621_v23, %v3178_v11  ;;  %v3450_v23 = vpop.permute.xlu1 %3449  ;;  %v3460_v56 = vpop.permute.xlu2 %3459 }
 0x94b   :  { %v3407_v18 = vmax.f32 %v3378_v44, 0.0 }
 0x94d   :  { %v3419_v41 = vpack.c.bf16 %v3407_v18, %v3406_v53 }
 0x950   :  { %v3380_v48 = vpop.f32.mrf.mxu1 }
 0x951   :  { %v3381_v50 = vadd.f32 %v3380_v48, %v3218_v54  ;;  %v3401_v48 = vmax.f32 %v3363_v17, 0.0  ;;  %v7684_v44 = vpop.permute.xlu1 %3637  ;;  %v7702_v18 = vpop.permute.xlu2 %3642 }
 0x953   :  { %v3408_v26 = vmax.f32 %v3381_v50, 0.0  ;;  %v5724_v50 = vld [vmem:[%s7949_s2 + $0x198] sm:$0xff] }
 0x958   :  { %v3382_v45 = vpop.f32.mrf.mxu1 }
 0x959   :  { %v3383_v25 = vadd.f32 %v3382_v45, %v3223_v43  ;;  %v7691_v0 = vpop.permute.xlu1 %3632  ;;  %v7706_v53 = vpop.permute.xlu2 %3617 }
 0x960   :  { %v3385_v63 = vpop.f32.mrf.mxu1 }
 0x961   :  { %v3386_v28 = vadd.f32 %v3385_v63, %v3228_v13  ;;  %v3400_v63 = vmax.f32 %v3361_v14, 0.0 }
 0x963   :  { %v3410_v46 = vmax.f32 %v3386_v28, 0.0 }
 0x968   :  { %v3387_v5 = vpop.f32.mrf.mxu1 }
 0x969   :  { %v3388_v42 = vadd.f32 %v3387_v5, %v3233_v51 }
 0x96b   :  { %v3411_v24 = vmax.f32 %v3388_v42, 0.0 }
 0x970   :  { %v3390_v47 = vpop.f32.mrf.mxu1 }
 0x971   :  { %v3391_v62 = vadd.f32 %v3390_v47, %v3238_v19  ;;  %v3421_v19 = vpack.c.bf16 %v3411_v24, %v3410_v46  ;;  %v5725_v46 = vld [vmem:[%s7949_s2 + $0x1a0] sm:$0xff] }
 0x973   :  { %v3412_v6 = vmax.f32 %v3391_v62, 0.0 }
 0x978   :  { %v3392_v3 = vpop.f32.mrf.mxu1 }
 0x979   :  { %v3393_v29 = vadd.f32 %v3392_v3, %v3243_v9 }
 0x97b   :  { %v3413_v52 = vmax.f32 %v3393_v29, 0.0 }
 0x97d   :  { %v3422_v34 = vpack.c.bf16 %v3413_v52, %v3412_v6 }
 0x980   :  { %v3395_v59 = vpop.f32.mrf.mxu1 }
 0x981   :  { %v3396_v8 = vadd.f32 %v3395_v59, %v7625_v40  ;;  %v3198_v40 = vpop.permute.xlu0 %3197 }
 0x982   :  { %v3371_v58 = vadd.f32 %v3370_v49, %v3198_v40  ;;  %v3402_v49 = vmax.f32 %v3366_v15, 0.0  ;;  %v5723_v40 = vld [vmem:[%s7949_s2 + $0x190] sm:$0xff] }
 0x983   :  { %v3414_v1 = vmax.f32 %v3396_v8, 0.0 }
 0x984   :  { %v3404_v16 = vmax.f32 %v3371_v58, 0.0 }
 0x986   :  { %v3418_v7 = vpack.c.bf16 %v3405_v2, %v3404_v16 }
 0x988   :  { %v3397_v36 = vpop.f32.mrf.mxu1 }
 0x989   :  { %v3398_v4 = vadd.f32 %v3397_v36, %v7623_v55  ;;  %v3409_v55 = vmax.f32 %v3383_v25, 0.0  ;;  %v3193_v27 = vpop.permute.xlu0 %3192  ;;  %v3476_v36 = vmul.f32 %v3450_v23, %v7411_v57 }
 0x98a   :  { %v3368_v32 = vadd.f32 %v7636_v30, %v3193_v27  ;;  %v3416_v30 = vpack.c.bf16 %v3401_v48, %v3400_v63  ;;  %v5728_v27 = vld [vmem:[%s7949_s2 + $0x1b8] sm:$0xff] }
 0x98b   :  { %v3415_v39 = vmax.f32 %v3398_v4, 0.0  ;;  %v3420_v12 = vpack.c.bf16 %v3409_v55, %v3408_v26  ;;  %v7696_v26 = vpop.permute.xlu1 %3607 }
 0x98c   :  { %v3403_v22 = vmax.f32 %v3368_v32, 0.0 }
 0x98d   :  { %v3423_v60 = vpack.c.bf16 %v3415_v39, %v3414_v1 }
 0x98e   :  { %v3417_v45 = vpack.c.bf16 %v3403_v22, %v3402_v49 }
 0x98f   :  { %3462 = vmatpush.bf16.msra.mxu3 %v3423_v60 }
 0x991   :  { %v3431_v5 = vpop.permute.xlu0 %3430 }
 0x993   :  { %3463 = vmatpush.bf16.msra.mxu3 %v3422_v34 }
 0x997   :  { %3464 = vmatpush.bf16.msra.mxu3 %v3421_v19  ;;  %v5726_v19 = vld [vmem:[%s7949_s2 + $0x1a8] sm:$0xff] }
 0x999   :  { %v3495_v6 = vpop.permute.xlu0 %3494 }
 0x99b   :  { %3465 = vmatpush.bf16.msra.mxu3 %v3420_v12  ;;  %v3603_v12 = vpop.permute.xlu1 %3602 }
 0x99f   :  { %3466 = vmatpush.bf16.msra.mxu3 %v3419_v41  ;;  %v7714_v41 = vpop.permute.xlu2 %3612 }
 0x9a1   :  { %v7686_v55 = vpop.permute.xlu0 %3627 }
 0x9a3   :  { %3467 = vmatpush.bf16.msra.mxu3 %v3418_v7  ;;  %v3588_v32 = vpop.permute.xlu1 %3587 }
 0x9a7   :  { %3468 = vmatpush.bf16.msra.mxu3 %v3417_v45  ;;  %v7721_v17 = vpop.permute.xlu2 %3717 }
 0x9a9   :  { %v7694_v61 = vpop.permute.xlu0 %3622 }
 0x9ab   :  { %3469 = vmatpush.bf16.msra.mxu3 %v3416_v30  ;;  %v7716_v15 = vpop.permute.xlu1 %3712 }
 0x9ae   :  { %3470 = vmatmul.bf16.vlgmr.msra.gmra.mxu3 %v5346_v31  ;;  %v5730_v31 = vld [vmem:[%s7949_s2 + $0x1c8] sm:$0xff] }
 0x9af   :  { %v3593_v49 = vpop.permute.xlu2 %3592 }
 0x9b1   :  { %v3598_v35 = vpop.permute.xlu0 %3597 }
 0x9b3   :  { %v7724_v22 = vpop.permute.xlu1 %3697 }
 0x9b7   :  { %v3442_v33 = vpop.f32.mrf.mxu3 }
 0x9b8   :  { %v3443_v47 = vadd.f32 %v3442_v33, %v3431_v5 }
 0x9b9   :  { %v7704_v58 = vpop.permute.xlu0 %3722 }
 0x9ba   :  { %5767 = vtanh.f32 %v3443_v47 }
 0x9bb   :  { %v3573_v45 = vpop.permute.xlu1 %3572 }
 0x9bf   :  { %v3444_v9 = vpop.f32.mrf.mxu3 }
 0x9c0   :  { %v5768_v3 = vpop.eup %5767 }
 0x9c1   :  { %v3452_v13 = vmul.f32 %v5768_v3, %v3450_v23  ;;  %v7712_v2 = vpop.permute.xlu0 %3707 }
 0x9c3   :  { %v3477_v59 = vmul.f32 1.442695, %v3452_v13  ;;  %v3482_v54 = vrot.slane %v3452_v13, 4 }
 0x9c5   :  { %5769 = vpow2.f32 %v3477_v59  ;;  %v3483_v51 = vadd.f32 %v3482_v54, %v3452_v13  ;;  %v3578_v59 = vpop.permute.xlu2 %3577 }
 0x9c7   :  { %v3484_v8 = vrot.slane %v3483_v51, 2 }
 0x9c9   :  { %v3485_v43 = vadd.f32 %v3484_v8, %v3483_v51  ;;  %v3583_v16 = vpop.permute.xlu0 %3582 }
 0x9cb   :  { %v5770_v29 = vpop.eup %5769  ;;  %v3486_v4 = vrot.slane %v3485_v43, 1 }
 0x9cc   :  { %v3479_v62 = vmul.f32 %v5770_v29, %v3476_v36  ;;  %v5731_v36 = vld [vmem:[%s7949_s2 + $0x1d0] sm:$0xff] }
 0x9cd   :  { %v3487_v1 = vadd.f32 %v3486_v4, %v3485_v43 }
 0x9ce   :  { %v3480_v21 = vadd.f32 %v3479_v62, %v7414_v10  ;;  %v5722_v10 = vld [vmem:[%s7949_s2 + $0x188] sm:$0xff] }
 0x9cf   :  { %v7653_v39 = vadd.f32 %v3487_v1, %v7408_v37  ;;  %v5721_v37 = vld [vmem:[%s7949_s2 + $0x180] sm:$0xff] }
 0x9d1   :  { %v3568_v11 = vpop.permute.xlu0 %3567 }
 0xa31   :  { %v3471_v42 = vpop.f32.mrf.mxu3 }
 0xa32   :  { %v3472_v52 = vadd.f32 %v3471_v42, %v3460_v56 }
 0xa34   :  { %v3475_v60 = vmul.f32 %v3472_v52, %v3450_v23 }
 0xa36   :  { %v7656_v28 = vadd.f32 %v3480_v21, %v3475_v60 }
 0xa38   :  { %v7659_v25 = vmul.f32 %v3495_v6, %v7656_v28 }
 0xa39   :  { %v3473_v57 = vpop.f32.mrf.mxu3 }
 0xa3a   :  { %v3498_v24 = vpack.c.bf16 %v7659_v25, %v7659_v25 }
 0xa3c   :  { %v3854_v34 = vsel %vm407_vm0, %v3498_v24, 0  ;;  %v5732_v24 = vld [vmem:[%s7949_s2 + $0x1d8] sm:$0xff] }
 0xa3d   :  { %3863 = vmatpush.bf16.msrb.mxu3 %v3854_v34 }
 0xa40   :  { %5477 = vmatmul.msk.bf16.vlgmr.msrb.gmra.mxu3 %vm358_vm1, %v5721_v37 }
 0xa50   :  { %5478 = vmatmul.msk.bf16.gmra.mxu3 %vm358_vm1, %v5722_v10 }
 0xa60   :  { %5479 = vmatmul.msk.bf16.gmra.mxu3 %vm358_vm1, %v5723_v40 }
 0xa70   :  { %5480 = vmatmul.msk.bf16.gmra.mxu3 %vm358_vm1, %v5724_v50 }
 0xa80   :  { %5481 = vmatmul.msk.bf16.gmra.mxu3 %vm358_vm1, %v5725_v46 }
 0xa90   :  { %5482 = vmatmul.msk.bf16.gmra.mxu3 %vm358_vm1, %v5726_v19 }
 0xaa0   :  { %5483 = vmatmul.msk.bf16.gmra.mxu3 %vm358_vm1, %v5727_v38 }
 0xab0   :  { %5484 = vmatmul.msk.bf16.gmra.mxu3 %vm358_vm1, %v5728_v27 }
 0xac0   :  { %5485 = vmatmul.msk.bf16.gmra.mxu3 %vm358_vm1, %v5729_v20  ;;  %v5733_v20 = vld [vmem:[%s7949_s2 + $0x1e0] sm:$0xff] }
 0xac3   :  { %v3865_v7 = vpop.f32.mrf.mxu3 }
 0xac4   :  { %v3866_v14 = vadd.f32 %v3865_v7, %v3568_v11 }
 0xac6   :  { %v3945_v48 = vmax.f32 %v3866_v14, 0.0 }
 0xac8   :  { %v3977_v5 = vpack.c.bf16 %v3945_v48, %v3945_v48 }
 0xaca   :  { %v4187_v9 = vunpack.c.l.b16 %v3977_v5  ;;  %v5735_v5 = vld [vmem:[%s7949_s2 + $0x1f0] sm:$0xff] }
 0xacb   :  { %v3867_v63 = vpop.f32.mrf.mxu3 }
 0xacc   :  { %v3868_v30 = vadd.f32 %v3867_v63, %v3573_v45 }
 0xace   :  { %v3946_v33 = vmax.f32 %v3868_v30, 0.0 }
 0xad0   :  { %v3978_v47 = vpack.c.bf16 %v3946_v33, %v3946_v33  ;;  %5486 = vmatmul.msk.bf16.gmra.mxu3 %vm358_vm1, %v5730_v31  ;;  %v7758_v33 = vpop.permute.xlu2 %3702 }
 0xad2   :  { %v4188_v3 = vunpack.c.l.b16 %v3978_v47 }
 0xad3   :  { %v3870_v23 = vpop.f32.mrf.mxu3 }
 0xad4   :  { %v7730_v13 = vpack.c.b16 %v4188_v3, %v4187_v9  ;;  %v3871_v54 = vadd.f32 %v3870_v23, %v3578_v59  ;;  %v5736_v3 = vld [vmem:[%s7949_s2 + $0x1f8] sm:$0xff]  ;;  %v7766_v59 = vpop.permute.xlu1 %3677 }
 0xad6   :  { %v3947_v51 = vmax.f32 %v3871_v54, 0.0 }
 0xad8   :  { %v3979_v29 = vpack.c.bf16 %v3947_v51, %v3947_v51  ;;  %v7763_v23 = vpop.permute.xlu2 %3687 }
 0xada   :  { %v4189_v1 = vunpack.c.l.b16 %v3979_v29 }
 0xadb   :  { %v3872_v8 = vpop.f32.mrf.mxu3 }
 0xadc   :  { %v3873_v43 = vadd.f32 %v3872_v8, %v3583_v16 }
 0xade   :  { %v3948_v4 = vmax.f32 %v3873_v43, 0.0 }
 0xae0   :  { %v3980_v62 = vpack.c.bf16 %v3948_v4, %v3948_v4  ;;  %5487 = vmatmul.msk.bf16.gmra.mxu3 %vm358_vm1, %v5731_v36  ;;  %v7769_v8 = vpop.permute.xlu2 %3682  ;;  %v7773_v4 = vpop.permute.xlu1 %3672 }
 0xae2   :  { %v4190_v56 = vunpack.c.l.b16 %v3980_v62 }
 0xae3   :  { %v3875_v42 = vpop.f32.mrf.mxu3 }
 0xae4   :  { %v7736_v52 = vpack.c.b16 %v4190_v56, %v4189_v1  ;;  %v3876_v60 = vadd.f32 %v3875_v42, %v3588_v32 }
 0xae6   :  { %v3949_v21 = vmax.f32 %v3876_v60, 0.0 }
 0xae8   :  { %v3981_v34 = vpack.c.bf16 %v3949_v21, %v3949_v21 }
 0xaea   :  { %v4191_v40 = vunpack.c.l.b16 %v3981_v34 }
 0xaeb   :  { %v3877_v6 = vpop.f32.mrf.mxu3 }
 0xaec   :  { %v3878_v57 = vadd.f32 %v3877_v6, %v3593_v49 }
 0xaee   :  { %v3950_v37 = vmax.f32 %v3878_v57, 0.0 }
 0xaf0   :  { %v3982_v10 = vpack.c.bf16 %v3950_v37, %v3950_v37  ;;  %5488 = vmatmul.msk.bf16.gmra.mxu3 %vm358_vm1, %v5732_v24 }
 0xaf2   :  { %v4192_v50 = vunpack.c.l.b16 %v3982_v10 }
 0xaf3   :  { %v3880_v46 = vpop.f32.mrf.mxu3 }
 0xaf4   :  { %v7742_v19 = vpack.c.b16 %v4192_v50, %v4191_v40  ;;  %v3881_v38 = vadd.f32 %v3880_v46, %v3598_v35  ;;  %v5734_v35 = vld [vmem:[%s7949_s2 + $0x1e8] sm:$0xff] }
 0xaf6   :  { %v3951_v27 = vmax.f32 %v3881_v38, 0.0 }
 0xaf8   :  { %v3983_v7 = vpack.c.bf16 %v3951_v27, %v3951_v27 }
 0xafa   :  { %v4193_v49 = vunpack.c.l.b16 %v3983_v7 }
 0xafb   :  { %v3882_v32 = vpop.f32.mrf.mxu3 }
 0xafc   :  { %v3883_v16 = vadd.f32 %v3882_v32, %v3603_v12  ;;  %v3648_v32 = vpop.permute.xlu1 %3647 }
 0xafe   :  { %v3952_v11 = vmax.f32 %v3883_v16, 0.0 }
 0xb00   :  { %v3984_v14 = vpack.c.bf16 %v3952_v11, %v3952_v11  ;;  %5489 = vmatmul.msk.bf16.gmra.mxu3 %vm358_vm1, %v5733_v20  ;;  %v7780_v11 = vpop.permute.xlu0 %3692 }
 0xb02   :  { %v4194_v48 = vunpack.c.l.b16 %v3984_v14 }
 0xb03   :  { %v3885_v45 = vpop.f32.mrf.mxu3 }
 0xb04   :  { %v7748_v63 = vpack.c.b16 %v4194_v48, %v4193_v49  ;;  %v3886_v37 = vadd.f32 %v3885_v45, %v7696_v26 }
 0xb06   :  { %v3953_v16 = vmax.f32 %v3886_v37, 0.0 }
 0xb08   :  { %v3985_v48 = vpack.c.bf16 %v3953_v16, %v3953_v16 }
 0xb0b   :  { %v3887_v30 = vpop.f32.mrf.mxu3 }
 0xb0c   :  { %v3888_v57 = vadd.f32 %v3887_v30, %v7714_v41 }
 0xb0e   :  { %v3954_v38 = vmax.f32 %v3888_v57, 0.0 }
 0xb10   :  { %5490 = vmatmul.msk.bf16.gmra.mxu3 %vm358_vm1, %v5734_v35  ;;  %v3986_v14 = vpack.c.bf16 %v3954_v38, %v3954_v38 }
 0xb13   :  { %v3890_v12 = vpop.f32.mrf.mxu3 }
 0xb14   :  { %v3891_v60 = vadd.f32 %v3890_v12, %v7706_v53 }
 0xb16   :  { %v3955_v10 = vmax.f32 %v3891_v60, 0.0 }
 0xb18   :  { %v3987_v20 = vpack.c.bf16 %v3955_v10, %v3955_v10 }
 0xb1a   :  { %v4197_v45 = vunpack.c.l.b16 %v3987_v20 }
 0xb1b   :  { %v3892_v31 = vpop.f32.mrf.mxu3 }
 0xb1c   :  { %v3893_v1 = vadd.f32 %v3892_v31, %v7694_v61  ;;  %v4196_v31 = vunpack.c.l.b16 %v3986_v14 }
 0xb1e   :  { %v3956_v24 = vmax.f32 %v3893_v1, 0.0 }
 0xb20   :  { %5491 = vmatmul.msk.bf16.gmra.mxu3 %vm358_vm1, %v5735_v5 }
 0xb23   :  { %v3895_v47 = vpop.f32.mrf.mxu3 }
 0xb24   :  { %v3896_v36 = vadd.f32 %v3895_v47, %v7686_v55  ;;  %v3658_v55 = vpop.permute.xlu2 %3657 }
 0xb26   :  { %v3957_v21 = vmax.f32 %v3896_v36, 0.0  ;;  %v3668_v36 = vpop.permute.xlu0 %3667 }
 0xb28   :  { %v3989_v40 = vpack.c.bf16 %v3957_v21, %v3957_v21 }
 0xb2a   :  { %v4199_v7 = vunpack.c.l.b16 %v3989_v40 }
 0xb2b   :  { %v3897_v9 = vpop.f32.mrf.mxu3 }
 0xb2c   :  { %v3898_v43 = vadd.f32 %v3897_v9, %v7691_v0  ;;  %v3653_v35 = vpop.permute.xlu2 %3652  ;;  %v4195_v9 = vunpack.c.l.b16 %v3985_v48 }
 0xb2e   :  { %v3958_v56 = vmax.f32 %v3898_v43, 0.0  ;;  %v4207_v43 = vpack.c.b16 %v4196_v31, %v4195_v9  ;;  %v3663_v21 = vpop.permute.xlu0 %3662  ;;  %v7812_v9 = vpop.permute.xlu1 %4120 }
 0xb30   :  { %5492 = vmatmul.msk.bf16.gmra.mxu3 %vm358_vm1, %v5736_v3  ;;  %v3990_v0 = vpack.c.bf16 %v3958_v56, %v3958_v56 }
 0xb32   :  { %v4200_v27 = vunpack.c.l.b16 %v3990_v0 }
 0xb33   :  { %v3900_v54 = vpop.f32.mrf.mxu3 }
 0xb34   :  { %v3901_v51 = vadd.f32 %v3900_v54, %v7684_v44  ;;  %v4209_v26 = vpack.c.b16 %v4200_v27, %v4199_v7 }
 0xb36   :  { %v3959_v29 = vmax.f32 %v3901_v51, 0.0 }
 0xb38   :  { %v3991_v6 = vpack.c.bf16 %v3959_v29, %v3959_v29 }
 0xb3a   :  { %v4201_v50 = vunpack.c.l.b16 %v3991_v6 }
 0xb3b   :  { %v3902_v62 = vpop.f32.mrf.mxu3 }
 0xb3c   :  { %v3903_v42 = vadd.f32 %v3902_v62, %v7702_v18  ;;  %v3988_v18 = vpack.c.bf16 %v3956_v24, %v3956_v24 }
 0xb3e   :  { %v3960_v44 = vmax.f32 %v3903_v42, 0.0  ;;  %v4198_v49 = vunpack.c.l.b16 %v3988_v18  ;;  %v5738_v18 = vld [vmem:[%s7952_s4 + $0xc8] sm:$0xff] }
 0xb40   :  { %v3992_v34 = vpack.c.bf16 %v3960_v44, %v3960_v44  ;;  %v4208_v47 = vpack.c.b16 %v4198_v49, %v4197_v45 }
 0xb42   :  { %v4202_v61 = vunpack.c.l.b16 %v3992_v34  ;;  %v5737_v34 = vld [vmem:[%s7952_s4 + $0xc0] sm:$0xff] }
 0xb43   :  { %v3905_v46 = vpop.f32.mrf.mxu3 }
 0xb44   :  { %v4210_v53 = vpack.c.b16 %v4202_v61, %v4201_v50  ;;  %v3906_v41 = vadd.f32 %v3905_v46, %v3648_v32 }
 0xb46   :  { %4219 = vmatpush.bf16.msra.mxu2 %v4210_v53  ;;  %v3961_v30 = vmax.f32 %v3906_v41, 0.0 }
 0xb48   :  { %v3993_v3 = vpack.c.bf16 %v3961_v30, %v3961_v30 }
 0xb4a   :  { %4220 = vmatpush.bf16.msra.mxu2 %v4209_v26  ;;  %v4470_v29 = vunpack.c.l.b16 %v3993_v3  ;;  %v5739_v26 = vld [vmem:[%s7952_s4 + $0xd0] sm:$0xff]  ;;  %v7814_v3 = vpop.permute.xlu2 %4105 }
 0xb4b   :  { %v3907_v12 = vpop.f32.mrf.mxu3 }
 0xb4c   :  { %v3908_v5 = vadd.f32 %v3907_v12, %v3653_v35 }
 0xb4e   :  { %v3962_v54 = vmax.f32 %v3908_v5, 0.0  ;;  %4221 = vmatpush.bf16.msra.mxu2 %v4208_v47  ;;  %v5741_v5 = vld [vmem:[%s7952_s4 + $0xe0] sm:$0xff] }
 0xb50   :  { %v3994_v51 = vpack.c.bf16 %v3962_v54, %v3962_v54 }
 0xb52   :  { %v4471_v62 = vunpack.c.l.b16 %v3994_v51  ;;  %4222 = vmatpush.bf16.msra.mxu2 %v4207_v43  ;;  %v5742_v51 = vld [vmem:[%s7952_s4 + $0xe8] sm:$0xff]  ;;  %v7819_v43 = vpop.permute.xlu1 %4095 }
 0xb53   :  { %v3910_v1 = vpop.f32.mrf.mxu3 }
 0xb54   :  { %v7782_v56 = vpack.c.b16 %v4471_v62, %v4470_v29  ;;  %v3911_v42 = vadd.f32 %v3910_v1, %v3658_v55  ;;  %v7821_v29 = vpop.permute.xlu2 %4100 }
 0xb56   :  { %4223 = vmatpush.bf16.msra.mxu2 %v7748_v63  ;;  %v3963_v60 = vmax.f32 %v3911_v42, 0.0 }
 0xb58   :  { %v3995_v57 = vpack.c.bf16 %v3963_v60, %v3963_v60 }
 0xb5a   :  { %4224 = vmatpush.bf16.msra.mxu2 %v7742_v19  ;;  %v4472_v37 = vunpack.c.l.b16 %v3995_v57 }
 0xb5b   :  { %v3912_v6 = vpop.f32.mrf.mxu3 }
 0xb5c   :  { %v3913_v44 = vadd.f32 %v3912_v6, %v3663_v21  ;;  %v7826_v6 = vpop.permute.xlu1 %4090 }
 0xb5e   :  { %v3964_v24 = vmax.f32 %v3913_v44, 0.0  ;;  %4225 = vmatpush.bf16.msra.mxu2 %v7736_v52 }
 0xb60   :  { %v3996_v0 = vpack.c.bf16 %v3964_v24, %v3964_v24 }
 0xb62   :  { %v4473_v10 = vunpack.c.l.b16 %v3996_v0  ;;  %4226 = vmatpush.bf16.msra.mxu2 %v7730_v13  ;;  %v7830_v0 = vpop.permute.xlu2 %4398 }
 0xb63   :  { %v3915_v63 = vpop.f32.mrf.mxu3 }
 0xb64   :  { %v7791_v55 = vpack.c.b16 %v4473_v10, %v4472_v37  ;;  %v3916_v19 = vadd.f32 %v3915_v63, %v3668_v36 }
 0xb65   :  { %4227 = vmatmul.bf16.vlgmr.msra.gmra.mxu2 %v5737_v34 }
 0xb66   :  { %v3965_v40 = vmax.f32 %v3916_v19, 0.0 }
 0xb68   :  { %v3997_v46 = vpack.c.bf16 %v3965_v40, %v3965_v40 }
 0xb6a   :  { %v4474_v27 = vunpack.c.l.b16 %v3997_v46 }
 0xb6b   :  { %v3917_v50 = vpop.f32.mrf.mxu3 }
 0xb6c   :  { %v3918_v61 = vadd.f32 %v3917_v50, %v7773_v4  ;;  %v7838_v50 = vpop.permute.xlu0 %4115 }
 0xb6e   :  { %v3966_v52 = vmax.f32 %v3918_v61, 0.0 }
 0xb70   :  { %v3998_v38 = vpack.c.bf16 %v3966_v52, %v3966_v52 }
 0xb72   :  { %v4475_v53 = vunpack.c.l.b16 %v3998_v38 }
 0xb73   :  { %v3920_v32 = vpop.f32.mrf.mxu3 }
 0xb74   :  { %v7797_v13 = vpack.c.b16 %v4475_v53, %v4474_v27  ;;  %v3921_v16 = vadd.f32 %v3920_v32, %v7766_v59  ;;  %v5740_v59 = vld [vmem:[%s7952_s4 + $0xd8] sm:$0xff] }
 0xb75   :  { %4232 = vmatmul.bf16.gmra.mxu2 %v5738_v18 }
 0xb76   :  { %v3967_v20 = vmax.f32 %v3921_v16, 0.0  ;;  %v7842_v16 = vpop.permute.xlu2 %4080 }
 0xb78   :  { %v3999_v4 = vpack.c.bf16 %v3967_v20, %v3967_v20 }
 0xb7a   :  { %v4476_v48 = vunpack.c.l.b16 %v3999_v4 }
 0xb7b   :  { %v3922_v7 = vpop.f32.mrf.mxu3 }
 0xb7c   :  { %v3923_v41 = vadd.f32 %v3922_v7, %v7769_v8 }
 0xb7e   :  { %v3968_v14 = vmax.f32 %v3923_v41, 0.0 }
 0xb80   :  { %v4000_v49 = vpack.c.bf16 %v3968_v14, %v3968_v14 }
 0xb82   :  { %v4477_v45 = vunpack.c.l.b16 %v4000_v49  ;;  %v7844_v49 = vpop.permute.xlu0 %4110 }
 0xb83   :  { %v3925_v30 = vpop.f32.mrf.mxu3 }
 0xb84   :  { %v7804_v35 = vpack.c.b16 %v4477_v45, %v4476_v48  ;;  %v3926_v40 = vadd.f32 %v3925_v30, %v7763_v23 }
 0xb85   :  { %4237 = vmatmul.bf16.gmra.mxu2 %v5739_v26 }
 0xb86   :  { %v3969_v53 = vmax.f32 %v3926_v40, 0.0 }
 0xb88   :  { %v4001_v4 = vpack.c.bf16 %v3969_v53, %v3969_v53 }
 0xb8a   :  { %v4478_v45 = vunpack.c.l.b16 %v4001_v4 }
 0xb8b   :  { %v3927_v12 = vpop.f32.mrf.mxu3 }
 0xb93   :  { %v3930_v31 = vpop.f32.mrf.mxu3 }
 0xb94   :  { %v3931_v34 = vadd.f32 %v3930_v31, %v7724_v22  ;;  %v4066_v31 = vpop.permute.xlu2 %4065 }
 0xb95   :  { %4242 = vmatmul.bf16.gmra.mxu2 %v5740_v59  ;;  %v5744_v59 = vld [vmem:[%s7952_s4 + $0xf8] sm:$0xff] }
 0xb9b   :  { %v3932_v8 = vpop.f32.mrf.mxu3 }
 0xb9c   :  { %v3933_v44 = vadd.f32 %v3932_v8, %v7758_v33  ;;  %v5743_v33 = vld [vmem:[%s7952_s4 + $0xf0] sm:$0xff]  ;;  %v7851_v8 = vpop.permute.xlu0 %4085 }
 0xb9e   :  { %v3972_v63 = vmax.f32 %v3933_v44, 0.0  ;;  %v5746_v44 = vld [vmem:[%s7953_s8 + $0xc8] sm:$0xff] }
 0xba0   :  { %v4004_v38 = vpack.c.bf16 %v3972_v63, %v3972_v63 }
 0xba2   :  { %v4481_v7 = vunpack.c.l.b16 %v4004_v38 }
 0xba3   :  { %v3935_v47 = vpop.f32.mrf.mxu3 }
 0xba4   :  { %v3936_v42 = vadd.f32 %v3935_v47, %v7712_v2  ;;  %v7857_v47 = vpop.permute.xlu2 %4383 }
 0xba5   :  { %4247 = vmatmul.bf16.gmra.mxu2 %v5741_v5 }
 0xba6   :  { %v3973_v37 = vmax.f32 %v3936_v42, 0.0 }
 0xba8   :  { %v4005_v61 = vpack.c.bf16 %v3973_v37, %v3973_v37 }
 0xbaa   :  { %v4482_v23 = vunpack.c.l.b16 %v4005_v61 }
 0xbab   :  { %v3937_v54 = vpop.f32.mrf.mxu3 }
 0xbac   :  { %v3938_v1 = vadd.f32 %v3937_v54, %v7716_v15  ;;  %v3928_v15 = vadd.f32 %v3927_v12, %v7780_v11  ;;  %v7840_v11 = vpop.permute.xlu1 %4075  ;;  %v7860_v54 = vpop.permute.xlu0 %4403 }
 0xbae   :  { %v3974_v57 = vmax.f32 %v3938_v1, 0.0  ;;  %v3970_v52 = vmax.f32 %v3928_v15, 0.0 }
 0xbb0   :  { %v4006_v2 = vpack.c.bf16 %v3974_v57, %v3974_v57  ;;  %v4002_v20 = vpack.c.bf16 %v3970_v52, %v3970_v52  ;;  %v5748_v52 = vld [vmem:[%s7953_s8 + $0xd8] sm:$0xff] }
 0xbb2   :  { %v4483_v18 = vunpack.c.l.b16 %v4006_v2  ;;  %v4479_v26 = vunpack.c.l.b16 %v4002_v20  ;;  %v5747_v2 = vld [vmem:[%s7953_s8 + $0xd0] sm:$0xff] }
 0xbb3   :  { %v3940_v36 = vpop.f32.mrf.mxu3 }
 0xbb4   :  { %v3941_v62 = vadd.f32 %v3940_v36, %v7721_v17  ;;  %v4492_v41 = vpack.c.b16 %v4483_v18, %v4482_v23  ;;  %v7846_v30 = vpop.permute.xlu1 %4393  ;;  %v4490_v12 = vpack.c.b16 %v4479_v26, %v4478_v45  ;;  %v7868_v1 = vpop.permute.xlu0 %4388  ;;  %v5750_v45 = vld [vmem:[%s7953_s8 + $0xe8] sm:$0xff] }
 0xbb5   :  { %4252 = vmatmul.bf16.gmra.mxu2 %v5742_v51  ;;  %v5745_v51 = vld [vmem:[%s7953_s8 + $0xc0] sm:$0xff] }
 0xbb6   :  { %v3975_v60 = vmax.f32 %v3941_v62, 0.0  ;;  %v7866_v62 = vpop.permute.xlu2 %4368 }
 0xbb8   :  { %v4007_v10 = vpack.c.bf16 %v3975_v60, %v3975_v60 }
 0xbba   :  { %v4484_v46 = vunpack.c.l.b16 %v4007_v10 }
 0xbbb   :  { %v3942_v21 = vpop.f32.mrf.mxu3 }
 0xbbc   :  { %v3943_v24 = vadd.f32 %v3942_v21, %v7704_v58  ;;  %v3971_v58 = vmax.f32 %v3931_v34, 0.0  ;;  %v7854_v5 = vpop.permute.xlu1 %4378  ;;  %v4071_v34 = vpop.permute.xlu0 %4070 }
 0xbbe   :  { %v3976_v17 = vmax.f32 %v3943_v24, 0.0  ;;  %v4003_v32 = vpack.c.bf16 %v3971_v58, %v3971_v58  ;;  %v4051_v60 = vpop.permute.xlu2 %4050 }
 0xbc0   :  { %v4008_v19 = vpack.c.bf16 %v3976_v17, %v3976_v17  ;;  %v4480_v14 = vunpack.c.l.b16 %v4003_v32 }
 0xbc2   :  { %v4485_v22 = vunpack.c.l.b16 %v4008_v19  ;;  %v4491_v48 = vpack.c.b16 %v4481_v7, %v4480_v14  ;;  %v5749_v7 = vld [vmem:[%s7953_s8 + $0xe0] sm:$0xff] }
 0xbc4   :  { %v4493_v27 = vpack.c.b16 %v4485_v22, %v4484_v46  ;;  %v4061_v36 = vpop.permute.xlu1 %4060  ;;  %v4056_v10 = vpop.permute.xlu0 %4055 }
 0xbc5   :  { %4257 = vmatmul.bf16.gmra.mxu2 %v5743_v33 }
 0xbc6   :  { %4502 = vmatpush.bf16.msra.mxu1 %v4493_v27 }
 0xbca   :  { %4503 = vmatpush.bf16.msra.mxu1 %v4492_v41 }
 0xbce   :  { %4504 = vmatpush.bf16.msra.mxu1 %v4491_v48 }
 0xbd2   :  { %4505 = vmatpush.bf16.msra.mxu1 %v4490_v12 }
 0xbd5   :  { %4262 = vmatmul.bf16.gmra.mxu2 %v5744_v59 }
 0xbd6   :  { %4506 = vmatpush.bf16.msra.mxu1 %v7804_v35 }
 0xbda   :  { %4507 = vmatpush.bf16.msra.mxu1 %v7797_v13  ;;  %v4046_v13 = vpop.permute.xlu1 %4045 }
 0xbde   :  { %4508 = vmatpush.bf16.msra.mxu1 %v7791_v55 }
 0xbe2   :  { %4509 = vmatpush.bf16.msra.mxu1 %v7782_v56 }
 0xbe5   :  { %4510 = vmatmul.bf16.vlgmr.msra.gmra.mxu1 %v5745_v51 }
 0xbe8   :  { %v4228_v35 = vpop.f32.mrf.mxu2 }
 0xbe9   :  { %v4229_v42 = vadd.f32 %v4228_v35, %v4046_v13  ;;  %v7903_v13 = vpop.permute.xlu1 %4363 }
 0xbeb   :  { %v4268_v57 = vmax.f32 %v4229_v42, 0.0 }
 0xbf0   :  { %v4230_v21 = vpop.f32.mrf.mxu2 }
 0xbf1   :  { %v4231_v55 = vadd.f32 %v4230_v21, %v4051_v60 }
 0xbf3   :  { %v4269_v24 = vmax.f32 %v4231_v55, 0.0  ;;  %v4339_v55 = vpop.permute.xlu1 %4338 }
 0xbf5   :  { %v7873_v56 = vpack.c.bf16 %v4269_v24, %v4268_v57  ;;  %4515 = vmatmul.bf16.gmra.mxu1 %v5746_v44 }
 0xbf8   :  { %v4233_v37 = vpop.f32.mrf.mxu2 }
 0xbf9   :  { %v4234_v17 = vadd.f32 %v4233_v37, %v4056_v10 }
 0xbfb   :  { %v4270_v19 = vmax.f32 %v4234_v17, 0.0 }
 0xc00   :  { %v4235_v15 = vpop.f32.mrf.mxu2 }
 0xc01   :  { %v4236_v63 = vadd.f32 %v4235_v15, %v4061_v36  ;;  %v5752_v36 = vld [vmem:[%s7953_s8 + $0xf8] sm:$0xff] }
 0xc03   :  { %v4271_v40 = vmax.f32 %v4236_v63, 0.0 }
 0xc05   :  { %v7878_v33 = vpack.c.bf16 %v4271_v40, %v4270_v19  ;;  %4520 = vmatmul.bf16.gmra.mxu1 %v5747_v2 }
 0xc08   :  { %v4238_v58 = vpop.f32.mrf.mxu2 }
 0xc09   :  { %v4239_v61 = vadd.f32 %v4238_v58, %v4066_v31  ;;  %v7896_v31 = vpop.permute.xlu0 %4373 }
 0xc0b   :  { %v4272_v38 = vmax.f32 %v4239_v61, 0.0 }
 0xc10   :  { %v4240_v46 = vpop.f32.mrf.mxu2 }
 0xc11   :  { %v4241_v22 = vadd.f32 %v4240_v46, %v4071_v34  ;;  %v7901_v35 = vpop.permute.xlu0 %4358 }
 0xc13   :  { %v4273_v18 = vmax.f32 %v4241_v22, 0.0 }
 0xc15   :  { %v7883_v27 = vpack.c.bf16 %v4273_v18, %v4272_v38  ;;  %4525 = vmatmul.bf16.gmra.mxu1 %v5748_v52 }
 0xc18   :  { %v4243_v53 = vpop.f32.mrf.mxu2 }
 0xc19   :  { %v4244_v32 = vadd.f32 %v4243_v53, %v7840_v11  ;;  %v4354_v60 = vpop.permute.xlu0 %4353 }
 0xc1b   :  { %v4274_v41 = vmax.f32 %v4244_v32, 0.0 }
 0xc20   :  { %v4245_v23 = vpop.f32.mrf.mxu2 }
 0xc21   :  { %v4246_v20 = vadd.f32 %v4245_v23, %v7842_v16  ;;  %v5751_v16 = vld [vmem:[%s7953_s8 + $0xf0] sm:$0xff] }
 0xc23   :  { %v4275_v4 = vmax.f32 %v4246_v20, 0.0  ;;  %v4349_v20 = vpop.permute.xlu2 %4348 }
 0xc25   :  { %v4287_v14 = vpack.c.bf16 %v4275_v4, %v4274_v41  ;;  %4530 = vmatmul.bf16.gmra.mxu1 %v5749_v7 }
 0xc28   :  { %v4248_v26 = vpop.f32.mrf.mxu2 }
 0xc2b   :  { %v4344_v4 = vpop.permute.xlu2 %4343 }
 0xc30   :  { %v4250_v48 = vpop.f32.mrf.mxu2 }
 0xc31   :  { %v4251_v58 = vadd.f32 %v4250_v48, %v7826_v6 }
 0xc35   :  { %4535 = vmatmul.bf16.gmra.mxu1 %v5750_v45 }
 0xc38   :  { %v4253_v12 = vpop.f32.mrf.mxu2 }
 0xc39   :  { %v4254_v19 = vadd.f32 %v4253_v12, %v7819_v43 }
 0xc3b   :  { %v4278_v52 = vmax.f32 %v4254_v19, 0.0 }
 0xc40   :  { %v4255_v11 = vpop.f32.mrf.mxu2 }
 0xc41   :  { %v4256_v15 = vadd.f32 %v4255_v11, %v7821_v29  ;;  %v4277_v29 = vmax.f32 %v4251_v58, 0.0 }
 0xc43   :  { %v4279_v61 = vmax.f32 %v4256_v15, 0.0 }
 0xc45   :  { %4540 = vmatmul.bf16.gmra.mxu1 %v5751_v16  ;;  %v4289_v18 = vpack.c.bf16 %v4279_v61, %v4278_v52  ;;  %v5621_v16 = vld [vmem:[%s7954_s6 + $0xc] sm:$0xf] }
 0xc48   :  { %v4258_v59 = vpop.f32.mrf.mxu2 }
 0xc49   :  { %v4259_v37 = vadd.f32 %v4258_v59, %v7814_v3  ;;  %v4249_v3 = vadd.f32 %v4248_v26, %v7851_v8 }
 0xc4b   :  { %v4280_v40 = vmax.f32 %v4259_v37, 0.0  ;;  %v4276_v43 = vmax.f32 %v4249_v3, 0.0 }
 0xc4d   :  { %v4288_v6 = vpack.c.bf16 %v4277_v29, %v4276_v43 }
 0xc50   :  { %v4260_v51 = vpop.f32.mrf.mxu2 }
 0xc51   :  { %v4261_v57 = vadd.f32 %v4260_v51, %v7844_v49 }
 0xc53   :  { %v4281_v63 = vmax.f32 %v4261_v57, 0.0 }
 0xc55   :  { %4545 = vmatmul.bf16.gmra.mxu1 %v5752_v36  ;;  %v4290_v49 = vpack.c.bf16 %v4281_v63, %v4280_v40 }
 0xc58   :  { %v4263_v42 = vpop.f32.mrf.mxu2 }
 0xc59   :  { %v4264_v21 = vadd.f32 %v4263_v42, %v7838_v50  ;;  %v4329_v50 = vpop.permute.xlu0 %4328 }
 0xc5b   :  { %v4282_v10 = vmax.f32 %v4264_v21, 0.0 }
 0xc60   :  { %v4265_v44 = vpop.f32.mrf.mxu2 }
 0xc61   :  { %v4266_v24 = vadd.f32 %v4265_v44, %v7812_v9  ;;  %v4334_v9 = vpop.permute.xlu1 %4333  ;;  %v4601_v43 = vpop.permute.xlu0 %4600 }
 0xc62   :  { %v4511_v34 = vpop.f32.mrf.mxu1 }
 0xc63   :  { %v4283_v17 = vmax.f32 %v4266_v24, 0.0  ;;  %v4512_v46 = vadd.f32 %v4511_v34, %v4329_v50 }
 0xc65   :  { %v4291_v2 = vpack.c.bf16 %v4283_v17, %v4282_v10  ;;  %v4551_v53 = vmax.f32 %v4512_v46, 0.0 }
 0xc67   :  { %4584 = vmatpush.bf16.msra.mxu0 %v4291_v2 }
 0xc6a   :  { %v4513_v22 = vpop.f32.mrf.mxu1 }
 0xc6b   :  { %v4514_v38 = vadd.f32 %v4513_v22, %v4334_v9  ;;  %4585 = vmatpush.bf16.msra.mxu0 %v4290_v49 }
 0xc6d   :  { %v4552_v32 = vmax.f32 %v4514_v38, 0.0 }
 0xc6f   :  { %v7913_v23 = vpack.c.bf16 %v4552_v32, %v4551_v53  ;;  %4586 = vmatpush.bf16.msra.mxu0 %v4289_v18 }
 0xc72   :  { %v4516_v7 = vpop.f32.mrf.mxu1 }
 0xc73   :  { %4587 = vmatpush.bf16.msra.mxu0 %v4288_v6  ;;  %v4517_v41 = vadd.f32 %v4516_v7, %v4339_v55 }
 0xc75   :  { %v4553_v26 = vmax.f32 %v4517_v41, 0.0 }
 0xc77   :  { %4588 = vmatpush.bf16.msra.mxu0 %v4287_v14 }
 0xc7a   :  { %v4518_v48 = vpop.f32.mrf.mxu1 }
 0xc7b   :  { %v4519_v8 = vadd.f32 %v4518_v48, %v4344_v4  ;;  %4589 = vmatpush.bf16.msra.mxu0 %v7883_v27 }
 0xc7d   :  { %v4554_v45 = vmax.f32 %v4519_v8, 0.0 }
 0xc7f   :  { %v4568_v12 = vpack.c.bf16 %v4554_v45, %v4553_v26  ;;  %4590 = vmatpush.bf16.msra.mxu0 %v7878_v33 }
 0xc82   :  { %v4521_v11 = vpop.f32.mrf.mxu1 }
 0xc83   :  { %4591 = vmatpush.bf16.msra.mxu0 %v7873_v56  ;;  %v4522_v14 = vadd.f32 %v4521_v11, %v4349_v20 }
 0xc85   :  { %v4555_v36 = vmax.f32 %v4522_v14, 0.0 }
 0xc86   :  { %4592 = vmatmul.bf16.vlgmr.msra.gmra.mxu0 %v5621_v16  ;;  %v4611_v16 = vpop.permute.xlu1 %4610 }
 0xc8a   :  { %v4523_v59 = vpop.f32.mrf.mxu1 }
 0xc8b   :  { %v4524_v51 = vadd.f32 %v4523_v59, %v4354_v60 }
 0xc8d   :  { %v4556_v42 = vmax.f32 %v4524_v51, 0.0 }
 0xc8f   :  { %v4569_v21 = vpack.c.bf16 %v4556_v42, %v4555_v36 }
 0xc92   :  { %v4526_v27 = vpop.f32.mrf.mxu1 }
 0xc93   :  { %v4527_v55 = vadd.f32 %v4526_v27, %v7901_v35 }
 0xc95   :  { %v4557_v57 = vmax.f32 %v4527_v55, 0.0 }
 0xc9a   :  { %v4528_v44 = vpop.f32.mrf.mxu1 }
 0xc9b   :  { %v4529_v33 = vadd.f32 %v4528_v44, %v7903_v13 }
 0xc9d   :  { %v4558_v24 = vmax.f32 %v4529_v33, 0.0 }
 0xc9f   :  { %v4570_v56 = vpack.c.bf16 %v4558_v24, %v4557_v57 }
 0xca2   :  { %v4531_v34 = vpop.f32.mrf.mxu1 }
 0xcaa   :  { %v4533_v37 = vpop.f32.mrf.mxu1 }
 0xcab   :  { %v4534_v3 = vadd.f32 %v4533_v37, %v7896_v31 }
 0xcb2   :  { %v4536_v10 = vpop.f32.mrf.mxu1 }
 0xcb3   :  { %v4537_v9 = vadd.f32 %v4536_v10, %v7854_v5  ;;  %v5623_v5 = vld [vmem:[%s7955_s10 + $0xc] sm:$0xf] }
 0xcb5   :  { %v4561_v38 = vmax.f32 %v4537_v9, 0.0 }
 0xcba   :  { %v4538_v17 = vpop.f32.mrf.mxu1 }
 0xcbb   :  { %v4539_v61 = vadd.f32 %v4538_v17, %v7857_v47  ;;  %v4582_v47 = vpop.permute.xlu2 %4581 }
 0xcc2   :  { %v4541_v15 = vpop.f32.mrf.mxu1 }
 0xcc3   :  { %v4542_v50 = vadd.f32 %v4541_v15, %v7868_v1 }
 0xcc5   :  { %v4563_v22 = vmax.f32 %v4542_v50, 0.0 }
 0xcca   :  { %v4543_v63 = vpop.f32.mrf.mxu1 }
 0xccb   :  { %v4544_v40 = vadd.f32 %v4543_v63, %v7846_v30  ;;  %v4532_v30 = vadd.f32 %v4531_v34, %v7866_v62 }
 0xccd   :  { %v4564_v49 = vmax.f32 %v4544_v40, 0.0  ;;  %v4559_v29 = vmax.f32 %v4532_v30, 0.0 }
 0xccf   :  { %v4573_v52 = vpack.c.bf16 %v4564_v49, %v4563_v22 }
 0xcd2   :  { %v4546_v2 = vpop.f32.mrf.mxu1 }
 0xcd3   :  { %v4547_v60 = vadd.f32 %v4546_v2, %v7830_v0  ;;  %v4562_v0 = vmax.f32 %v4539_v61, 0.0 }
 0xcd5   :  { %v4565_v13 = vmax.f32 %v4547_v60, 0.0  ;;  %v4572_v1 = vpack.c.bf16 %v4562_v0, %v4561_v38 }
 0xcda   :  { %v4548_v19 = vpop.f32.mrf.mxu1 }
 0xcdb   :  { %v4549_v35 = vadd.f32 %v4548_v19, %v7860_v54  ;;  %v4560_v54 = vmax.f32 %v4534_v3, 0.0 }
 0xcdd   :  { %v4566_v58 = vmax.f32 %v4549_v35, 0.0  ;;  %v4571_v18 = vpack.c.bf16 %v4560_v54, %v4559_v29 }
 0xcdf   :  { %v4574_v46 = vpack.c.bf16 %v4566_v58, %v4565_v13 }
 0xce1   :  { %4613 = vmatpush.bf16.msrb.mxu2 %v4574_v46 }
 0xce5   :  { %4614 = vmatpush.bf16.msrb.mxu2 %v4573_v52 }
 0xce9   :  { %4615 = vmatpush.bf16.msrb.mxu2 %v4572_v1 }
 0xced   :  { %4616 = vmatpush.bf16.msrb.mxu2 %v4571_v18 }
 0xcf1   :  { %4617 = vmatpush.bf16.msrb.mxu2 %v4570_v56 }
 0xcf5   :  { %4618 = vmatpush.bf16.msrb.mxu2 %v4569_v21 }
 0xcf9   :  { %4619 = vmatpush.bf16.msrb.mxu2 %v4568_v12 }
 0xcfd   :  { %4620 = vmatpush.bf16.msrb.mxu2 %v7913_v23  ;;  %v4627_v23 = vmul.f32 %v4601_v43, %v7656_v28 }
 0xd00   :  { %4621 = vmatmul.bf16.vlgmr.msrb.gmra.mxu2 %v5623_v5 }
 0xd03   :  { %v4593_v62 = vpop.f32.mrf.mxu0 }
 0xd04   :  { %v4594_v31 = vadd.f32 %v4593_v62, %v4582_v47 }
 0xd06   :  { %5771 = vtanh.f32 %v4594_v31 }
 0xd0b   :  { %v4595_v53 = vpop.f32.mrf.mxu0 }
 0xd0c   :  { %v5772_v32 = vpop.eup %5771 }
 0xd0d   :  { %v4603_v20 = vmul.f32 %v5772_v32, %v4601_v43 }
 0xd0f   :  { %v4628_v6 = vmul.f32 1.442695, %v4603_v20  ;;  %v4633_v7 = vrot.slane %v4603_v20, 4 }
 0xd11   :  { %5773 = vpow2.f32 %v4628_v6  ;;  %v4634_v41 = vadd.f32 %v4633_v7, %v4603_v20 }
 0xd13   :  { %v4635_v4 = vrot.slane %v4634_v41, 2 }
 0xd15   :  { %v4636_v48 = vadd.f32 %v4635_v4, %v4634_v41 }
 0xd17   :  { %v5774_v8 = vpop.eup %5773  ;;  %v4637_v26 = vrot.slane %v4636_v48, 1 }
 0xd18   :  { %v4630_v45 = vmul.f32 %v5774_v8, %v4627_v23 }
 0xd19   :  { %v4638_v12 = vadd.f32 %v4637_v26, %v4636_v48 }
 0xd1a   :  { %v4631_v36 = vadd.f32 %v4630_v45, %v7659_v25 }
 0xd1b   :  { %v4639_v11 = vadd.f32 %v4638_v12, %v7653_v39 }
 0xd1d   :  { %4641 = vst [vmem:[%s7956_s13] sm:$0x1] %v4639_v11 }
 0xd83   :  { %v4622_v14 = vpop.f32.mrf.mxu2 }
 0xd84   :  { %v4623_v59 = vadd.f32 %v4622_v14, %v4611_v16 }
 0xd86   :  { %v4626_v51 = vmul.f32 %v4623_v59, %v4601_v43 }
 0xd88   :  { %v4632_v42 = vadd.f32 %v4631_v36, %v4626_v51 }
 0xd8a   :  { %4640 = vst [vmem:[%s7957_s12] sm:$0xff] %v4632_v42 }
 0xd8b   :  { %v4624_v28 = vpop.f32.mrf.mxu2 }

</bundles_post_ra>
